<compile_context>
chip_gen: v7x
topology: tpu7x:2x2x1
jax: 0.10.0
libtpu: 0.0.40
codegen_flags: <defaults>
</compile_context>

<pallas_src>
import math
from dataclasses import dataclass
from typing import Optional

import numpy as np
import jax
import jax.numpy as jnp
from jax.experimental import pallas as pl
from jax.experimental.pallas import tpu as pltpu

HIDDEN = 32            # small hidden size for the example (module default is 128)
NUM_LSTM_LAYERS = 2
TEMPERATURE = 1.0
BATCH = 2              # real batch
B_PAD = 8              # batch padded to f32 sublane count -> full (8,128) tiles
HEAD_PAD = 128         # every head output padded to one full lane group
EMB_PAD = 8            # choice-embedding tables padded along the choice dim
NEG_INF = -1e30        # additive mask for padded head columns

FFN_TYPE_MOE = 1
ATTN_TYPE_SLIDING_WINDOW = 1


# ----------------------------------------------------------------------------
# Synthetic search space (stand-in for the original SearchSpace object)
# ----------------------------------------------------------------------------
class SearchSpace:
    def get_discrete_choices(self):
        return {
            "model_type": ["encoder", "decoder", "encoder_decoder"],
            "attention_type": ["standard", "sliding_window", "linear"],
            "ffn_type": ["dense", "moe"],
            "norm_type": ["layernorm", "rmsnorm"],
            "learning_rate": [1e-4, 3e-4, 1e-3, 3e-3],
        }

    def get_continuous_ranges(self):
        return {
            "num_layers": (2.0, 12.0),
            "num_heads": (2.0, 16.0),
            "hidden_size": (128.0, 1024.0),
            "intermediate_ratio": (2.0, 4.0),
            "dropout": (0.0, 0.3),
            "num_experts": (2.0, 8.0),
            "experts_per_token": (1.0, 2.0),
            "window_size": (64.0, 512.0),
        }


@dataclass
class ArchitectureConfig:
    model_type: int
    attention_type: int
    ffn_type: int
    norm_type: int
    num_layers: int
    num_heads: int
    hidden_size: int
    intermediate_size: int
    dropout: float
    learning_rate: float
    num_experts: Optional[int] = None
    experts_per_token: Optional[int] = None
    window_size: Optional[int] = None


# ----------------------------------------------------------------------------
# Fused Pallas kernel: all 13 controller steps in one invocation.
#   - LSTM state (h, c) carried as values, never leaves the chip.
#   - per-layer gates via ONE matmul on concat([x, h]) with pre-concatenated
#     (2H, 4H) weights and pre-summed bias.
#   - discrete steps: Gumbel-max sampling + log-prob + embedding lookup,
#     all in-kernel.
#   - continuous steps: raw = mean + exp(log_std) * eps, log-prob in-kernel.
# ----------------------------------------------------------------------------
def make_controller_kernel(L, H, num_choices, n_cont, temperature):
    n_disc = len(num_choices)
    inv_t = 1.0 / float(temperature)
    half_log_2pi = 0.5 * math.log(2.0 * math.pi)

    def kernel(w_cat_ref, b_ref, wh_ref, bh_ref, emb_ref, mask_ref,
               gumbel_ref, eps_ref,
               choice_ref, dlogp_ref, raw_ref, clogp_ref):
        B = gumbel_ref.shape[1]

        def lstm_step(x, h, c):
            inp = x
            nh, nc = [], []
            for l in range(L):                                   # static unroll
                xz = jnp.concatenate([inp, h[l]], axis=-1)       # (B, 2H)
                gates = (jnp.dot(xz, w_cat_ref[l],
                                 preferred_element_type=jnp.float32)
                         + b_ref[l])                             # (B, 4H)
                i_g = jax.nn.sigmoid(gates[:, 0 * H:1 * H])
                f_g = jax.nn.sigmoid(gates[:, 1 * H:2 * H])
                g_g = jnp.tanh(gates[:, 2 * H:3 * H])
                o_g = jax.nn.sigmoid(gates[:, 3 * H:4 * H])
                cn = f_g * c[l] + i_g * g_g
                hn = o_g * jnp.tanh(cn)
                nh.append(hn)
                nc.append(cn)
                inp = hn
            return inp, nh, nc

        h = [jnp.zeros((B, H), jnp.float32) for _ in range(L)]
        c = [jnp.zeros((B, H), jnp.float32) for _ in range(L)]
        x = jnp.zeros((B, H), jnp.float32)

        # ---------------- discrete steps ----------------
        choice_cols, dlogp_cols = [], []
        for si in range(n_disc):                                 # static unroll
            out, h, c = lstm_step(x, h, c)
            logits = (jnp.dot(out, wh_ref[si],
                              preferred_element_type=jnp.float32)
                      + bh_ref[si]) * inv_t                      # (B, HEAD_PAD)
            logits_m = logits + mask_ref[si]                     # pad cols -> -1e30

            # Gumbel-max categorical sample (first-occurrence tie break, like argmax)
            z = logits_m + gumbel_ref[si]
            col = jax.lax.broadcasted_iota(jnp.int32, z.shape, 1)
            zmax = jnp.max(z, axis=-1, keepdims=True)
            choice = jnp.min(jnp.where(z >= zmax, col, z.shape[-1]),
                             axis=-1, keepdims=True)             # (B, 1) int32

            # log prob under softmax(logits / T); masked columns underflow to 0
            m = jnp.max(logits_m, axis=-1, keepdims=True)
            lse = m + jnp.log(jnp.sum(jnp.exp(logits_m - m),
                                      axis=-1, keepdims=True))
            ls = logits_m - lse
            logp = jnp.sum(jnp.where(col == choice, ls, 0.0),
                           axis=-1, keepdims=True)               # (B, 1)

            choice_cols.append(choice)
            dlogp_cols.append(logp)

            # next LSTM input = embedding of the sampled choice (VMEM-resident)
            emb_s = emb_ref[si]                                  # (EMB_PAD, H)
            x = jnp.zeros((B, H), jnp.float32)
            for j in range(num_choices[si]):                     # <= 4 selects
                sel = (choice == j).astype(jnp.float32)          # (B, 1)
                x = x + sel * emb_s[j:j + 1, :]

        choice_ref[...] = jnp.concatenate(choice_cols, axis=-1)  # (B, n_disc)
        dlogp_ref[...] = jnp.concatenate(dlogp_cols, axis=-1)

        # ---------------- continuous steps ----------------
        raw_cols, clogp_cols = [], []
        for si in range(n_cont):                                 # static unroll
            out, h, c = lstm_step(x, h, c)
            stats = (jnp.dot(out, wh_ref[n_disc + si],
                             preferred_element_type=jnp.float32)
                     + bh_ref[n_disc + si])                      # (B, HEAD_PAD)
            mean = stats[:, 0:1]
            log_std = stats[:, 1:2]
            eps = eps_ref[si]                                    # (B, 1)
            raw = mean + jnp.exp(log_std) * eps
            # Normal(mean, std).log_prob(raw) with (raw-mean)/std == eps
            logp = -0.5 * eps * eps - log_std - half_log_2pi
            raw_cols.append(raw)
            clogp_cols.append(logp)
            # NOTE: reference module does NOT feed anything back into x here.

        raw_ref[...] = jnp.concatenate(raw_cols, axis=-1)        # (B, n_cont)
        clogp_ref[...] = jnp.concatenate(clogp_cols, axis=-1)

    return kernel


# ----------------------------------------------------------------------------
# Parameter init (deterministic, mimics shapes of the PyTorch __init__)
# ----------------------------------------------------------------------------
class KeyGen:
    def __init__(self, key):
        self.key = key

    def __call__(self):
        self.key, sub = jax.random.split(self.key)
        return sub


def init_params(key, search_space, hidden=HIDDEN, L=NUM_LSTM_LAYERS):
    kg = KeyGen(key)
    k = 1.0 / math.sqrt(hidden)
    u = lambda shape: jax.random.uniform(kg(), shape, jnp.float32, -k, k)
    params = {}

    # choice embeddings: (num_choices, hidden), N(0, 1) like nn.Embedding default
    params["emb"] = {
        name: jax.random.normal(kg(), (len(ch), hidden), jnp.float32)
        for name, ch in search_space.get_discrete_choices().items()
    }

    # LSTM: stored pre-transposed as (L, in, 4H); biases as (L, 1, 4H)
    params["lstm"] = {
        "wih_t": u((L, hidden, 4 * hidden)),
        "whh_t": u((L, hidden, 4 * hidden)),
        "bih": u((L, 1, 4 * hidden)),
        "bhh": u((L, 1, 4 * hidden)),
    }

    def padded_head(out_dim):
        w = u((hidden, out_dim))
        b = u((1, out_dim))
        w_pad = jnp.zeros((hidden, HEAD_PAD), jnp.float32).at[:, :out_dim].set(w)
        b_pad = jnp.zeros((1, HEAD_PAD), jnp.float32).at[:, :out_dim].set(b)
        return w_pad, b_pad

    params["discrete_heads"] = {
        name: padded_head(len(ch))
        for name, ch in search_space.get_discrete_choices().items()
    }
    params["continuous_heads"] = {
        name: padded_head(2)
        for name in search_space.get_continuous_ranges().keys()
    }
    return params


def pack_params(params, search_space, hidden=HIDDEN, L=NUM_LSTM_LAYERS):
    """Pack params for the fused kernel (concat LSTM weights, stacked heads)."""
    disc = search_space.get_discrete_choices()
    cont = search_space.get_continuous_ranges()
    disc_names = list(disc.keys())
    cont_names = list(cont.keys())
    lstm = params["lstm"]

    packed = {
        # fused [wih; whh] -> (L, 2H, 4H), bias pre-summed -> (L, 1, 4H)
        "w_cat": jnp.concatenate([lstm["wih_t"], lstm["whh_t"]], axis=1),
        "b_sum": lstm["bih"] + lstm["bhh"],
        # stacked heads (discrete first, then continuous): (13, H, 128)/(13, 1, 128)
        "wh": jnp.stack([params["discrete_heads"][n][0] for n in disc_names]
                        + [params["continuous_heads"][n][0] for n in cont_names]),
        "bh": jnp.stack([params["discrete_heads"][n][1] for n in disc_names]
                        + [params["continuous_heads"][n][1] for n in cont_names]),
    }

    # embedding tables padded along the choice dim: (n_disc, EMB_PAD, H)
    emb_list = []
    for n in disc_names:
        e = params["emb"][n]
        emb_list.append(jnp.zeros((EMB_PAD, hidden), jnp.float32).at[:e.shape[0]].set(e))
    packed["emb"] = jnp.stack(emb_list)

    # additive masks for padded head columns: (n_disc, 1, HEAD_PAD)
    masks = []
    for n in disc_names:
        nc = len(disc[n])
        m = jnp.where(jnp.arange(HEAD_PAD) < nc, 0.0, NEG_INF).astype(jnp.float32)
        masks.append(m.reshape(1, HEAD_PAD))
    packed["mask"] = jnp.stack(masks)
    return packed


# ----------------------------------------------------------------------------
# Single fused pallas_call for the whole controller forward (hot path)
# ----------------------------------------------------------------------------
def run_fused(params, search_space, gumbel, eps,
              hidden=HIDDEN, L=NUM_LSTM_LAYERS, temperature=TEMPERATURE):
    disc = search_space.get_discrete_choices()
    cont = search_space.get_continuous_ranges()
    num_choices = tuple(len(v) for v in disc.values())
    n_disc, n_cont = len(disc), len(cont)
    B = gumbel.shape[1]

    packed = pack_params(params, search_space, hidden=hidden, L=L)
    kernel = make_controller_kernel(L, hidden, num_choices, n_cont, temperature)
    vmem = pl.BlockSpec(memory_space=pltpu.MemorySpace.VMEM)

    return pl.pallas_call(
        kernel,
        out_shape=(
            jax.ShapeDtypeStruct((B, n_disc), jnp.int32),    # sampled choice indices
            jax.ShapeDtypeStruct((B, n_disc), jnp.float32),  # discrete log probs
            jax.ShapeDtypeStruct((B, n_cont), jnp.float32),  # raw continuous samples
            jax.ShapeDtypeStruct((B, n_cont), jnp.float32),  # continuous log probs
        ),
        in_specs=[vmem] * 8,
        out_specs=(vmem, vmem, vmem, vmem),
        # TODO(synk): if batch ever grows, add a leading "parallel" batch grid
        # axis (dimension_semantics) so v7x's second TensorCore can be used.
    )(packed["w_cat"], packed["b_sum"], packed["wh"], packed["bh"],
      packed["emb"], packed["mask"], gumbel, eps)


# ----------------------------------------------------------------------------
# Pure-JAX reference of the fused kernel (same pre-drawn noise) for sanity check
# ----------------------------------------------------------------------------
def controller_ref_outputs(params, search_space, gumbel, eps, B=B_PAD,
                           hidden=HIDDEN, L=NUM_LSTM_LAYERS, temperature=TEMPERATURE):
    disc = search_space.get_discrete_choices()
    cont = search_space.get_continuous_ranges()
    lstm = params["lstm"]
    H = hidden
    h = [jnp.zeros((B, H), jnp.float32) for _ in range(L)]
    c = [jnp.zeros((B, H), jnp.float32) for _ in range(L)]
    x = jnp.zeros((B, H), jnp.float32)

    def step(x, h, c):
        inp = x
        nh, nc = [], []
        for l in range(L):
            gates = (inp @ lstm["wih_t"][l] + h[l] @ lstm["whh_t"][l]
                     + lstm["bih"][l] + lstm["bhh"][l])
            i_g = jax.nn.sigmoid(gates[:, 0 * H:1 * H])
            f_g = jax.nn.sigmoid(gates[:, 1 * H:2 * H])
            g_g = jnp.tanh(gates[:, 2 * H:3 * H])
            o_g = jax.nn.sigmoid(gates[:, 3 * H:4 * H])
            cn = f_g * c[l] + i_g * g_g
            hn = o_g * jnp.tanh(cn)
            nh.append(hn)
            nc.append(cn)
            inp = hn
        return inp, nh, nc

    choices, dlogps, raws, clogps = [], [], [], []
    for k, (name, ch_list) in enumerate(disc.items()):
        out, h, c = step(x, h, c)
        wp, bp = params["discrete_heads"][name]
        n = len(ch_list)
        logits = (out @ wp + bp)[:, :n] / temperature
        z = logits + gumbel[k, :, :n]
        choice = jnp.argmax(z, axis=-1)
        logp = jax.nn.log_softmax(logits, axis=-1)[jnp.arange(B), choice]
        choices.append(choice)
        dlogps.append(logp)
        x = params["emb"][name][choice]
    for k, name in enumerate(cont.keys()):
        out, h, c = step(x, h, c)
        wp, bp = params["continuous_heads"][name]
        stats = (out @ wp + bp)[:, :2]
        mean, log_std = stats[:, 0], stats[:, 1]
        e = eps[k, :, 0]
        raw = mean + jnp.exp(log_std) * e
        logp = -0.5 * e * e - log_std - 0.5 * math.log(2.0 * math.pi)
        raws.append(raw)
        clogps.append(logp)
    return (jnp.stack(choices, axis=-1).astype(jnp.int32),
            jnp.stack(dlogps, axis=-1),
            jnp.stack(raws, axis=-1),
            jnp.stack(clogps, axis=-1))


# ----------------------------------------------------------------------------
# Forward pass (mirrors ArchitectureController.forward)
# ----------------------------------------------------------------------------
def draw_noise(key, n_disc, n_cont):
    kg, kn = jax.random.split(key)
    gumbel = jax.random.gumbel(kg, (n_disc, B_PAD, HEAD_PAD), jnp.float32)
    eps = jax.random.normal(kn, (n_cont, B_PAD, 1), jnp.float32)
    return gumbel, eps


def controller_forward(params, search_space, key, batch_size=BATCH,
                       temperature=TEMPERATURE):
    disc = search_space.get_discrete_choices()
    cont = search_space.get_continuous_ranges()
    disc_names = list(disc.keys())
    cont_names = list(cont.keys())
    n_disc, n_cont = len(disc_names), len(cont_names)
    assert batch_size <= B_PAD

    gumbel, eps = draw_noise(key, n_disc, n_cont)
    choice_pad, dlogp_pad, raw_pad, clogp_pad = run_fused(
        params, search_space, gumbel, eps, temperature=temperature)

    # drop padded batch rows before any log-prob accumulation / config building
    choice = choice_pad[:batch_size]
    dlogp = dlogp_pad[:batch_size]
    raw = raw_pad[:batch_size]
    clogp = clogp_pad[:batch_size]

    discrete_choices = {name: choice[:, k] for k, name in enumerate(disc_names)}
    continuous_params = {}
    for k, name in enumerate(cont_names):
        min_val, max_val = cont[name]
        # NOTE: matches reference — no clamp on log_std before exp.
        p = jax.nn.sigmoid(raw[:, k]) * (max_val - min_val) + min_val
        p = jnp.clip(p, min_val, max_val)
        if name in ["num_layers", "num_heads", "hidden_size", "num_experts"]:
            p = jnp.round(p)
        continuous_params[name] = p

    total_log_prob = dlogp.sum(axis=-1) + clogp.sum(axis=-1)   # (B,)
    return discrete_choices, continuous_params, total_log_prob


def build_configs(discrete_choices, continuous_params, batch_size):
    dc = {k: np.asarray(jax.device_get(v)) for k, v in discrete_choices.items()}
    cp = {k: np.asarray(jax.device_get(v)) for k, v in continuous_params.items()}
    configs = []
    for i in range(batch_size):
        cfg = ArchitectureConfig(
            model_type=int(dc["model_type"][i]),
            attention_type=int(dc["attention_type"][i]),
            ffn_type=int(dc["ffn_type"][i]),
            norm_type=int(dc["norm_type"][i]),
            num_layers=int(cp["num_layers"][i]),
            num_heads=int(cp["num_heads"][i]),
            hidden_size=int(cp["hidden_size"][i]),
            intermediate_size=int(cp["hidden_size"][i] * cp["intermediate_ratio"][i]),
            dropout=float(cp["dropout"][i]),
            # matches reference: uses the sampled *index* cast to float
            learning_rate=float(dc["learning_rate"][i]),
        )
        if cfg.ffn_type == FFN_TYPE_MOE:
            cfg.num_experts = int(cp["num_experts"][i])
            cfg.experts_per_token = int(cp["experts_per_token"][i])
        if cfg.attention_type == ATTN_TYPE_SLIDING_WINDOW:
            cfg.window_size = int(cp["window_size"][i])
        configs.append(cfg)
    return configs


if __name__ == "__main__":
    root = jax.random.PRNGKey(0)
    param_key, sample_key, check_key = jax.random.split(root, 3)

    space = SearchSpace()
    params = init_params(param_key, space)
    n_disc = len(space.get_discrete_choices())
    n_cont = len(space.get_continuous_ranges())

    # --- sanity check: fused Pallas kernel vs pure-JAX reference (same noise) ---
    g_chk, e_chk = draw_noise(check_key, n_disc, n_cont)
    got = run_fused(params, space, g_chk, e_chk)
    want = controller_ref_outputs(params, space, g_chk, e_chk, B=B_PAD)
    np.testing.assert_array_equal(np.asarray(got[0]), np.asarray(want[0]))
    for g, w in zip(got[1:], want[1:]):
        np.testing.assert_allclose(np.asarray(g), np.asarray(w), rtol=1e-4, atol=1e-5)

    # --- full controller forward (one fused kernel launch) ---
    discrete_choices, continuous_params, total_log_prob = controller_forward(
        params, space, sample_key, batch_size=BATCH)
    total_log_prob = jax.block_until_ready(total_log_prob)
    configs = build_configs(discrete_choices, continuous_params, BATCH)
    assert len(configs) == BATCH and total_log_prob.shape == (BATCH,)
    assert bool(jnp.all(jnp.isfinite(total_log_prob)))

    print("KERNEL_OK")
</pallas_src>

<mosaic_0001>
module attributes {stable_mosaic.version = 11 : i64} {
  func.func @kernel(%arg0: memref<2x64x128xf32, #tpu.memory_space<vmem>>, %arg1: memref<2x1x128xf32, #tpu.memory_space<vmem>>, %arg2: memref<13x32x128xf32, #tpu.memory_space<vmem>>, %arg3: memref<13x1x128xf32, #tpu.memory_space<vmem>>, %arg4: memref<5x8x32xf32, #tpu.memory_space<vmem>>, %arg5: memref<5x1x128xf32, #tpu.memory_space<vmem>>, %arg6: memref<5x8x128xf32, #tpu.memory_space<vmem>>, %arg7: memref<8x8x1xf32, #tpu.memory_space<vmem>>, %arg8: memref<8x5xi32, #tpu.memory_space<vmem>>, %arg9: memref<8x5xf32, #tpu.memory_space<vmem>>, %arg10: memref<8x8xf32, #tpu.memory_space<vmem>>, %arg11: memref<8x8xf32, #tpu.memory_space<vmem>>) attributes {dimension_semantics = [], scalar_prefetch = 0 : i64, scratch_operands = 0 : i64, tpu.core_type = #tpu.core_type<tc>} {
    %cst = arith.constant 0.000000e+00 : f32
    %0 = vector.broadcast %cst : f32 to vector<8x32xf32>
    %cst_0 = arith.constant 0.000000e+00 : f32
    %1 = vector.broadcast %cst_0 : f32 to vector<8x32xf32>
    %cst_1 = arith.constant 0.000000e+00 : f32
    %2 = vector.broadcast %cst_1 : f32 to vector<8x32xf32>
    %cst_2 = arith.constant 0.000000e+00 : f32
    %3 = vector.broadcast %cst_2 : f32 to vector<8x32xf32>
    %cst_3 = arith.constant 0.000000e+00 : f32
    %4 = vector.broadcast %cst_3 : f32 to vector<8x32xf32>
    %5 = tpu.concatenate %4, %0 in 1 : vector<8x32xf32>, vector<8x32xf32> -> vector<8x64xf32>
    %c0 = arith.constant 0 : index
    %c0_4 = arith.constant 0 : index
    %c0_5 = arith.constant 0 : index
    %6 = vector.load %arg0[%c0, %c0_4, %c0_5] : memref<2x64x128xf32, #tpu.memory_space<vmem>>, vector<1x64x128xf32>
    %7 = vector.shape_cast %6 : vector<1x64x128xf32> to vector<64x128xf32>
    %cst_6 = arith.constant dense<0.000000e+00> : vector<8x128xf32>
    %8 = tpu.matmul %5, %7, %cst_6 {dimension_numbers = #tpu.dot_dimension_numbers<[1], [0], [0], [1], [0, 0, 1, 1], [], []>} : vector<8x64xf32>, vector<64x128xf32>, vector<8x128xf32> -> vector<8x128xf32>
    %c0_7 = arith.constant 0 : index
    %c0_8 = arith.constant 0 : index
    %c0_9 = arith.constant 0 : index
    %9 = vector.load %arg1[%c0_7, %c0_8, %c0_9] : memref<2x1x128xf32, #tpu.memory_space<vmem>>, vector<1x1x128xf32>
    %10 = vector.shape_cast %9 : vector<1x1x128xf32> to vector<1x128xf32>
    %11 = vector.broadcast %10 : vector<1x128xf32> to vector<8x128xf32>
    %12 = arith.addf %8, %11 : vector<8x128xf32>
    %13 = vector.extract_strided_slice %12 {offsets = [0, 0], sizes = [8, 32], strides = [1, 1]} : vector<8x128xf32> to vector<8x32xf32>
    %14 = arith.negf %13 : vector<8x32xf32>
    %15 = math.exp %14 : vector<8x32xf32>
    %cst_10 = arith.constant 1.000000e+00 : f32
    %16 = vector.broadcast %cst_10 : f32 to vector<8x32xf32>
    %17 = arith.addf %16, %15 : vector<8x32xf32>
    %18 = arith.divf %16, %17 : vector<8x32xf32>
    %19 = vector.extract_strided_slice %12 {offsets = [0, 32], sizes = [8, 32], strides = [1, 1]} : vector<8x128xf32> to vector<8x32xf32>
    %20 = arith.negf %19 : vector<8x32xf32>
    %21 = math.exp %20 : vector<8x32xf32>
    %cst_11 = arith.constant 1.000000e+00 : f32
    %22 = vector.broadcast %cst_11 : f32 to vector<8x32xf32>
    %23 = arith.addf %22, %21 : vector<8x32xf32>
    %24 = arith.divf %22, %23 : vector<8x32xf32>
    %25 = vector.extract_strided_slice %12 {offsets = [0, 64], sizes = [8, 32], strides = [1, 1]} : vector<8x128xf32> to vector<8x32xf32>
    %26 = math.tanh %25 : vector<8x32xf32>
    %27 = vector.extract_strided_slice %12 {offsets = [0, 96], sizes = [8, 32], strides = [1, 1]} : vector<8x128xf32> to vector<8x32xf32>
    %28 = arith.negf %27 : vector<8x32xf32>
    %29 = math.exp %28 : vector<8x32xf32>
    %cst_12 = arith.constant 1.000000e+00 : f32
    %30 = vector.broadcast %cst_12 : f32 to vector<8x32xf32>
    %31 = arith.addf %30, %29 : vector<8x32xf32>
    %32 = arith.divf %30, %31 : vector<8x32xf32>
    %33 = arith.mulf %24, %2 : vector<8x32xf32>
    %34 = arith.mulf %18, %26 : vector<8x32xf32>
    %35 = arith.addf %33, %34 : vector<8x32xf32>
    %36 = math.tanh %35 : vector<8x32xf32>
    %37 = arith.mulf %32, %36 : vector<8x32xf32>
    %38 = tpu.concatenate %37, %1 in 1 : vector<8x32xf32>, vector<8x32xf32> -> vector<8x64xf32>
    %c1 = arith.constant 1 : index
    %c0_13 = arith.constant 0 : index
    %c0_14 = arith.constant 0 : index
    %39 = vector.load %arg0[%c1, %c0_13, %c0_14] : memref<2x64x128xf32, #tpu.memory_space<vmem>>, vector<1x64x128xf32>
    %40 = vector.shape_cast %39 : vector<1x64x128xf32> to vector<64x128xf32>
    %cst_15 = arith.constant dense<0.000000e+00> : vector<8x128xf32>
    %41 = tpu.matmul %38, %40, %cst_15 {dimension_numbers = #tpu.dot_dimension_numbers<[1], [0], [0], [1], [0, 0, 1, 1], [], []>} : vector<8x64xf32>, vector<64x128xf32>, vector<8x128xf32> -> vector<8x128xf32>
    %c1_16 = arith.constant 1 : index
    %c0_17 = arith.constant 0 : index
    %c0_18 = arith.constant 0 : index
    %42 = vector.load %arg1[%c1_16, %c0_17, %c0_18] : memref<2x1x128xf32, #tpu.memory_space<vmem>>, vector<1x1x128xf32>
    %43 = vector.shape_cast %42 : vector<1x1x128xf32> to vector<1x128xf32>
    %44 = vector.broadcast %43 : vector<1x128xf32> to vector<8x128xf32>
    %45 = arith.addf %41, %44 : vector<8x128xf32>
    %46 = vector.extract_strided_slice %45 {offsets = [0, 0], sizes = [8, 32], strides = [1, 1]} : vector<8x128xf32> to vector<8x32xf32>
    %47 = arith.negf %46 : vector<8x32xf32>
    %48 = math.exp %47 : vector<8x32xf32>
    %cst_19 = arith.constant 1.000000e+00 : f32
    %49 = vector.broadcast %cst_19 : f32 to vector<8x32xf32>
    %50 = arith.addf %49, %48 : vector<8x32xf32>
    %51 = arith.divf %49, %50 : vector<8x32xf32>
    %52 = vector.extract_strided_slice %45 {offsets = [0, 32], sizes = [8, 32], strides = [1, 1]} : vector<8x128xf32> to vector<8x32xf32>
    %53 = arith.negf %52 : vector<8x32xf32>
    %54 = math.exp %53 : vector<8x32xf32>
    %cst_20 = arith.constant 1.000000e+00 : f32
    %55 = vector.broadcast %cst_20 : f32 to vector<8x32xf32>
    %56 = arith.addf %55, %54 : vector<8x32xf32>
    %57 = arith.divf %55, %56 : vector<8x32xf32>
    %58 = vector.extract_strided_slice %45 {offsets = [0, 64], sizes = [8, 32], strides = [1, 1]} : vector<8x128xf32> to vector<8x32xf32>
    %59 = math.tanh %58 : vector<8x32xf32>
    %60 = vector.extract_strided_slice %45 {offsets = [0, 96], sizes = [8, 32], strides = [1, 1]} : vector<8x128xf32> to vector<8x32xf32>
    %61 = arith.negf %60 : vector<8x32xf32>
    %62 = math.exp %61 : vector<8x32xf32>
    %cst_21 = arith.constant 1.000000e+00 : f32
    %63 = vector.broadcast %cst_21 : f32 to vector<8x32xf32>
    %64 = arith.addf %63, %62 : vector<8x32xf32>
    %65 = arith.divf %63, %64 : vector<8x32xf32>
    %66 = arith.mulf %57, %3 : vector<8x32xf32>
    %67 = arith.mulf %51, %59 : vector<8x32xf32>
    %68 = arith.addf %66, %67 : vector<8x32xf32>
    %69 = math.tanh %68 : vector<8x32xf32>
    %70 = arith.mulf %65, %69 : vector<8x32xf32>
    %c0_22 = arith.constant 0 : index
    %c0_23 = arith.constant 0 : index
    %c0_24 = arith.constant 0 : index
    %71 = vector.load %arg2[%c0_22, %c0_23, %c0_24] : memref<13x32x128xf32, #tpu.memory_space<vmem>>, vector<1x32x128xf32>
    %72 = vector.shape_cast %71 : vector<1x32x128xf32> to vector<32x128xf32>
    %cst_25 = arith.constant dense<0.000000e+00> : vector<8x128xf32>
    %73 = tpu.matmul %70, %72, %cst_25 {dimension_numbers = #tpu.dot_dimension_numbers<[1], [0], [0], [1], [0, 0, 1, 1], [], []>} : vector<8x32xf32>, vector<32x128xf32>, vector<8x128xf32> -> vector<8x128xf32>
    %c0_26 = arith.constant 0 : index
    %c0_27 = arith.constant 0 : index
    %c0_28 = arith.constant 0 : index
    %74 = vector.load %arg3[%c0_26, %c0_27, %c0_28] : memref<13x1x128xf32, #tpu.memory_space<vmem>>, vector<1x1x128xf32>
    %75 = vector.shape_cast %74 : vector<1x1x128xf32> to vector<1x128xf32>
    %76 = vector.broadcast %75 : vector<1x128xf32> to vector<8x128xf32>
    %77 = arith.addf %73, %76 : vector<8x128xf32>
    %cst_29 = arith.constant 1.000000e+00 : f32
    %78 = vector.broadcast %cst_29 : f32 to vector<8x128xf32>
    %79 = arith.mulf %77, %78 : vector<8x128xf32>
    %c0_30 = arith.constant 0 : index
    %c0_31 = arith.constant 0 : index
    %c0_32 = arith.constant 0 : index
    %80 = vector.load %arg5[%c0_30, %c0_31, %c0_32] : memref<5x1x128xf32, #tpu.memory_space<vmem>>, vector<1x1x128xf32>
    %81 = vector.shape_cast %80 : vector<1x1x128xf32> to vector<1x128xf32>
    %82 = vector.broadcast %81 : vector<1x128xf32> to vector<8x128xf32>
    %83 = arith.addf %79, %82 : vector<8x128xf32>
    %c0_33 = arith.constant 0 : index
    %c0_34 = arith.constant 0 : index
    %c0_35 = arith.constant 0 : index
    %84 = vector.load %arg6[%c0_33, %c0_34, %c0_35] : memref<5x8x128xf32, #tpu.memory_space<vmem>>, vector<1x8x128xf32>
    %85 = vector.shape_cast %84 : vector<1x8x128xf32> to vector<8x128xf32>
    %86 = arith.addf %83, %85 : vector<8x128xf32>
    %87 = tpu.iota {dimensions = array<i32: 1>} : vector<8x128xi32>
    %cst_36 = arith.constant dense<0xFF800000> : vector<8xf32>
    %88 = vector.multi_reduction <maximumf>, %86, %cst_36 [1] : vector<8x128xf32> to vector<8xf32>
    %89 = vector.shape_cast %88 : vector<8xf32> to vector<8x1xf32>
    %90 = vector.broadcast %89 : vector<8x1xf32> to vector<8x128xf32>
    %91 = arith.cmpf oge, %86, %90 : vector<8x128xf32>
    %c128_i32 = arith.constant 128 : i32
    %92 = vector.broadcast %c128_i32 : i32 to vector<8x128xi32>
    %93 = arith.select %91, %87, %92 : vector<8x128xi1>, vector<8x128xi32>
    %cst_37 = arith.constant dense<2147483647> : vector<8xi32>
    %94 = vector.multi_reduction <minsi>, %93, %cst_37 [1] : vector<8x128xi32> to vector<8xi32>
    %95 = vector.shape_cast %94 : vector<8xi32> to vector<8x1xi32>
    %cst_38 = arith.constant dense<0xFF800000> : vector<8xf32>
    %96 = vector.multi_reduction <maximumf>, %83, %cst_38 [1] : vector<8x128xf32> to vector<8xf32>
    %97 = vector.shape_cast %96 : vector<8xf32> to vector<8x1xf32>
    %98 = vector.broadcast %97 : vector<8x1xf32> to vector<8x128xf32>
    %99 = arith.subf %83, %98 : vector<8x128xf32>
    %100 = math.exp %99 : vector<8x128xf32>
    %cst_39 = arith.constant dense<0.000000e+00> : vector<8xf32>
    %101 = vector.multi_reduction <add>, %100, %cst_39 [1] : vector<8x128xf32> to vector<8xf32>
    %102 = vector.shape_cast %101 : vector<8xf32> to vector<8x1xf32>
    %103 = math.log %102 : vector<8x1xf32>
    %104 = arith.addf %97, %103 : vector<8x1xf32>
    %105 = vector.broadcast %104 : vector<8x1xf32> to vector<8x128xf32>
    %106 = arith.subf %83, %105 : vector<8x128xf32>
    %107 = vector.broadcast %95 : vector<8x1xi32> to vector<8x128xi32>
    %108 = arith.cmpi eq, %87, %107 : vector<8x128xi32>
    %cst_40 = arith.constant 0.000000e+00 : f32
    %109 = vector.broadcast %cst_40 : f32 to vector<8x128xf32>
    %110 = arith.select %108, %106, %109 : vector<8x128xi1>, vector<8x128xf32>
    %cst_41 = arith.constant dense<0.000000e+00> : vector<8xf32>
    %111 = vector.multi_reduction <add>, %110, %cst_41 [1] : vector<8x128xf32> to vector<8xf32>
    %112 = vector.shape_cast %111 : vector<8xf32> to vector<8x1xf32>
    %c0_42 = arith.constant 0 : index
    %c0_43 = arith.constant 0 : index
    %c0_44 = arith.constant 0 : index
    %113 = vector.load %arg4[%c0_42, %c0_43, %c0_44] : memref<5x8x32xf32, #tpu.memory_space<vmem>>, vector<1x8x32xf32>
    %114 = vector.shape_cast %113 : vector<1x8x32xf32> to vector<8x32xf32>
    %cst_45 = arith.constant 0.000000e+00 : f32
    %115 = vector.broadcast %cst_45 : f32 to vector<8x32xf32>
    %c0_i32 = arith.constant 0 : i32
    %116 = vector.broadcast %c0_i32 : i32 to vector<8x1xi32>
    %117 = arith.cmpi eq, %95, %116 : vector<8x1xi32>
    %118 = arith.extui %117 : vector<8x1xi1> to vector<8x1xi32>
    %119 = arith.sitofp %118 : vector<8x1xi32> to vector<8x1xf32>
    %120 = vector.extract_strided_slice %114 {offsets = [0, 0], sizes = [1, 32], strides = [1, 1]} : vector<8x32xf32> to vector<1x32xf32>
    %121 = vector.broadcast %119 : vector<8x1xf32> to vector<8x32xf32>
    %122 = vector.broadcast %120 : vector<1x32xf32> to vector<8x32xf32>
    %123 = arith.mulf %121, %122 : vector<8x32xf32>
    %124 = arith.addf %115, %123 : vector<8x32xf32>
    %c1_i32 = arith.constant 1 : i32
    %125 = vector.broadcast %c1_i32 : i32 to vector<8x1xi32>
    %126 = arith.cmpi eq, %95, %125 : vector<8x1xi32>
    %127 = arith.extui %126 : vector<8x1xi1> to vector<8x1xi32>
    %128 = arith.sitofp %127 : vector<8x1xi32> to vector<8x1xf32>
    %129 = vector.extract_strided_slice %114 {offsets = [1, 0], sizes = [1, 32], strides = [1, 1]} : vector<8x32xf32> to vector<1x32xf32>
    %130 = vector.broadcast %128 : vector<8x1xf32> to vector<8x32xf32>
    %131 = vector.broadcast %129 : vector<1x32xf32> to vector<8x32xf32>
    %132 = arith.mulf %130, %131 : vector<8x32xf32>
    %133 = arith.addf %124, %132 : vector<8x32xf32>
    %c2_i32 = arith.constant 2 : i32
    %134 = vector.broadcast %c2_i32 : i32 to vector<8x1xi32>
    %135 = arith.cmpi eq, %95, %134 : vector<8x1xi32>
    %136 = arith.extui %135 : vector<8x1xi1> to vector<8x1xi32>
    %137 = arith.sitofp %136 : vector<8x1xi32> to vector<8x1xf32>
    %138 = vector.extract_strided_slice %114 {offsets = [2, 0], sizes = [1, 32], strides = [1, 1]} : vector<8x32xf32> to vector<1x32xf32>
    %139 = vector.broadcast %137 : vector<8x1xf32> to vector<8x32xf32>
    %140 = vector.broadcast %138 : vector<1x32xf32> to vector<8x32xf32>
    %141 = arith.mulf %139, %140 : vector<8x32xf32>
    %142 = arith.addf %133, %141 : vector<8x32xf32>
    %143 = tpu.concatenate %142, %37 in 1 : vector<8x32xf32>, vector<8x32xf32> -> vector<8x64xf32>
    %c0_46 = arith.constant 0 : index
    %c0_47 = arith.constant 0 : index
    %c0_48 = arith.constant 0 : index
    %144 = vector.load %arg0[%c0_46, %c0_47, %c0_48] : memref<2x64x128xf32, #tpu.memory_space<vmem>>, vector<1x64x128xf32>
    %145 = vector.shape_cast %144 : vector<1x64x128xf32> to vector<64x128xf32>
    %cst_49 = arith.constant dense<0.000000e+00> : vector<8x128xf32>
    %146 = tpu.matmul %143, %145, %cst_49 {dimension_numbers = #tpu.dot_dimension_numbers<[1], [0], [0], [1], [0, 0, 1, 1], [], []>} : vector<8x64xf32>, vector<64x128xf32>, vector<8x128xf32> -> vector<8x128xf32>
    %c0_50 = arith.constant 0 : index
    %c0_51 = arith.constant 0 : index
    %c0_52 = arith.constant 0 : index
    %147 = vector.load %arg1[%c0_50, %c0_51, %c0_52] : memref<2x1x128xf32, #tpu.memory_space<vmem>>, vector<1x1x128xf32>
    %148 = vector.shape_cast %147 : vector<1x1x128xf32> to vector<1x128xf32>
    %149 = vector.broadcast %148 : vector<1x128xf32> to vector<8x128xf32>
    %150 = arith.addf %146, %149 : vector<8x128xf32>
    %151 = vector.extract_strided_slice %150 {offsets = [0, 0], sizes = [8, 32], strides = [1, 1]} : vector<8x128xf32> to vector<8x32xf32>
    %152 = arith.negf %151 : vector<8x32xf32>
    %153 = math.exp %152 : vector<8x32xf32>
    %cst_53 = arith.constant 1.000000e+00 : f32
    %154 = vector.broadcast %cst_53 : f32 to vector<8x32xf32>
    %155 = arith.addf %154, %153 : vector<8x32xf32>
    %156 = arith.divf %154, %155 : vector<8x32xf32>
    %157 = vector.extract_strided_slice %150 {offsets = [0, 32], sizes = [8, 32], strides = [1, 1]} : vector<8x128xf32> to vector<8x32xf32>
    %158 = arith.negf %157 : vector<8x32xf32>
    %159 = math.exp %158 : vector<8x32xf32>
    %cst_54 = arith.constant 1.000000e+00 : f32
    %160 = vector.broadcast %cst_54 : f32 to vector<8x32xf32>
    %161 = arith.addf %160, %159 : vector<8x32xf32>
    %162 = arith.divf %160, %161 : vector<8x32xf32>
    %163 = vector.extract_strided_slice %150 {offsets = [0, 64], sizes = [8, 32], strides = [1, 1]} : vector<8x128xf32> to vector<8x32xf32>
    %164 = math.tanh %163 : vector<8x32xf32>
    %165 = vector.extract_strided_slice %150 {offsets = [0, 96], sizes = [8, 32], strides = [1, 1]} : vector<8x128xf32> to vector<8x32xf32>
    %166 = arith.negf %165 : vector<8x32xf32>
    %167 = math.exp %166 : vector<8x32xf32>
    %cst_55 = arith.constant 1.000000e+00 : f32
    %168 = vector.broadcast %cst_55 : f32 to vector<8x32xf32>
    %169 = arith.addf %168, %167 : vector<8x32xf32>
    %170 = arith.divf %168, %169 : vector<8x32xf32>
    %171 = arith.mulf %162, %35 : vector<8x32xf32>
    %172 = arith.mulf %156, %164 : vector<8x32xf32>
    %173 = arith.addf %171, %172 : vector<8x32xf32>
    %174 = math.tanh %173 : vector<8x32xf32>
    %175 = arith.mulf %170, %174 : vector<8x32xf32>
    %176 = tpu.concatenate %175, %70 in 1 : vector<8x32xf32>, vector<8x32xf32> -> vector<8x64xf32>
    %c1_56 = arith.constant 1 : index
    %c0_57 = arith.constant 0 : index
    %c0_58 = arith.constant 0 : index
    %177 = vector.load %arg0[%c1_56, %c0_57, %c0_58] : memref<2x64x128xf32, #tpu.memory_space<vmem>>, vector<1x64x128xf32>
    %178 = vector.shape_cast %177 : vector<1x64x128xf32> to vector<64x128xf32>
    %cst_59 = arith.constant dense<0.000000e+00> : vector<8x128xf32>
    %179 = tpu.matmul %176, %178, %cst_59 {dimension_numbers = #tpu.dot_dimension_numbers<[1], [0], [0], [1], [0, 0, 1, 1], [], []>} : vector<8x64xf32>, vector<64x128xf32>, vector<8x128xf32> -> vector<8x128xf32>
    %c1_60 = arith.constant 1 : index
    %c0_61 = arith.constant 0 : index
    %c0_62 = arith.constant 0 : index
    %180 = vector.load %arg1[%c1_60, %c0_61, %c0_62] : memref<2x1x128xf32, #tpu.memory_space<vmem>>, vector<1x1x128xf32>
    %181 = vector.shape_cast %180 : vector<1x1x128xf32> to vector<1x128xf32>
    %182 = vector.broadcast %181 : vector<1x128xf32> to vector<8x128xf32>
    %183 = arith.addf %179, %182 : vector<8x128xf32>
    %184 = vector.extract_strided_slice %183 {offsets = [0, 0], sizes = [8, 32], strides = [1, 1]} : vector<8x128xf32> to vector<8x32xf32>
    %185 = arith.negf %184 : vector<8x32xf32>
    %186 = math.exp %185 : vector<8x32xf32>
    %cst_63 = arith.constant 1.000000e+00 : f32
    %187 = vector.broadcast %cst_63 : f32 to vector<8x32xf32>
    %188 = arith.addf %187, %186 : vector<8x32xf32>
    %189 = arith.divf %187, %188 : vector<8x32xf32>
    %190 = vector.extract_strided_slice %183 {offsets = [0, 32], sizes = [8, 32], strides = [1, 1]} : vector<8x128xf32> to vector<8x32xf32>
    %191 = arith.negf %190 : vector<8x32xf32>
    %192 = math.exp %191 : vector<8x32xf32>
    %cst_64 = arith.constant 1.000000e+00 : f32
    %193 = vector.broadcast %cst_64 : f32 to vector<8x32xf32>
    %194 = arith.addf %193, %192 : vector<8x32xf32>
    %195 = arith.divf %193, %194 : vector<8x32xf32>
    %196 = vector.extract_strided_slice %183 {offsets = [0, 64], sizes = [8, 32], strides = [1, 1]} : vector<8x128xf32> to vector<8x32xf32>
    %197 = math.tanh %196 : vector<8x32xf32>
    %198 = vector.extract_strided_slice %183 {offsets = [0, 96], sizes = [8, 32], strides = [1, 1]} : vector<8x128xf32> to vector<8x32xf32>
    %199 = arith.negf %198 : vector<8x32xf32>
    %200 = math.exp %199 : vector<8x32xf32>
    %cst_65 = arith.constant 1.000000e+00 : f32
    %201 = vector.broadcast %cst_65 : f32 to vector<8x32xf32>
    %202 = arith.addf %201, %200 : vector<8x32xf32>
    %203 = arith.divf %201, %202 : vector<8x32xf32>
    %204 = arith.mulf %195, %68 : vector<8x32xf32>
    %205 = arith.mulf %189, %197 : vector<8x32xf32>
    %206 = arith.addf %204, %205 : vector<8x32xf32>
    %207 = math.tanh %206 : vector<8x32xf32>
    %208 = arith.mulf %203, %207 : vector<8x32xf32>
    %c1_66 = arith.constant 1 : index
    %c0_67 = arith.constant 0 : index
    %c0_68 = arith.constant 0 : index
    %209 = vector.load %arg2[%c1_66, %c0_67, %c0_68] : memref<13x32x128xf32, #tpu.memory_space<vmem>>, vector<1x32x128xf32>
    %210 = vector.shape_cast %209 : vector<1x32x128xf32> to vector<32x128xf32>
    %cst_69 = arith.constant dense<0.000000e+00> : vector<8x128xf32>
    %211 = tpu.matmul %208, %210, %cst_69 {dimension_numbers = #tpu.dot_dimension_numbers<[1], [0], [0], [1], [0, 0, 1, 1], [], []>} : vector<8x32xf32>, vector<32x128xf32>, vector<8x128xf32> -> vector<8x128xf32>
    %c1_70 = arith.constant 1 : index
    %c0_71 = arith.constant 0 : index
    %c0_72 = arith.constant 0 : index
    %212 = vector.load %arg3[%c1_70, %c0_71, %c0_72] : memref<13x1x128xf32, #tpu.memory_space<vmem>>, vector<1x1x128xf32>
    %213 = vector.shape_cast %212 : vector<1x1x128xf32> to vector<1x128xf32>
    %214 = vector.broadcast %213 : vector<1x128xf32> to vector<8x128xf32>
    %215 = arith.addf %211, %214 : vector<8x128xf32>
    %cst_73 = arith.constant 1.000000e+00 : f32
    %216 = vector.broadcast %cst_73 : f32 to vector<8x128xf32>
    %217 = arith.mulf %215, %216 : vector<8x128xf32>
    %c1_74 = arith.constant 1 : index
    %c0_75 = arith.constant 0 : index
    %c0_76 = arith.constant 0 : index
    %218 = vector.load %arg5[%c1_74, %c0_75, %c0_76] : memref<5x1x128xf32, #tpu.memory_space<vmem>>, vector<1x1x128xf32>
    %219 = vector.shape_cast %218 : vector<1x1x128xf32> to vector<1x128xf32>
    %220 = vector.broadcast %219 : vector<1x128xf32> to vector<8x128xf32>
    %221 = arith.addf %217, %220 : vector<8x128xf32>
    %c1_77 = arith.constant 1 : index
    %c0_78 = arith.constant 0 : index
    %c0_79 = arith.constant 0 : index
    %222 = vector.load %arg6[%c1_77, %c0_78, %c0_79] : memref<5x8x128xf32, #tpu.memory_space<vmem>>, vector<1x8x128xf32>
    %223 = vector.shape_cast %222 : vector<1x8x128xf32> to vector<8x128xf32>
    %224 = arith.addf %221, %223 : vector<8x128xf32>
    %225 = tpu.iota {dimensions = array<i32: 1>} : vector<8x128xi32>
    %cst_80 = arith.constant dense<0xFF800000> : vector<8xf32>
    %226 = vector.multi_reduction <maximumf>, %224, %cst_80 [1] : vector<8x128xf32> to vector<8xf32>
    %227 = vector.shape_cast %226 : vector<8xf32> to vector<8x1xf32>
    %228 = vector.broadcast %227 : vector<8x1xf32> to vector<8x128xf32>
    %229 = arith.cmpf oge, %224, %228 : vector<8x128xf32>
    %c128_i32_81 = arith.constant 128 : i32
    %230 = vector.broadcast %c128_i32_81 : i32 to vector<8x128xi32>
    %231 = arith.select %229, %225, %230 : vector<8x128xi1>, vector<8x128xi32>
    %cst_82 = arith.constant dense<2147483647> : vector<8xi32>
    %232 = vector.multi_reduction <minsi>, %231, %cst_82 [1] : vector<8x128xi32> to vector<8xi32>
    %233 = vector.shape_cast %232 : vector<8xi32> to vector<8x1xi32>
    %cst_83 = arith.constant dense<0xFF800000> : vector<8xf32>
    %234 = vector.multi_reduction <maximumf>, %221, %cst_83 [1] : vector<8x128xf32> to vector<8xf32>
    %235 = vector.shape_cast %234 : vector<8xf32> to vector<8x1xf32>
    %236 = vector.broadcast %235 : vector<8x1xf32> to vector<8x128xf32>
    %237 = arith.subf %221, %236 : vector<8x128xf32>
    %238 = math.exp %237 : vector<8x128xf32>
    %cst_84 = arith.constant dense<0.000000e+00> : vector<8xf32>
    %239 = vector.multi_reduction <add>, %238, %cst_84 [1] : vector<8x128xf32> to vector<8xf32>
    %240 = vector.shape_cast %239 : vector<8xf32> to vector<8x1xf32>
    %241 = math.log %240 : vector<8x1xf32>
    %242 = arith.addf %235, %241 : vector<8x1xf32>
    %243 = vector.broadcast %242 : vector<8x1xf32> to vector<8x128xf32>
    %244 = arith.subf %221, %243 : vector<8x128xf32>
    %245 = vector.broadcast %233 : vector<8x1xi32> to vector<8x128xi32>
    %246 = arith.cmpi eq, %225, %245 : vector<8x128xi32>
    %cst_85 = arith.constant 0.000000e+00 : f32
    %247 = vector.broadcast %cst_85 : f32 to vector<8x128xf32>
    %248 = arith.select %246, %244, %247 : vector<8x128xi1>, vector<8x128xf32>
    %cst_86 = arith.constant dense<0.000000e+00> : vector<8xf32>
    %249 = vector.multi_reduction <add>, %248, %cst_86 [1] : vector<8x128xf32> to vector<8xf32>
    %250 = vector.shape_cast %249 : vector<8xf32> to vector<8x1xf32>
    %c1_87 = arith.constant 1 : index
    %c0_88 = arith.constant 0 : index
    %c0_89 = arith.constant 0 : index
    %251 = vector.load %arg4[%c1_87, %c0_88, %c0_89] : memref<5x8x32xf32, #tpu.memory_space<vmem>>, vector<1x8x32xf32>
    %252 = vector.shape_cast %251 : vector<1x8x32xf32> to vector<8x32xf32>
    %cst_90 = arith.constant 0.000000e+00 : f32
    %253 = vector.broadcast %cst_90 : f32 to vector<8x32xf32>
    %c0_i32_91 = arith.constant 0 : i32
    %254 = vector.broadcast %c0_i32_91 : i32 to vector<8x1xi32>
    %255 = arith.cmpi eq, %233, %254 : vector<8x1xi32>
    %256 = arith.extui %255 : vector<8x1xi1> to vector<8x1xi32>
    %257 = arith.sitofp %256 : vector<8x1xi32> to vector<8x1xf32>
    %258 = vector.extract_strided_slice %252 {offsets = [0, 0], sizes = [1, 32], strides = [1, 1]} : vector<8x32xf32> to vector<1x32xf32>
    %259 = vector.broadcast %257 : vector<8x1xf32> to vector<8x32xf32>
    %260 = vector.broadcast %258 : vector<1x32xf32> to vector<8x32xf32>
    %261 = arith.mulf %259, %260 : vector<8x32xf32>
    %262 = arith.addf %253, %261 : vector<8x32xf32>
    %c1_i32_92 = arith.constant 1 : i32
    %263 = vector.broadcast %c1_i32_92 : i32 to vector<8x1xi32>
    %264 = arith.cmpi eq, %233, %263 : vector<8x1xi32>
    %265 = arith.extui %264 : vector<8x1xi1> to vector<8x1xi32>
    %266 = arith.sitofp %265 : vector<8x1xi32> to vector<8x1xf32>
    %267 = vector.extract_strided_slice %252 {offsets = [1, 0], sizes = [1, 32], strides = [1, 1]} : vector<8x32xf32> to vector<1x32xf32>
    %268 = vector.broadcast %266 : vector<8x1xf32> to vector<8x32xf32>
    %269 = vector.broadcast %267 : vector<1x32xf32> to vector<8x32xf32>
    %270 = arith.mulf %268, %269 : vector<8x32xf32>
    %271 = arith.addf %262, %270 : vector<8x32xf32>
    %c2_i32_93 = arith.constant 2 : i32
    %272 = vector.broadcast %c2_i32_93 : i32 to vector<8x1xi32>
    %273 = arith.cmpi eq, %233, %272 : vector<8x1xi32>
    %274 = arith.extui %273 : vector<8x1xi1> to vector<8x1xi32>
    %275 = arith.sitofp %274 : vector<8x1xi32> to vector<8x1xf32>
    %276 = vector.extract_strided_slice %252 {offsets = [2, 0], sizes = [1, 32], strides = [1, 1]} : vector<8x32xf32> to vector<1x32xf32>
    %277 = vector.broadcast %275 : vector<8x1xf32> to vector<8x32xf32>
    %278 = vector.broadcast %276 : vector<1x32xf32> to vector<8x32xf32>
    %279 = arith.mulf %277, %278 : vector<8x32xf32>
    %280 = arith.addf %271, %279 : vector<8x32xf32>
    %281 = tpu.concatenate %280, %175 in 1 : vector<8x32xf32>, vector<8x32xf32> -> vector<8x64xf32>
    %c0_94 = arith.constant 0 : index
    %c0_95 = arith.constant 0 : index
    %c0_96 = arith.constant 0 : index
    %282 = vector.load %arg0[%c0_94, %c0_95, %c0_96] : memref<2x64x128xf32, #tpu.memory_space<vmem>>, vector<1x64x128xf32>
    %283 = vector.shape_cast %282 : vector<1x64x128xf32> to vector<64x128xf32>
    %cst_97 = arith.constant dense<0.000000e+00> : vector<8x128xf32>
    %284 = tpu.matmul %281, %283, %cst_97 {dimension_numbers = #tpu.dot_dimension_numbers<[1], [0], [0], [1], [0, 0, 1, 1], [], []>} : vector<8x64xf32>, vector<64x128xf32>, vector<8x128xf32> -> vector<8x128xf32>
    %c0_98 = arith.constant 0 : index
    %c0_99 = arith.constant 0 : index
    %c0_100 = arith.constant 0 : index
    %285 = vector.load %arg1[%c0_98, %c0_99, %c0_100] : memref<2x1x128xf32, #tpu.memory_space<vmem>>, vector<1x1x128xf32>
    %286 = vector.shape_cast %285 : vector<1x1x128xf32> to vector<1x128xf32>
    %287 = vector.broadcast %286 : vector<1x128xf32> to vector<8x128xf32>
    %288 = arith.addf %284, %287 : vector<8x128xf32>
    %289 = vector.extract_strided_slice %288 {offsets = [0, 0], sizes = [8, 32], strides = [1, 1]} : vector<8x128xf32> to vector<8x32xf32>
    %290 = arith.negf %289 : vector<8x32xf32>
    %291 = math.exp %290 : vector<8x32xf32>
    %cst_101 = arith.constant 1.000000e+00 : f32
    %292 = vector.broadcast %cst_101 : f32 to vector<8x32xf32>
    %293 = arith.addf %292, %291 : vector<8x32xf32>
    %294 = arith.divf %292, %293 : vector<8x32xf32>
    %295 = vector.extract_strided_slice %288 {offsets = [0, 32], sizes = [8, 32], strides = [1, 1]} : vector<8x128xf32> to vector<8x32xf32>
    %296 = arith.negf %295 : vector<8x32xf32>
    %297 = math.exp %296 : vector<8x32xf32>
    %cst_102 = arith.constant 1.000000e+00 : f32
    %298 = vector.broadcast %cst_102 : f32 to vector<8x32xf32>
    %299 = arith.addf %298, %297 : vector<8x32xf32>
    %300 = arith.divf %298, %299 : vector<8x32xf32>
    %301 = vector.extract_strided_slice %288 {offsets = [0, 64], sizes = [8, 32], strides = [1, 1]} : vector<8x128xf32> to vector<8x32xf32>
    %302 = math.tanh %301 : vector<8x32xf32>
    %303 = vector.extract_strided_slice %288 {offsets = [0, 96], sizes = [8, 32], strides = [1, 1]} : vector<8x128xf32> to vector<8x32xf32>
    %304 = arith.negf %303 : vector<8x32xf32>
    %305 = math.exp %304 : vector<8x32xf32>
    %cst_103 = arith.constant 1.000000e+00 : f32
    %306 = vector.broadcast %cst_103 : f32 to vector<8x32xf32>
    %307 = arith.addf %306, %305 : vector<8x32xf32>
    %308 = arith.divf %306, %307 : vector<8x32xf32>
    %309 = arith.mulf %300, %173 : vector<8x32xf32>
    %310 = arith.mulf %294, %302 : vector<8x32xf32>
    %311 = arith.addf %309, %310 : vector<8x32xf32>
    %312 = math.tanh %311 : vector<8x32xf32>
    %313 = arith.mulf %308, %312 : vector<8x32xf32>
    %314 = tpu.concatenate %313, %208 in 1 : vector<8x32xf32>, vector<8x32xf32> -> vector<8x64xf32>
    %c1_104 = arith.constant 1 : index
    %c0_105 = arith.constant 0 : index
    %c0_106 = arith.constant 0 : index
    %315 = vector.load %arg0[%c1_104, %c0_105, %c0_106] : memref<2x64x128xf32, #tpu.memory_space<vmem>>, vector<1x64x128xf32>
    %316 = vector.shape_cast %315 : vector<1x64x128xf32> to vector<64x128xf32>
    %cst_107 = arith.constant dense<0.000000e+00> : vector<8x128xf32>
    %317 = tpu.matmul %314, %316, %cst_107 {dimension_numbers = #tpu.dot_dimension_numbers<[1], [0], [0], [1], [0, 0, 1, 1], [], []>} : vector<8x64xf32>, vector<64x128xf32>, vector<8x128xf32> -> vector<8x128xf32>
    %c1_108 = arith.constant 1 : index
    %c0_109 = arith.constant 0 : index
    %c0_110 = arith.constant 0 : index
    %318 = vector.load %arg1[%c1_108, %c0_109, %c0_110] : memref<2x1x128xf32, #tpu.memory_space<vmem>>, vector<1x1x128xf32>
    %319 = vector.shape_cast %318 : vector<1x1x128xf32> to vector<1x128xf32>
    %320 = vector.broadcast %319 : vector<1x128xf32> to vector<8x128xf32>
    %321 = arith.addf %317, %320 : vector<8x128xf32>
    %322 = vector.extract_strided_slice %321 {offsets = [0, 0], sizes = [8, 32], strides = [1, 1]} : vector<8x128xf32> to vector<8x32xf32>
    %323 = arith.negf %322 : vector<8x32xf32>
    %324 = math.exp %323 : vector<8x32xf32>
    %cst_111 = arith.constant 1.000000e+00 : f32
    %325 = vector.broadcast %cst_111 : f32 to vector<8x32xf32>
    %326 = arith.addf %325, %324 : vector<8x32xf32>
    %327 = arith.divf %325, %326 : vector<8x32xf32>
    %328 = vector.extract_strided_slice %321 {offsets = [0, 32], sizes = [8, 32], strides = [1, 1]} : vector<8x128xf32> to vector<8x32xf32>
    %329 = arith.negf %328 : vector<8x32xf32>
    %330 = math.exp %329 : vector<8x32xf32>
    %cst_112 = arith.constant 1.000000e+00 : f32
    %331 = vector.broadcast %cst_112 : f32 to vector<8x32xf32>
    %332 = arith.addf %331, %330 : vector<8x32xf32>
    %333 = arith.divf %331, %332 : vector<8x32xf32>
    %334 = vector.extract_strided_slice %321 {offsets = [0, 64], sizes = [8, 32], strides = [1, 1]} : vector<8x128xf32> to vector<8x32xf32>
    %335 = math.tanh %334 : vector<8x32xf32>
    %336 = vector.extract_strided_slice %321 {offsets = [0, 96], sizes = [8, 32], strides = [1, 1]} : vector<8x128xf32> to vector<8x32xf32>
    %337 = arith.negf %336 : vector<8x32xf32>
    %338 = math.exp %337 : vector<8x32xf32>
    %cst_113 = arith.constant 1.000000e+00 : f32
    %339 = vector.broadcast %cst_113 : f32 to vector<8x32xf32>
    %340 = arith.addf %339, %338 : vector<8x32xf32>
    %341 = arith.divf %339, %340 : vector<8x32xf32>
    %342 = arith.mulf %333, %206 : vector<8x32xf32>
    %343 = arith.mulf %327, %335 : vector<8x32xf32>
    %344 = arith.addf %342, %343 : vector<8x32xf32>
    %345 = math.tanh %344 : vector<8x32xf32>
    %346 = arith.mulf %341, %345 : vector<8x32xf32>
    %c2 = arith.constant 2 : index
    %c0_114 = arith.constant 0 : index
    %c0_115 = arith.constant 0 : index
    %347 = vector.load %arg2[%c2, %c0_114, %c0_115] : memref<13x32x128xf32, #tpu.memory_space<vmem>>, vector<1x32x128xf32>
    %348 = vector.shape_cast %347 : vector<1x32x128xf32> to vector<32x128xf32>
    %cst_116 = arith.constant dense<0.000000e+00> : vector<8x128xf32>
    %349 = tpu.matmul %346, %348, %cst_116 {dimension_numbers = #tpu.dot_dimension_numbers<[1], [0], [0], [1], [0, 0, 1, 1], [], []>} : vector<8x32xf32>, vector<32x128xf32>, vector<8x128xf32> -> vector<8x128xf32>
    %c2_117 = arith.constant 2 : index
    %c0_118 = arith.constant 0 : index
    %c0_119 = arith.constant 0 : index
    %350 = vector.load %arg3[%c2_117, %c0_118, %c0_119] : memref<13x1x128xf32, #tpu.memory_space<vmem>>, vector<1x1x128xf32>
    %351 = vector.shape_cast %350 : vector<1x1x128xf32> to vector<1x128xf32>
    %352 = vector.broadcast %351 : vector<1x128xf32> to vector<8x128xf32>
    %353 = arith.addf %349, %352 : vector<8x128xf32>
    %cst_120 = arith.constant 1.000000e+00 : f32
    %354 = vector.broadcast %cst_120 : f32 to vector<8x128xf32>
    %355 = arith.mulf %353, %354 : vector<8x128xf32>
    %c2_121 = arith.constant 2 : index
    %c0_122 = arith.constant 0 : index
    %c0_123 = arith.constant 0 : index
    %356 = vector.load %arg5[%c2_121, %c0_122, %c0_123] : memref<5x1x128xf32, #tpu.memory_space<vmem>>, vector<1x1x128xf32>
    %357 = vector.shape_cast %356 : vector<1x1x128xf32> to vector<1x128xf32>
    %358 = vector.broadcast %357 : vector<1x128xf32> to vector<8x128xf32>
    %359 = arith.addf %355, %358 : vector<8x128xf32>
    %c2_124 = arith.constant 2 : index
    %c0_125 = arith.constant 0 : index
    %c0_126 = arith.constant 0 : index
    %360 = vector.load %arg6[%c2_124, %c0_125, %c0_126] : memref<5x8x128xf32, #tpu.memory_space<vmem>>, vector<1x8x128xf32>
    %361 = vector.shape_cast %360 : vector<1x8x128xf32> to vector<8x128xf32>
    %362 = arith.addf %359, %361 : vector<8x128xf32>
    %363 = tpu.iota {dimensions = array<i32: 1>} : vector<8x128xi32>
    %cst_127 = arith.constant dense<0xFF800000> : vector<8xf32>
    %364 = vector.multi_reduction <maximumf>, %362, %cst_127 [1] : vector<8x128xf32> to vector<8xf32>
    %365 = vector.shape_cast %364 : vector<8xf32> to vector<8x1xf32>
    %366 = vector.broadcast %365 : vector<8x1xf32> to vector<8x128xf32>
    %367 = arith.cmpf oge, %362, %366 : vector<8x128xf32>
    %c128_i32_128 = arith.constant 128 : i32
    %368 = vector.broadcast %c128_i32_128 : i32 to vector<8x128xi32>
    %369 = arith.select %367, %363, %368 : vector<8x128xi1>, vector<8x128xi32>
    %cst_129 = arith.constant dense<2147483647> : vector<8xi32>
    %370 = vector.multi_reduction <minsi>, %369, %cst_129 [1] : vector<8x128xi32> to vector<8xi32>
    %371 = vector.shape_cast %370 : vector<8xi32> to vector<8x1xi32>
    %cst_130 = arith.constant dense<0xFF800000> : vector<8xf32>
    %372 = vector.multi_reduction <maximumf>, %359, %cst_130 [1] : vector<8x128xf32> to vector<8xf32>
    %373 = vector.shape_cast %372 : vector<8xf32> to vector<8x1xf32>
    %374 = vector.broadcast %373 : vector<8x1xf32> to vector<8x128xf32>
    %375 = arith.subf %359, %374 : vector<8x128xf32>
    %376 = math.exp %375 : vector<8x128xf32>
    %cst_131 = arith.constant dense<0.000000e+00> : vector<8xf32>
    %377 = vector.multi_reduction <add>, %376, %cst_131 [1] : vector<8x128xf32> to vector<8xf32>
    %378 = vector.shape_cast %377 : vector<8xf32> to vector<8x1xf32>
    %379 = math.log %378 : vector<8x1xf32>
    %380 = arith.addf %373, %379 : vector<8x1xf32>
    %381 = vector.broadcast %380 : vector<8x1xf32> to vector<8x128xf32>
    %382 = arith.subf %359, %381 : vector<8x128xf32>
    %383 = vector.broadcast %371 : vector<8x1xi32> to vector<8x128xi32>
    %384 = arith.cmpi eq, %363, %383 : vector<8x128xi32>
    %cst_132 = arith.constant 0.000000e+00 : f32
    %385 = vector.broadcast %cst_132 : f32 to vector<8x128xf32>
    %386 = arith.select %384, %382, %385 : vector<8x128xi1>, vector<8x128xf32>
    %cst_133 = arith.constant dense<0.000000e+00> : vector<8xf32>
    %387 = vector.multi_reduction <add>, %386, %cst_133 [1] : vector<8x128xf32> to vector<8xf32>
    %388 = vector.shape_cast %387 : vector<8xf32> to vector<8x1xf32>
    %c2_134 = arith.constant 2 : index
    %c0_135 = arith.constant 0 : index
    %c0_136 = arith.constant 0 : index
    %389 = vector.load %arg4[%c2_134, %c0_135, %c0_136] : memref<5x8x32xf32, #tpu.memory_space<vmem>>, vector<1x8x32xf32>
    %390 = vector.shape_cast %389 : vector<1x8x32xf32> to vector<8x32xf32>
    %cst_137 = arith.constant 0.000000e+00 : f32
    %391 = vector.broadcast %cst_137 : f32 to vector<8x32xf32>
    %c0_i32_138 = arith.constant 0 : i32
    %392 = vector.broadcast %c0_i32_138 : i32 to vector<8x1xi32>
    %393 = arith.cmpi eq, %371, %392 : vector<8x1xi32>
    %394 = arith.extui %393 : vector<8x1xi1> to vector<8x1xi32>
    %395 = arith.sitofp %394 : vector<8x1xi32> to vector<8x1xf32>
    %396 = vector.extract_strided_slice %390 {offsets = [0, 0], sizes = [1, 32], strides = [1, 1]} : vector<8x32xf32> to vector<1x32xf32>
    %397 = vector.broadcast %395 : vector<8x1xf32> to vector<8x32xf32>
    %398 = vector.broadcast %396 : vector<1x32xf32> to vector<8x32xf32>
    %399 = arith.mulf %397, %398 : vector<8x32xf32>
    %400 = arith.addf %391, %399 : vector<8x32xf32>
    %c1_i32_139 = arith.constant 1 : i32
    %401 = vector.broadcast %c1_i32_139 : i32 to vector<8x1xi32>
    %402 = arith.cmpi eq, %371, %401 : vector<8x1xi32>
    %403 = arith.extui %402 : vector<8x1xi1> to vector<8x1xi32>
    %404 = arith.sitofp %403 : vector<8x1xi32> to vector<8x1xf32>
    %405 = vector.extract_strided_slice %390 {offsets = [1, 0], sizes = [1, 32], strides = [1, 1]} : vector<8x32xf32> to vector<1x32xf32>
    %406 = vector.broadcast %404 : vector<8x1xf32> to vector<8x32xf32>
    %407 = vector.broadcast %405 : vector<1x32xf32> to vector<8x32xf32>
    %408 = arith.mulf %406, %407 : vector<8x32xf32>
    %409 = arith.addf %400, %408 : vector<8x32xf32>
    %410 = tpu.concatenate %409, %313 in 1 : vector<8x32xf32>, vector<8x32xf32> -> vector<8x64xf32>
    %c0_140 = arith.constant 0 : index
    %c0_141 = arith.constant 0 : index
    %c0_142 = arith.constant 0 : index
    %411 = vector.load %arg0[%c0_140, %c0_141, %c0_142] : memref<2x64x128xf32, #tpu.memory_space<vmem>>, vector<1x64x128xf32>
    %412 = vector.shape_cast %411 : vector<1x64x128xf32> to vector<64x128xf32>
    %cst_143 = arith.constant dense<0.000000e+00> : vector<8x128xf32>
    %413 = tpu.matmul %410, %412, %cst_143 {dimension_numbers = #tpu.dot_dimension_numbers<[1], [0], [0], [1], [0, 0, 1, 1], [], []>} : vector<8x64xf32>, vector<64x128xf32>, vector<8x128xf32> -> vector<8x128xf32>
    %c0_144 = arith.constant 0 : index
    %c0_145 = arith.constant 0 : index
    %c0_146 = arith.constant 0 : index
    %414 = vector.load %arg1[%c0_144, %c0_145, %c0_146] : memref<2x1x128xf32, #tpu.memory_space<vmem>>, vector<1x1x128xf32>
    %415 = vector.shape_cast %414 : vector<1x1x128xf32> to vector<1x128xf32>
    %416 = vector.broadcast %415 : vector<1x128xf32> to vector<8x128xf32>
    %417 = arith.addf %413, %416 : vector<8x128xf32>
    %418 = vector.extract_strided_slice %417 {offsets = [0, 0], sizes = [8, 32], strides = [1, 1]} : vector<8x128xf32> to vector<8x32xf32>
    %419 = arith.negf %418 : vector<8x32xf32>
    %420 = math.exp %419 : vector<8x32xf32>
    %cst_147 = arith.constant 1.000000e+00 : f32
    %421 = vector.broadcast %cst_147 : f32 to vector<8x32xf32>
    %422 = arith.addf %421, %420 : vector<8x32xf32>
    %423 = arith.divf %421, %422 : vector<8x32xf32>
    %424 = vector.extract_strided_slice %417 {offsets = [0, 32], sizes = [8, 32], strides = [1, 1]} : vector<8x128xf32> to vector<8x32xf32>
    %425 = arith.negf %424 : vector<8x32xf32>
    %426 = math.exp %425 : vector<8x32xf32>
    %cst_148 = arith.constant 1.000000e+00 : f32
    %427 = vector.broadcast %cst_148 : f32 to vector<8x32xf32>
    %428 = arith.addf %427, %426 : vector<8x32xf32>
    %429 = arith.divf %427, %428 : vector<8x32xf32>
    %430 = vector.extract_strided_slice %417 {offsets = [0, 64], sizes = [8, 32], strides = [1, 1]} : vector<8x128xf32> to vector<8x32xf32>
    %431 = math.tanh %430 : vector<8x32xf32>
    %432 = vector.extract_strided_slice %417 {offsets = [0, 96], sizes = [8, 32], strides = [1, 1]} : vector<8x128xf32> to vector<8x32xf32>
    %433 = arith.negf %432 : vector<8x32xf32>
    %434 = math.exp %433 : vector<8x32xf32>
    %cst_149 = arith.constant 1.000000e+00 : f32
    %435 = vector.broadcast %cst_149 : f32 to vector<8x32xf32>
    %436 = arith.addf %435, %434 : vector<8x32xf32>
    %437 = arith.divf %435, %436 : vector<8x32xf32>
    %438 = arith.mulf %429, %311 : vector<8x32xf32>
    %439 = arith.mulf %423, %431 : vector<8x32xf32>
    %440 = arith.addf %438, %439 : vector<8x32xf32>
    %441 = math.tanh %440 : vector<8x32xf32>
    %442 = arith.mulf %437, %441 : vector<8x32xf32>
    %443 = tpu.concatenate %442, %346 in 1 : vector<8x32xf32>, vector<8x32xf32> -> vector<8x64xf32>
    %c1_150 = arith.constant 1 : index
    %c0_151 = arith.constant 0 : index
    %c0_152 = arith.constant 0 : index
    %444 = vector.load %arg0[%c1_150, %c0_151, %c0_152] : memref<2x64x128xf32, #tpu.memory_space<vmem>>, vector<1x64x128xf32>
    %445 = vector.shape_cast %444 : vector<1x64x128xf32> to vector<64x128xf32>
    %cst_153 = arith.constant dense<0.000000e+00> : vector<8x128xf32>
    %446 = tpu.matmul %443, %445, %cst_153 {dimension_numbers = #tpu.dot_dimension_numbers<[1], [0], [0], [1], [0, 0, 1, 1], [], []>} : vector<8x64xf32>, vector<64x128xf32>, vector<8x128xf32> -> vector<8x128xf32>
    %c1_154 = arith.constant 1 : index
    %c0_155 = arith.constant 0 : index
    %c0_156 = arith.constant 0 : index
    %447 = vector.load %arg1[%c1_154, %c0_155, %c0_156] : memref<2x1x128xf32, #tpu.memory_space<vmem>>, vector<1x1x128xf32>
    %448 = vector.shape_cast %447 : vector<1x1x128xf32> to vector<1x128xf32>
    %449 = vector.broadcast %448 : vector<1x128xf32> to vector<8x128xf32>
    %450 = arith.addf %446, %449 : vector<8x128xf32>
    %451 = vector.extract_strided_slice %450 {offsets = [0, 0], sizes = [8, 32], strides = [1, 1]} : vector<8x128xf32> to vector<8x32xf32>
    %452 = arith.negf %451 : vector<8x32xf32>
    %453 = math.exp %452 : vector<8x32xf32>
    %cst_157 = arith.constant 1.000000e+00 : f32
    %454 = vector.broadcast %cst_157 : f32 to vector<8x32xf32>
    %455 = arith.addf %454, %453 : vector<8x32xf32>
    %456 = arith.divf %454, %455 : vector<8x32xf32>
    %457 = vector.extract_strided_slice %450 {offsets = [0, 32], sizes = [8, 32], strides = [1, 1]} : vector<8x128xf32> to vector<8x32xf32>
    %458 = arith.negf %457 : vector<8x32xf32>
    %459 = math.exp %458 : vector<8x32xf32>
    %cst_158 = arith.constant 1.000000e+00 : f32
    %460 = vector.broadcast %cst_158 : f32 to vector<8x32xf32>
    %461 = arith.addf %460, %459 : vector<8x32xf32>
    %462 = arith.divf %460, %461 : vector<8x32xf32>
    %463 = vector.extract_strided_slice %450 {offsets = [0, 64], sizes = [8, 32], strides = [1, 1]} : vector<8x128xf32> to vector<8x32xf32>
    %464 = math.tanh %463 : vector<8x32xf32>
    %465 = vector.extract_strided_slice %450 {offsets = [0, 96], sizes = [8, 32], strides = [1, 1]} : vector<8x128xf32> to vector<8x32xf32>
    %466 = arith.negf %465 : vector<8x32xf32>
    %467 = math.exp %466 : vector<8x32xf32>
    %cst_159 = arith.constant 1.000000e+00 : f32
    %468 = vector.broadcast %cst_159 : f32 to vector<8x32xf32>
    %469 = arith.addf %468, %467 : vector<8x32xf32>
    %470 = arith.divf %468, %469 : vector<8x32xf32>
    %471 = arith.mulf %462, %344 : vector<8x32xf32>
    %472 = arith.mulf %456, %464 : vector<8x32xf32>
    %473 = arith.addf %471, %472 : vector<8x32xf32>
    %474 = math.tanh %473 : vector<8x32xf32>
    %475 = arith.mulf %470, %474 : vector<8x32xf32>
    %c3 = arith.constant 3 : index
    %c0_160 = arith.constant 0 : index
    %c0_161 = arith.constant 0 : index
    %476 = vector.load %arg2[%c3, %c0_160, %c0_161] : memref<13x32x128xf32, #tpu.memory_space<vmem>>, vector<1x32x128xf32>
    %477 = vector.shape_cast %476 : vector<1x32x128xf32> to vector<32x128xf32>
    %cst_162 = arith.constant dense<0.000000e+00> : vector<8x128xf32>
    %478 = tpu.matmul %475, %477, %cst_162 {dimension_numbers = #tpu.dot_dimension_numbers<[1], [0], [0], [1], [0, 0, 1, 1], [], []>} : vector<8x32xf32>, vector<32x128xf32>, vector<8x128xf32> -> vector<8x128xf32>
    %c3_163 = arith.constant 3 : index
    %c0_164 = arith.constant 0 : index
    %c0_165 = arith.constant 0 : index
    %479 = vector.load %arg3[%c3_163, %c0_164, %c0_165] : memref<13x1x128xf32, #tpu.memory_space<vmem>>, vector<1x1x128xf32>
    %480 = vector.shape_cast %479 : vector<1x1x128xf32> to vector<1x128xf32>
    %481 = vector.broadcast %480 : vector<1x128xf32> to vector<8x128xf32>
    %482 = arith.addf %478, %481 : vector<8x128xf32>
    %cst_166 = arith.constant 1.000000e+00 : f32
    %483 = vector.broadcast %cst_166 : f32 to vector<8x128xf32>
    %484 = arith.mulf %482, %483 : vector<8x128xf32>
    %c3_167 = arith.constant 3 : index
    %c0_168 = arith.constant 0 : index
    %c0_169 = arith.constant 0 : index
    %485 = vector.load %arg5[%c3_167, %c0_168, %c0_169] : memref<5x1x128xf32, #tpu.memory_space<vmem>>, vector<1x1x128xf32>
    %486 = vector.shape_cast %485 : vector<1x1x128xf32> to vector<1x128xf32>
    %487 = vector.broadcast %486 : vector<1x128xf32> to vector<8x128xf32>
    %488 = arith.addf %484, %487 : vector<8x128xf32>
    %c3_170 = arith.constant 3 : index
    %c0_171 = arith.constant 0 : index
    %c0_172 = arith.constant 0 : index
    %489 = vector.load %arg6[%c3_170, %c0_171, %c0_172] : memref<5x8x128xf32, #tpu.memory_space<vmem>>, vector<1x8x128xf32>
    %490 = vector.shape_cast %489 : vector<1x8x128xf32> to vector<8x128xf32>
    %491 = arith.addf %488, %490 : vector<8x128xf32>
    %492 = tpu.iota {dimensions = array<i32: 1>} : vector<8x128xi32>
    %cst_173 = arith.constant dense<0xFF800000> : vector<8xf32>
    %493 = vector.multi_reduction <maximumf>, %491, %cst_173 [1] : vector<8x128xf32> to vector<8xf32>
    %494 = vector.shape_cast %493 : vector<8xf32> to vector<8x1xf32>
    %495 = vector.broadcast %494 : vector<8x1xf32> to vector<8x128xf32>
    %496 = arith.cmpf oge, %491, %495 : vector<8x128xf32>
    %c128_i32_174 = arith.constant 128 : i32
    %497 = vector.broadcast %c128_i32_174 : i32 to vector<8x128xi32>
    %498 = arith.select %496, %492, %497 : vector<8x128xi1>, vector<8x128xi32>
    %cst_175 = arith.constant dense<2147483647> : vector<8xi32>
    %499 = vector.multi_reduction <minsi>, %498, %cst_175 [1] : vector<8x128xi32> to vector<8xi32>
    %500 = vector.shape_cast %499 : vector<8xi32> to vector<8x1xi32>
    %cst_176 = arith.constant dense<0xFF800000> : vector<8xf32>
    %501 = vector.multi_reduction <maximumf>, %488, %cst_176 [1] : vector<8x128xf32> to vector<8xf32>
    %502 = vector.shape_cast %501 : vector<8xf32> to vector<8x1xf32>
    %503 = vector.broadcast %502 : vector<8x1xf32> to vector<8x128xf32>
    %504 = arith.subf %488, %503 : vector<8x128xf32>
    %505 = math.exp %504 : vector<8x128xf32>
    %cst_177 = arith.constant dense<0.000000e+00> : vector<8xf32>
    %506 = vector.multi_reduction <add>, %505, %cst_177 [1] : vector<8x128xf32> to vector<8xf32>
    %507 = vector.shape_cast %506 : vector<8xf32> to vector<8x1xf32>
    %508 = math.log %507 : vector<8x1xf32>
    %509 = arith.addf %502, %508 : vector<8x1xf32>
    %510 = vector.broadcast %509 : vector<8x1xf32> to vector<8x128xf32>
    %511 = arith.subf %488, %510 : vector<8x128xf32>
    %512 = vector.broadcast %500 : vector<8x1xi32> to vector<8x128xi32>
    %513 = arith.cmpi eq, %492, %512 : vector<8x128xi32>
    %cst_178 = arith.constant 0.000000e+00 : f32
    %514 = vector.broadcast %cst_178 : f32 to vector<8x128xf32>
    %515 = arith.select %513, %511, %514 : vector<8x128xi1>, vector<8x128xf32>
    %cst_179 = arith.constant dense<0.000000e+00> : vector<8xf32>
    %516 = vector.multi_reduction <add>, %515, %cst_179 [1] : vector<8x128xf32> to vector<8xf32>
    %517 = vector.shape_cast %516 : vector<8xf32> to vector<8x1xf32>
    %c3_180 = arith.constant 3 : index
    %c0_181 = arith.constant 0 : index
    %c0_182 = arith.constant 0 : index
    %518 = vector.load %arg4[%c3_180, %c0_181, %c0_182] : memref<5x8x32xf32, #tpu.memory_space<vmem>>, vector<1x8x32xf32>
    %519 = vector.shape_cast %518 : vector<1x8x32xf32> to vector<8x32xf32>
    %cst_183 = arith.constant 0.000000e+00 : f32
    %520 = vector.broadcast %cst_183 : f32 to vector<8x32xf32>
    %c0_i32_184 = arith.constant 0 : i32
    %521 = vector.broadcast %c0_i32_184 : i32 to vector<8x1xi32>
    %522 = arith.cmpi eq, %500, %521 : vector<8x1xi32>
    %523 = arith.extui %522 : vector<8x1xi1> to vector<8x1xi32>
    %524 = arith.sitofp %523 : vector<8x1xi32> to vector<8x1xf32>
    %525 = vector.extract_strided_slice %519 {offsets = [0, 0], sizes = [1, 32], strides = [1, 1]} : vector<8x32xf32> to vector<1x32xf32>
    %526 = vector.broadcast %524 : vector<8x1xf32> to vector<8x32xf32>
    %527 = vector.broadcast %525 : vector<1x32xf32> to vector<8x32xf32>
    %528 = arith.mulf %526, %527 : vector<8x32xf32>
    %529 = arith.addf %520, %528 : vector<8x32xf32>
    %c1_i32_185 = arith.constant 1 : i32
    %530 = vector.broadcast %c1_i32_185 : i32 to vector<8x1xi32>
    %531 = arith.cmpi eq, %500, %530 : vector<8x1xi32>
    %532 = arith.extui %531 : vector<8x1xi1> to vector<8x1xi32>
    %533 = arith.sitofp %532 : vector<8x1xi32> to vector<8x1xf32>
    %534 = vector.extract_strided_slice %519 {offsets = [1, 0], sizes = [1, 32], strides = [1, 1]} : vector<8x32xf32> to vector<1x32xf32>
    %535 = vector.broadcast %533 : vector<8x1xf32> to vector<8x32xf32>
    %536 = vector.broadcast %534 : vector<1x32xf32> to vector<8x32xf32>
    %537 = arith.mulf %535, %536 : vector<8x32xf32>
    %538 = arith.addf %529, %537 : vector<8x32xf32>
    %539 = tpu.concatenate %538, %442 in 1 : vector<8x32xf32>, vector<8x32xf32> -> vector<8x64xf32>
    %c0_186 = arith.constant 0 : index
    %c0_187 = arith.constant 0 : index
    %c0_188 = arith.constant 0 : index
    %540 = vector.load %arg0[%c0_186, %c0_187, %c0_188] : memref<2x64x128xf32, #tpu.memory_space<vmem>>, vector<1x64x128xf32>
    %541 = vector.shape_cast %540 : vector<1x64x128xf32> to vector<64x128xf32>
    %cst_189 = arith.constant dense<0.000000e+00> : vector<8x128xf32>
    %542 = tpu.matmul %539, %541, %cst_189 {dimension_numbers = #tpu.dot_dimension_numbers<[1], [0], [0], [1], [0, 0, 1, 1], [], []>} : vector<8x64xf32>, vector<64x128xf32>, vector<8x128xf32> -> vector<8x128xf32>
    %c0_190 = arith.constant 0 : index
    %c0_191 = arith.constant 0 : index
    %c0_192 = arith.constant 0 : index
    %543 = vector.load %arg1[%c0_190, %c0_191, %c0_192] : memref<2x1x128xf32, #tpu.memory_space<vmem>>, vector<1x1x128xf32>
    %544 = vector.shape_cast %543 : vector<1x1x128xf32> to vector<1x128xf32>
    %545 = vector.broadcast %544 : vector<1x128xf32> to vector<8x128xf32>
    %546 = arith.addf %542, %545 : vector<8x128xf32>
    %547 = vector.extract_strided_slice %546 {offsets = [0, 0], sizes = [8, 32], strides = [1, 1]} : vector<8x128xf32> to vector<8x32xf32>
    %548 = arith.negf %547 : vector<8x32xf32>
    %549 = math.exp %548 : vector<8x32xf32>
    %cst_193 = arith.constant 1.000000e+00 : f32
    %550 = vector.broadcast %cst_193 : f32 to vector<8x32xf32>
    %551 = arith.addf %550, %549 : vector<8x32xf32>
    %552 = arith.divf %550, %551 : vector<8x32xf32>
    %553 = vector.extract_strided_slice %546 {offsets = [0, 32], sizes = [8, 32], strides = [1, 1]} : vector<8x128xf32> to vector<8x32xf32>
    %554 = arith.negf %553 : vector<8x32xf32>
    %555 = math.exp %554 : vector<8x32xf32>
    %cst_194 = arith.constant 1.000000e+00 : f32
    %556 = vector.broadcast %cst_194 : f32 to vector<8x32xf32>
    %557 = arith.addf %556, %555 : vector<8x32xf32>
    %558 = arith.divf %556, %557 : vector<8x32xf32>
    %559 = vector.extract_strided_slice %546 {offsets = [0, 64], sizes = [8, 32], strides = [1, 1]} : vector<8x128xf32> to vector<8x32xf32>
    %560 = math.tanh %559 : vector<8x32xf32>
    %561 = vector.extract_strided_slice %546 {offsets = [0, 96], sizes = [8, 32], strides = [1, 1]} : vector<8x128xf32> to vector<8x32xf32>
    %562 = arith.negf %561 : vector<8x32xf32>
    %563 = math.exp %562 : vector<8x32xf32>
    %cst_195 = arith.constant 1.000000e+00 : f32
    %564 = vector.broadcast %cst_195 : f32 to vector<8x32xf32>
    %565 = arith.addf %564, %563 : vector<8x32xf32>
    %566 = arith.divf %564, %565 : vector<8x32xf32>
    %567 = arith.mulf %558, %440 : vector<8x32xf32>
    %568 = arith.mulf %552, %560 : vector<8x32xf32>
    %569 = arith.addf %567, %568 : vector<8x32xf32>
    %570 = math.tanh %569 : vector<8x32xf32>
    %571 = arith.mulf %566, %570 : vector<8x32xf32>
    %572 = tpu.concatenate %571, %475 in 1 : vector<8x32xf32>, vector<8x32xf32> -> vector<8x64xf32>
    %c1_196 = arith.constant 1 : index
    %c0_197 = arith.constant 0 : index
    %c0_198 = arith.constant 0 : index
    %573 = vector.load %arg0[%c1_196, %c0_197, %c0_198] : memref<2x64x128xf32, #tpu.memory_space<vmem>>, vector<1x64x128xf32>
    %574 = vector.shape_cast %573 : vector<1x64x128xf32> to vector<64x128xf32>
    %cst_199 = arith.constant dense<0.000000e+00> : vector<8x128xf32>
    %575 = tpu.matmul %572, %574, %cst_199 {dimension_numbers = #tpu.dot_dimension_numbers<[1], [0], [0], [1], [0, 0, 1, 1], [], []>} : vector<8x64xf32>, vector<64x128xf32>, vector<8x128xf32> -> vector<8x128xf32>
    %c1_200 = arith.constant 1 : index
    %c0_201 = arith.constant 0 : index
    %c0_202 = arith.constant 0 : index
    %576 = vector.load %arg1[%c1_200, %c0_201, %c0_202] : memref<2x1x128xf32, #tpu.memory_space<vmem>>, vector<1x1x128xf32>
    %577 = vector.shape_cast %576 : vector<1x1x128xf32> to vector<1x128xf32>
    %578 = vector.broadcast %577 : vector<1x128xf32> to vector<8x128xf32>
    %579 = arith.addf %575, %578 : vector<8x128xf32>
    %580 = vector.extract_strided_slice %579 {offsets = [0, 0], sizes = [8, 32], strides = [1, 1]} : vector<8x128xf32> to vector<8x32xf32>
    %581 = arith.negf %580 : vector<8x32xf32>
    %582 = math.exp %581 : vector<8x32xf32>
    %cst_203 = arith.constant 1.000000e+00 : f32
    %583 = vector.broadcast %cst_203 : f32 to vector<8x32xf32>
    %584 = arith.addf %583, %582 : vector<8x32xf32>
    %585 = arith.divf %583, %584 : vector<8x32xf32>
    %586 = vector.extract_strided_slice %579 {offsets = [0, 32], sizes = [8, 32], strides = [1, 1]} : vector<8x128xf32> to vector<8x32xf32>
    %587 = arith.negf %586 : vector<8x32xf32>
    %588 = math.exp %587 : vector<8x32xf32>
    %cst_204 = arith.constant 1.000000e+00 : f32
    %589 = vector.broadcast %cst_204 : f32 to vector<8x32xf32>
    %590 = arith.addf %589, %588 : vector<8x32xf32>
    %591 = arith.divf %589, %590 : vector<8x32xf32>
    %592 = vector.extract_strided_slice %579 {offsets = [0, 64], sizes = [8, 32], strides = [1, 1]} : vector<8x128xf32> to vector<8x32xf32>
    %593 = math.tanh %592 : vector<8x32xf32>
    %594 = vector.extract_strided_slice %579 {offsets = [0, 96], sizes = [8, 32], strides = [1, 1]} : vector<8x128xf32> to vector<8x32xf32>
    %595 = arith.negf %594 : vector<8x32xf32>
    %596 = math.exp %595 : vector<8x32xf32>
    %cst_205 = arith.constant 1.000000e+00 : f32
    %597 = vector.broadcast %cst_205 : f32 to vector<8x32xf32>
    %598 = arith.addf %597, %596 : vector<8x32xf32>
    %599 = arith.divf %597, %598 : vector<8x32xf32>
    %600 = arith.mulf %591, %473 : vector<8x32xf32>
    %601 = arith.mulf %585, %593 : vector<8x32xf32>
    %602 = arith.addf %600, %601 : vector<8x32xf32>
    %603 = math.tanh %602 : vector<8x32xf32>
    %604 = arith.mulf %599, %603 : vector<8x32xf32>
    %c4 = arith.constant 4 : index
    %c0_206 = arith.constant 0 : index
    %c0_207 = arith.constant 0 : index
    %605 = vector.load %arg2[%c4, %c0_206, %c0_207] : memref<13x32x128xf32, #tpu.memory_space<vmem>>, vector<1x32x128xf32>
    %606 = vector.shape_cast %605 : vector<1x32x128xf32> to vector<32x128xf32>
    %cst_208 = arith.constant dense<0.000000e+00> : vector<8x128xf32>
    %607 = tpu.matmul %604, %606, %cst_208 {dimension_numbers = #tpu.dot_dimension_numbers<[1], [0], [0], [1], [0, 0, 1, 1], [], []>} : vector<8x32xf32>, vector<32x128xf32>, vector<8x128xf32> -> vector<8x128xf32>
    %c4_209 = arith.constant 4 : index
    %c0_210 = arith.constant 0 : index
    %c0_211 = arith.constant 0 : index
    %608 = vector.load %arg3[%c4_209, %c0_210, %c0_211] : memref<13x1x128xf32, #tpu.memory_space<vmem>>, vector<1x1x128xf32>
    %609 = vector.shape_cast %608 : vector<1x1x128xf32> to vector<1x128xf32>
    %610 = vector.broadcast %609 : vector<1x128xf32> to vector<8x128xf32>
    %611 = arith.addf %607, %610 : vector<8x128xf32>
    %cst_212 = arith.constant 1.000000e+00 : f32
    %612 = vector.broadcast %cst_212 : f32 to vector<8x128xf32>
    %613 = arith.mulf %611, %612 : vector<8x128xf32>
    %c4_213 = arith.constant 4 : index
    %c0_214 = arith.constant 0 : index
    %c0_215 = arith.constant 0 : index
    %614 = vector.load %arg5[%c4_213, %c0_214, %c0_215] : memref<5x1x128xf32, #tpu.memory_space<vmem>>, vector<1x1x128xf32>
    %615 = vector.shape_cast %614 : vector<1x1x128xf32> to vector<1x128xf32>
    %616 = vector.broadcast %615 : vector<1x128xf32> to vector<8x128xf32>
    %617 = arith.addf %613, %616 : vector<8x128xf32>
    %c4_216 = arith.constant 4 : index
    %c0_217 = arith.constant 0 : index
    %c0_218 = arith.constant 0 : index
    %618 = vector.load %arg6[%c4_216, %c0_217, %c0_218] : memref<5x8x128xf32, #tpu.memory_space<vmem>>, vector<1x8x128xf32>
    %619 = vector.shape_cast %618 : vector<1x8x128xf32> to vector<8x128xf32>
    %620 = arith.addf %617, %619 : vector<8x128xf32>
    %621 = tpu.iota {dimensions = array<i32: 1>} : vector<8x128xi32>
    %cst_219 = arith.constant dense<0xFF800000> : vector<8xf32>
    %622 = vector.multi_reduction <maximumf>, %620, %cst_219 [1] : vector<8x128xf32> to vector<8xf32>
    %623 = vector.shape_cast %622 : vector<8xf32> to vector<8x1xf32>
    %624 = vector.broadcast %623 : vector<8x1xf32> to vector<8x128xf32>
    %625 = arith.cmpf oge, %620, %624 : vector<8x128xf32>
    %c128_i32_220 = arith.constant 128 : i32
    %626 = vector.broadcast %c128_i32_220 : i32 to vector<8x128xi32>
    %627 = arith.select %625, %621, %626 : vector<8x128xi1>, vector<8x128xi32>
    %cst_221 = arith.constant dense<2147483647> : vector<8xi32>
    %628 = vector.multi_reduction <minsi>, %627, %cst_221 [1] : vector<8x128xi32> to vector<8xi32>
    %629 = vector.shape_cast %628 : vector<8xi32> to vector<8x1xi32>
    %cst_222 = arith.constant dense<0xFF800000> : vector<8xf32>
    %630 = vector.multi_reduction <maximumf>, %617, %cst_222 [1] : vector<8x128xf32> to vector<8xf32>
    %631 = vector.shape_cast %630 : vector<8xf32> to vector<8x1xf32>
    %632 = vector.broadcast %631 : vector<8x1xf32> to vector<8x128xf32>
    %633 = arith.subf %617, %632 : vector<8x128xf32>
    %634 = math.exp %633 : vector<8x128xf32>
    %cst_223 = arith.constant dense<0.000000e+00> : vector<8xf32>
    %635 = vector.multi_reduction <add>, %634, %cst_223 [1] : vector<8x128xf32> to vector<8xf32>
    %636 = vector.shape_cast %635 : vector<8xf32> to vector<8x1xf32>
    %637 = math.log %636 : vector<8x1xf32>
    %638 = arith.addf %631, %637 : vector<8x1xf32>
    %639 = vector.broadcast %638 : vector<8x1xf32> to vector<8x128xf32>
    %640 = arith.subf %617, %639 : vector<8x128xf32>
    %641 = vector.broadcast %629 : vector<8x1xi32> to vector<8x128xi32>
    %642 = arith.cmpi eq, %621, %641 : vector<8x128xi32>
    %cst_224 = arith.constant 0.000000e+00 : f32
    %643 = vector.broadcast %cst_224 : f32 to vector<8x128xf32>
    %644 = arith.select %642, %640, %643 : vector<8x128xi1>, vector<8x128xf32>
    %cst_225 = arith.constant dense<0.000000e+00> : vector<8xf32>
    %645 = vector.multi_reduction <add>, %644, %cst_225 [1] : vector<8x128xf32> to vector<8xf32>
    %646 = vector.shape_cast %645 : vector<8xf32> to vector<8x1xf32>
    %c4_226 = arith.constant 4 : index
    %c0_227 = arith.constant 0 : index
    %c0_228 = arith.constant 0 : index
    %647 = vector.load %arg4[%c4_226, %c0_227, %c0_228] : memref<5x8x32xf32, #tpu.memory_space<vmem>>, vector<1x8x32xf32>
    %648 = vector.shape_cast %647 : vector<1x8x32xf32> to vector<8x32xf32>
    %cst_229 = arith.constant 0.000000e+00 : f32
    %649 = vector.broadcast %cst_229 : f32 to vector<8x32xf32>
    %c0_i32_230 = arith.constant 0 : i32
    %650 = vector.broadcast %c0_i32_230 : i32 to vector<8x1xi32>
    %651 = arith.cmpi eq, %629, %650 : vector<8x1xi32>
    %652 = arith.extui %651 : vector<8x1xi1> to vector<8x1xi32>
    %653 = arith.sitofp %652 : vector<8x1xi32> to vector<8x1xf32>
    %654 = vector.extract_strided_slice %648 {offsets = [0, 0], sizes = [1, 32], strides = [1, 1]} : vector<8x32xf32> to vector<1x32xf32>
    %655 = vector.broadcast %653 : vector<8x1xf32> to vector<8x32xf32>
    %656 = vector.broadcast %654 : vector<1x32xf32> to vector<8x32xf32>
    %657 = arith.mulf %655, %656 : vector<8x32xf32>
    %658 = arith.addf %649, %657 : vector<8x32xf32>
    %c1_i32_231 = arith.constant 1 : i32
    %659 = vector.broadcast %c1_i32_231 : i32 to vector<8x1xi32>
    %660 = arith.cmpi eq, %629, %659 : vector<8x1xi32>
    %661 = arith.extui %660 : vector<8x1xi1> to vector<8x1xi32>
    %662 = arith.sitofp %661 : vector<8x1xi32> to vector<8x1xf32>
    %663 = vector.extract_strided_slice %648 {offsets = [1, 0], sizes = [1, 32], strides = [1, 1]} : vector<8x32xf32> to vector<1x32xf32>
    %664 = vector.broadcast %662 : vector<8x1xf32> to vector<8x32xf32>
    %665 = vector.broadcast %663 : vector<1x32xf32> to vector<8x32xf32>
    %666 = arith.mulf %664, %665 : vector<8x32xf32>
    %667 = arith.addf %658, %666 : vector<8x32xf32>
    %c2_i32_232 = arith.constant 2 : i32
    %668 = vector.broadcast %c2_i32_232 : i32 to vector<8x1xi32>
    %669 = arith.cmpi eq, %629, %668 : vector<8x1xi32>
    %670 = arith.extui %669 : vector<8x1xi1> to vector<8x1xi32>
    %671 = arith.sitofp %670 : vector<8x1xi32> to vector<8x1xf32>
    %672 = vector.extract_strided_slice %648 {offsets = [2, 0], sizes = [1, 32], strides = [1, 1]} : vector<8x32xf32> to vector<1x32xf32>
    %673 = vector.broadcast %671 : vector<8x1xf32> to vector<8x32xf32>
    %674 = vector.broadcast %672 : vector<1x32xf32> to vector<8x32xf32>
    %675 = arith.mulf %673, %674 : vector<8x32xf32>
    %676 = arith.addf %667, %675 : vector<8x32xf32>
    %c3_i32 = arith.constant 3 : i32
    %677 = vector.broadcast %c3_i32 : i32 to vector<8x1xi32>
    %678 = arith.cmpi eq, %629, %677 : vector<8x1xi32>
    %679 = arith.extui %678 : vector<8x1xi1> to vector<8x1xi32>
    %680 = arith.sitofp %679 : vector<8x1xi32> to vector<8x1xf32>
    %681 = vector.extract_strided_slice %648 {offsets = [3, 0], sizes = [1, 32], strides = [1, 1]} : vector<8x32xf32> to vector<1x32xf32>
    %682 = vector.broadcast %680 : vector<8x1xf32> to vector<8x32xf32>
    %683 = vector.broadcast %681 : vector<1x32xf32> to vector<8x32xf32>
    %684 = arith.mulf %682, %683 : vector<8x32xf32>
    %685 = arith.addf %676, %684 : vector<8x32xf32>
    %686 = tpu.concatenate %95, %233, %371, %500, %629 in 1 : vector<8x1xi32>, vector<8x1xi32>, vector<8x1xi32>, vector<8x1xi32>, vector<8x1xi32> -> vector<8x5xi32>
    %c0_233 = arith.constant 0 : index
    %c0_234 = arith.constant 0 : index
    %687 = vector.load %arg8[%c0_233, %c0_234] : memref<8x5xi32, #tpu.memory_space<vmem>>, vector<8x5xi32>
    tpu.vector_store %arg8[%c0_233, %c0_234], %686 {strides = array<i32>} : memref<8x5xi32, #tpu.memory_space<vmem>>, vector<8x5xi32>,
    %688 = tpu.concatenate %112, %250, %388, %517, %646 in 1 : vector<8x1xf32>, vector<8x1xf32>, vector<8x1xf32>, vector<8x1xf32>, vector<8x1xf32> -> vector<8x5xf32>
    %c0_235 = arith.constant 0 : index
    %c0_236 = arith.constant 0 : index
    %689 = vector.load %arg9[%c0_235, %c0_236] : memref<8x5xf32, #tpu.memory_space<vmem>>, vector<8x5xf32>
    tpu.vector_store %arg9[%c0_235, %c0_236], %688 {strides = array<i32>} : memref<8x5xf32, #tpu.memory_space<vmem>>, vector<8x5xf32>,
    %690 = tpu.concatenate %685, %571 in 1 : vector<8x32xf32>, vector<8x32xf32> -> vector<8x64xf32>
    %c0_237 = arith.constant 0 : index
    %c0_238 = arith.constant 0 : index
    %c0_239 = arith.constant 0 : index
    %691 = vector.load %arg0[%c0_237, %c0_238, %c0_239] : memref<2x64x128xf32, #tpu.memory_space<vmem>>, vector<1x64x128xf32>
    %692 = vector.shape_cast %691 : vector<1x64x128xf32> to vector<64x128xf32>
    %cst_240 = arith.constant dense<0.000000e+00> : vector<8x128xf32>
    %693 = tpu.matmul %690, %692, %cst_240 {dimension_numbers = #tpu.dot_dimension_numbers<[1], [0], [0], [1], [0, 0, 1, 1], [], []>} : vector<8x64xf32>, vector<64x128xf32>, vector<8x128xf32> -> vector<8x128xf32>
    %c0_241 = arith.constant 0 : index
    %c0_242 = arith.constant 0 : index
    %c0_243 = arith.constant 0 : index
    %694 = vector.load %arg1[%c0_241, %c0_242, %c0_243] : memref<2x1x128xf32, #tpu.memory_space<vmem>>, vector<1x1x128xf32>
    %695 = vector.shape_cast %694 : vector<1x1x128xf32> to vector<1x128xf32>
    %696 = vector.broadcast %695 : vector<1x128xf32> to vector<8x128xf32>
    %697 = arith.addf %693, %696 : vector<8x128xf32>
    %698 = vector.extract_strided_slice %697 {offsets = [0, 0], sizes = [8, 32], strides = [1, 1]} : vector<8x128xf32> to vector<8x32xf32>
    %699 = arith.negf %698 : vector<8x32xf32>
    %700 = math.exp %699 : vector<8x32xf32>
    %cst_244 = arith.constant 1.000000e+00 : f32
    %701 = vector.broadcast %cst_244 : f32 to vector<8x32xf32>
    %702 = arith.addf %701, %700 : vector<8x32xf32>
    %703 = arith.divf %701, %702 : vector<8x32xf32>
    %704 = vector.extract_strided_slice %697 {offsets = [0, 32], sizes = [8, 32], strides = [1, 1]} : vector<8x128xf32> to vector<8x32xf32>
    %705 = arith.negf %704 : vector<8x32xf32>
    %706 = math.exp %705 : vector<8x32xf32>
    %cst_245 = arith.constant 1.000000e+00 : f32
    %707 = vector.broadcast %cst_245 : f32 to vector<8x32xf32>
    %708 = arith.addf %707, %706 : vector<8x32xf32>
    %709 = arith.divf %707, %708 : vector<8x32xf32>
    %710 = vector.extract_strided_slice %697 {offsets = [0, 64], sizes = [8, 32], strides = [1, 1]} : vector<8x128xf32> to vector<8x32xf32>
    %711 = math.tanh %710 : vector<8x32xf32>
    %712 = vector.extract_strided_slice %697 {offsets = [0, 96], sizes = [8, 32], strides = [1, 1]} : vector<8x128xf32> to vector<8x32xf32>
    %713 = arith.negf %712 : vector<8x32xf32>
    %714 = math.exp %713 : vector<8x32xf32>
    %cst_246 = arith.constant 1.000000e+00 : f32
    %715 = vector.broadcast %cst_246 : f32 to vector<8x32xf32>
    %716 = arith.addf %715, %714 : vector<8x32xf32>
    %717 = arith.divf %715, %716 : vector<8x32xf32>
    %718 = arith.mulf %709, %569 : vector<8x32xf32>
    %719 = arith.mulf %703, %711 : vector<8x32xf32>
    %720 = arith.addf %718, %719 : vector<8x32xf32>
    %721 = math.tanh %720 : vector<8x32xf32>
    %722 = arith.mulf %717, %721 : vector<8x32xf32>
    %723 = tpu.concatenate %722, %604 in 1 : vector<8x32xf32>, vector<8x32xf32> -> vector<8x64xf32>
    %c1_247 = arith.constant 1 : index
    %c0_248 = arith.constant 0 : index
    %c0_249 = arith.constant 0 : index
    %724 = vector.load %arg0[%c1_247, %c0_248, %c0_249] : memref<2x64x128xf32, #tpu.memory_space<vmem>>, vector<1x64x128xf32>
    %725 = vector.shape_cast %724 : vector<1x64x128xf32> to vector<64x128xf32>
    %cst_250 = arith.constant dense<0.000000e+00> : vector<8x128xf32>
    %726 = tpu.matmul %723, %725, %cst_250 {dimension_numbers = #tpu.dot_dimension_numbers<[1], [0], [0], [1], [0, 0, 1, 1], [], []>} : vector<8x64xf32>, vector<64x128xf32>, vector<8x128xf32> -> vector<8x128xf32>
    %c1_251 = arith.constant 1 : index
    %c0_252 = arith.constant 0 : index
    %c0_253 = arith.constant 0 : index
    %727 = vector.load %arg1[%c1_251, %c0_252, %c0_253] : memref<2x1x128xf32, #tpu.memory_space<vmem>>, vector<1x1x128xf32>
    %728 = vector.shape_cast %727 : vector<1x1x128xf32> to vector<1x128xf32>
    %729 = vector.broadcast %728 : vector<1x128xf32> to vector<8x128xf32>
    %730 = arith.addf %726, %729 : vector<8x128xf32>
    %731 = vector.extract_strided_slice %730 {offsets = [0, 0], sizes = [8, 32], strides = [1, 1]} : vector<8x128xf32> to vector<8x32xf32>
    %732 = arith.negf %731 : vector<8x32xf32>
    %733 = math.exp %732 : vector<8x32xf32>
    %cst_254 = arith.constant 1.000000e+00 : f32
    %734 = vector.broadcast %cst_254 : f32 to vector<8x32xf32>
    %735 = arith.addf %734, %733 : vector<8x32xf32>
    %736 = arith.divf %734, %735 : vector<8x32xf32>
    %737 = vector.extract_strided_slice %730 {offsets = [0, 32], sizes = [8, 32], strides = [1, 1]} : vector<8x128xf32> to vector<8x32xf32>
    %738 = arith.negf %737 : vector<8x32xf32>
    %739 = math.exp %738 : vector<8x32xf32>
    %cst_255 = arith.constant 1.000000e+00 : f32
    %740 = vector.broadcast %cst_255 : f32 to vector<8x32xf32>
    %741 = arith.addf %740, %739 : vector<8x32xf32>
    %742 = arith.divf %740, %741 : vector<8x32xf32>
    %743 = vector.extract_strided_slice %730 {offsets = [0, 64], sizes = [8, 32], strides = [1, 1]} : vector<8x128xf32> to vector<8x32xf32>
    %744 = math.tanh %743 : vector<8x32xf32>
    %745 = vector.extract_strided_slice %730 {offsets = [0, 96], sizes = [8, 32], strides = [1, 1]} : vector<8x128xf32> to vector<8x32xf32>
    %746 = arith.negf %745 : vector<8x32xf32>
    %747 = math.exp %746 : vector<8x32xf32>
    %cst_256 = arith.constant 1.000000e+00 : f32
    %748 = vector.broadcast %cst_256 : f32 to vector<8x32xf32>
    %749 = arith.addf %748, %747 : vector<8x32xf32>
    %750 = arith.divf %748, %749 : vector<8x32xf32>
    %751 = arith.mulf %742, %602 : vector<8x32xf32>
    %752 = arith.mulf %736, %744 : vector<8x32xf32>
    %753 = arith.addf %751, %752 : vector<8x32xf32>
    %754 = math.tanh %753 : vector<8x32xf32>
    %755 = arith.mulf %750, %754 : vector<8x32xf32>
    %c5 = arith.constant 5 : index
    %c0_257 = arith.constant 0 : index
    %c0_258 = arith.constant 0 : index
    %756 = vector.load %arg2[%c5, %c0_257, %c0_258] : memref<13x32x128xf32, #tpu.memory_space<vmem>>, vector<1x32x128xf32>
    %757 = vector.shape_cast %756 : vector<1x32x128xf32> to vector<32x128xf32>
    %cst_259 = arith.constant dense<0.000000e+00> : vector<8x128xf32>
    %758 = tpu.matmul %755, %757, %cst_259 {dimension_numbers = #tpu.dot_dimension_numbers<[1], [0], [0], [1], [0, 0, 1, 1], [], []>} : vector<8x32xf32>, vector<32x128xf32>, vector<8x128xf32> -> vector<8x128xf32>
    %c5_260 = arith.constant 5 : index
    %c0_261 = arith.constant 0 : index
    %c0_262 = arith.constant 0 : index
    %759 = vector.load %arg3[%c5_260, %c0_261, %c0_262] : memref<13x1x128xf32, #tpu.memory_space<vmem>>, vector<1x1x128xf32>
    %760 = vector.shape_cast %759 : vector<1x1x128xf32> to vector<1x128xf32>
    %761 = vector.broadcast %760 : vector<1x128xf32> to vector<8x128xf32>
    %762 = arith.addf %758, %761 : vector<8x128xf32>
    %763 = vector.extract_strided_slice %762 {offsets = [0, 0], sizes = [8, 1], strides = [1, 1]} : vector<8x128xf32> to vector<8x1xf32>
    %764 = vector.extract_strided_slice %762 {offsets = [0, 1], sizes = [8, 1], strides = [1, 1]} : vector<8x128xf32> to vector<8x1xf32>
    %c0_263 = arith.constant 0 : index
    %c0_264 = arith.constant 0 : index
    %c0_265 = arith.constant 0 : index
    %765 = vector.load %arg7[%c0_263, %c0_264, %c0_265] : memref<8x8x1xf32, #tpu.memory_space<vmem>>, vector<1x8x1xf32>
    %766 = vector.shape_cast %765 : vector<1x8x1xf32> to vector<8x1xf32>
    %767 = math.exp %764 : vector<8x1xf32>
    %768 = arith.mulf %767, %766 : vector<8x1xf32>
    %769 = arith.addf %763, %768 : vector<8x1xf32>
    %cst_266 = arith.constant -5.000000e-01 : f32
    %770 = vector.broadcast %cst_266 : f32 to vector<8x1xf32>
    %771 = arith.mulf %770, %766 : vector<8x1xf32>
    %772 = arith.mulf %771, %766 : vector<8x1xf32>
    %773 = arith.subf %772, %764 : vector<8x1xf32>
    %cst_267 = arith.constant 0.918938517 : f32
    %774 = vector.broadcast %cst_267 : f32 to vector<8x1xf32>
    %775 = arith.subf %773, %774 : vector<8x1xf32>
    %776 = tpu.concatenate %685, %722 in 1 : vector<8x32xf32>, vector<8x32xf32> -> vector<8x64xf32>
    %c0_268 = arith.constant 0 : index
    %c0_269 = arith.constant 0 : index
    %c0_270 = arith.constant 0 : index
    %777 = vector.load %arg0[%c0_268, %c0_269, %c0_270] : memref<2x64x128xf32, #tpu.memory_space<vmem>>, vector<1x64x128xf32>
    %778 = vector.shape_cast %777 : vector<1x64x128xf32> to vector<64x128xf32>
    %cst_271 = arith.constant dense<0.000000e+00> : vector<8x128xf32>
    %779 = tpu.matmul %776, %778, %cst_271 {dimension_numbers = #tpu.dot_dimension_numbers<[1], [0], [0], [1], [0, 0, 1, 1], [], []>} : vector<8x64xf32>, vector<64x128xf32>, vector<8x128xf32> -> vector<8x128xf32>
    %c0_272 = arith.constant 0 : index
    %c0_273 = arith.constant 0 : index
    %c0_274 = arith.constant 0 : index
    %780 = vector.load %arg1[%c0_272, %c0_273, %c0_274] : memref<2x1x128xf32, #tpu.memory_space<vmem>>, vector<1x1x128xf32>
    %781 = vector.shape_cast %780 : vector<1x1x128xf32> to vector<1x128xf32>
    %782 = vector.broadcast %781 : vector<1x128xf32> to vector<8x128xf32>
    %783 = arith.addf %779, %782 : vector<8x128xf32>
    %784 = vector.extract_strided_slice %783 {offsets = [0, 0], sizes = [8, 32], strides = [1, 1]} : vector<8x128xf32> to vector<8x32xf32>
    %785 = arith.negf %784 : vector<8x32xf32>
    %786 = math.exp %785 : vector<8x32xf32>
    %cst_275 = arith.constant 1.000000e+00 : f32
    %787 = vector.broadcast %cst_275 : f32 to vector<8x32xf32>
    %788 = arith.addf %787, %786 : vector<8x32xf32>
    %789 = arith.divf %787, %788 : vector<8x32xf32>
    %790 = vector.extract_strided_slice %783 {offsets = [0, 32], sizes = [8, 32], strides = [1, 1]} : vector<8x128xf32> to vector<8x32xf32>
    %791 = arith.negf %790 : vector<8x32xf32>
    %792 = math.exp %791 : vector<8x32xf32>
    %cst_276 = arith.constant 1.000000e+00 : f32
    %793 = vector.broadcast %cst_276 : f32 to vector<8x32xf32>
    %794 = arith.addf %793, %792 : vector<8x32xf32>
    %795 = arith.divf %793, %794 : vector<8x32xf32>
    %796 = vector.extract_strided_slice %783 {offsets = [0, 64], sizes = [8, 32], strides = [1, 1]} : vector<8x128xf32> to vector<8x32xf32>
    %797 = math.tanh %796 : vector<8x32xf32>
    %798 = vector.extract_strided_slice %783 {offsets = [0, 96], sizes = [8, 32], strides = [1, 1]} : vector<8x128xf32> to vector<8x32xf32>
    %799 = arith.negf %798 : vector<8x32xf32>
    %800 = math.exp %799 : vector<8x32xf32>
    %cst_277 = arith.constant 1.000000e+00 : f32
    %801 = vector.broadcast %cst_277 : f32 to vector<8x32xf32>
    %802 = arith.addf %801, %800 : vector<8x32xf32>
    %803 = arith.divf %801, %802 : vector<8x32xf32>
    %804 = arith.mulf %795, %720 : vector<8x32xf32>
    %805 = arith.mulf %789, %797 : vector<8x32xf32>
    %806 = arith.addf %804, %805 : vector<8x32xf32>
    %807 = math.tanh %806 : vector<8x32xf32>
    %808 = arith.mulf %803, %807 : vector<8x32xf32>
    %809 = tpu.concatenate %808, %755 in 1 : vector<8x32xf32>, vector<8x32xf32> -> vector<8x64xf32>
    %c1_278 = arith.constant 1 : index
    %c0_279 = arith.constant 0 : index
    %c0_280 = arith.constant 0 : index
    %810 = vector.load %arg0[%c1_278, %c0_279, %c0_280] : memref<2x64x128xf32, #tpu.memory_space<vmem>>, vector<1x64x128xf32>
    %811 = vector.shape_cast %810 : vector<1x64x128xf32> to vector<64x128xf32>
    %cst_281 = arith.constant dense<0.000000e+00> : vector<8x128xf32>
    %812 = tpu.matmul %809, %811, %cst_281 {dimension_numbers = #tpu.dot_dimension_numbers<[1], [0], [0], [1], [0, 0, 1, 1], [], []>} : vector<8x64xf32>, vector<64x128xf32>, vector<8x128xf32> -> vector<8x128xf32>
    %c1_282 = arith.constant 1 : index
    %c0_283 = arith.constant 0 : index
    %c0_284 = arith.constant 0 : index
    %813 = vector.load %arg1[%c1_282, %c0_283, %c0_284] : memref<2x1x128xf32, #tpu.memory_space<vmem>>, vector<1x1x128xf32>
    %814 = vector.shape_cast %813 : vector<1x1x128xf32> to vector<1x128xf32>
    %815 = vector.broadcast %814 : vector<1x128xf32> to vector<8x128xf32>
    %816 = arith.addf %812, %815 : vector<8x128xf32>
    %817 = vector.extract_strided_slice %816 {offsets = [0, 0], sizes = [8, 32], strides = [1, 1]} : vector<8x128xf32> to vector<8x32xf32>
    %818 = arith.negf %817 : vector<8x32xf32>
    %819 = math.exp %818 : vector<8x32xf32>
    %cst_285 = arith.constant 1.000000e+00 : f32
    %820 = vector.broadcast %cst_285 : f32 to vector<8x32xf32>
    %821 = arith.addf %820, %819 : vector<8x32xf32>
    %822 = arith.divf %820, %821 : vector<8x32xf32>
    %823 = vector.extract_strided_slice %816 {offsets = [0, 32], sizes = [8, 32], strides = [1, 1]} : vector<8x128xf32> to vector<8x32xf32>
    %824 = arith.negf %823 : vector<8x32xf32>
    %825 = math.exp %824 : vector<8x32xf32>
    %cst_286 = arith.constant 1.000000e+00 : f32
    %826 = vector.broadcast %cst_286 : f32 to vector<8x32xf32>
    %827 = arith.addf %826, %825 : vector<8x32xf32>
    %828 = arith.divf %826, %827 : vector<8x32xf32>
    %829 = vector.extract_strided_slice %816 {offsets = [0, 64], sizes = [8, 32], strides = [1, 1]} : vector<8x128xf32> to vector<8x32xf32>
    %830 = math.tanh %829 : vector<8x32xf32>
    %831 = vector.extract_strided_slice %816 {offsets = [0, 96], sizes = [8, 32], strides = [1, 1]} : vector<8x128xf32> to vector<8x32xf32>
    %832 = arith.negf %831 : vector<8x32xf32>
    %833 = math.exp %832 : vector<8x32xf32>
    %cst_287 = arith.constant 1.000000e+00 : f32
    %834 = vector.broadcast %cst_287 : f32 to vector<8x32xf32>
    %835 = arith.addf %834, %833 : vector<8x32xf32>
    %836 = arith.divf %834, %835 : vector<8x32xf32>
    %837 = arith.mulf %828, %753 : vector<8x32xf32>
    %838 = arith.mulf %822, %830 : vector<8x32xf32>
    %839 = arith.addf %837, %838 : vector<8x32xf32>
    %840 = math.tanh %839 : vector<8x32xf32>
    %841 = arith.mulf %836, %840 : vector<8x32xf32>
    %c6 = arith.constant 6 : index
    %c0_288 = arith.constant 0 : index
    %c0_289 = arith.constant 0 : index
    %842 = vector.load %arg2[%c6, %c0_288, %c0_289] : memref<13x32x128xf32, #tpu.memory_space<vmem>>, vector<1x32x128xf32>
    %843 = vector.shape_cast %842 : vector<1x32x128xf32> to vector<32x128xf32>
    %cst_290 = arith.constant dense<0.000000e+00> : vector<8x128xf32>
    %844 = tpu.matmul %841, %843, %cst_290 {dimension_numbers = #tpu.dot_dimension_numbers<[1], [0], [0], [1], [0, 0, 1, 1], [], []>} : vector<8x32xf32>, vector<32x128xf32>, vector<8x128xf32> -> vector<8x128xf32>
    %c6_291 = arith.constant 6 : index
    %c0_292 = arith.constant 0 : index
    %c0_293 = arith.constant 0 : index
    %845 = vector.load %arg3[%c6_291, %c0_292, %c0_293] : memref<13x1x128xf32, #tpu.memory_space<vmem>>, vector<1x1x128xf32>
    %846 = vector.shape_cast %845 : vector<1x1x128xf32> to vector<1x128xf32>
    %847 = vector.broadcast %846 : vector<1x128xf32> to vector<8x128xf32>
    %848 = arith.addf %844, %847 : vector<8x128xf32>
    %849 = vector.extract_strided_slice %848 {offsets = [0, 0], sizes = [8, 1], strides = [1, 1]} : vector<8x128xf32> to vector<8x1xf32>
    %850 = vector.extract_strided_slice %848 {offsets = [0, 1], sizes = [8, 1], strides = [1, 1]} : vector<8x128xf32> to vector<8x1xf32>
    %c1_294 = arith.constant 1 : index
    %c0_295 = arith.constant 0 : index
    %c0_296 = arith.constant 0 : index
    %851 = vector.load %arg7[%c1_294, %c0_295, %c0_296] : memref<8x8x1xf32, #tpu.memory_space<vmem>>, vector<1x8x1xf32>
    %852 = vector.shape_cast %851 : vector<1x8x1xf32> to vector<8x1xf32>
    %853 = math.exp %850 : vector<8x1xf32>
    %854 = arith.mulf %853, %852 : vector<8x1xf32>
    %855 = arith.addf %849, %854 : vector<8x1xf32>
    %cst_297 = arith.constant -5.000000e-01 : f32
    %856 = vector.broadcast %cst_297 : f32 to vector<8x1xf32>
    %857 = arith.mulf %856, %852 : vector<8x1xf32>
    %858 = arith.mulf %857, %852 : vector<8x1xf32>
    %859 = arith.subf %858, %850 : vector<8x1xf32>
    %cst_298 = arith.constant 0.918938517 : f32
    %860 = vector.broadcast %cst_298 : f32 to vector<8x1xf32>
    %861 = arith.subf %859, %860 : vector<8x1xf32>
    %862 = tpu.concatenate %685, %808 in 1 : vector<8x32xf32>, vector<8x32xf32> -> vector<8x64xf32>
    %c0_299 = arith.constant 0 : index
    %c0_300 = arith.constant 0 : index
    %c0_301 = arith.constant 0 : index
    %863 = vector.load %arg0[%c0_299, %c0_300, %c0_301] : memref<2x64x128xf32, #tpu.memory_space<vmem>>, vector<1x64x128xf32>
    %864 = vector.shape_cast %863 : vector<1x64x128xf32> to vector<64x128xf32>
    %cst_302 = arith.constant dense<0.000000e+00> : vector<8x128xf32>
    %865 = tpu.matmul %862, %864, %cst_302 {dimension_numbers = #tpu.dot_dimension_numbers<[1], [0], [0], [1], [0, 0, 1, 1], [], []>} : vector<8x64xf32>, vector<64x128xf32>, vector<8x128xf32> -> vector<8x128xf32>
    %c0_303 = arith.constant 0 : index
    %c0_304 = arith.constant 0 : index
    %c0_305 = arith.constant 0 : index
    %866 = vector.load %arg1[%c0_303, %c0_304, %c0_305] : memref<2x1x128xf32, #tpu.memory_space<vmem>>, vector<1x1x128xf32>
    %867 = vector.shape_cast %866 : vector<1x1x128xf32> to vector<1x128xf32>
    %868 = vector.broadcast %867 : vector<1x128xf32> to vector<8x128xf32>
    %869 = arith.addf %865, %868 : vector<8x128xf32>
    %870 = vector.extract_strided_slice %869 {offsets = [0, 0], sizes = [8, 32], strides = [1, 1]} : vector<8x128xf32> to vector<8x32xf32>
    %871 = arith.negf %870 : vector<8x32xf32>
    %872 = math.exp %871 : vector<8x32xf32>
    %cst_306 = arith.constant 1.000000e+00 : f32
    %873 = vector.broadcast %cst_306 : f32 to vector<8x32xf32>
    %874 = arith.addf %873, %872 : vector<8x32xf32>
    %875 = arith.divf %873, %874 : vector<8x32xf32>
    %876 = vector.extract_strided_slice %869 {offsets = [0, 32], sizes = [8, 32], strides = [1, 1]} : vector<8x128xf32> to vector<8x32xf32>
    %877 = arith.negf %876 : vector<8x32xf32>
    %878 = math.exp %877 : vector<8x32xf32>
    %cst_307 = arith.constant 1.000000e+00 : f32
    %879 = vector.broadcast %cst_307 : f32 to vector<8x32xf32>
    %880 = arith.addf %879, %878 : vector<8x32xf32>
    %881 = arith.divf %879, %880 : vector<8x32xf32>
    %882 = vector.extract_strided_slice %869 {offsets = [0, 64], sizes = [8, 32], strides = [1, 1]} : vector<8x128xf32> to vector<8x32xf32>
    %883 = math.tanh %882 : vector<8x32xf32>
    %884 = vector.extract_strided_slice %869 {offsets = [0, 96], sizes = [8, 32], strides = [1, 1]} : vector<8x128xf32> to vector<8x32xf32>
    %885 = arith.negf %884 : vector<8x32xf32>
    %886 = math.exp %885 : vector<8x32xf32>
    %cst_308 = arith.constant 1.000000e+00 : f32
    %887 = vector.broadcast %cst_308 : f32 to vector<8x32xf32>
    %888 = arith.addf %887, %886 : vector<8x32xf32>
    %889 = arith.divf %887, %888 : vector<8x32xf32>
    %890 = arith.mulf %881, %806 : vector<8x32xf32>
    %891 = arith.mulf %875, %883 : vector<8x32xf32>
    %892 = arith.addf %890, %891 : vector<8x32xf32>
    %893 = math.tanh %892 : vector<8x32xf32>
    %894 = arith.mulf %889, %893 : vector<8x32xf32>
    %895 = tpu.concatenate %894, %841 in 1 : vector<8x32xf32>, vector<8x32xf32> -> vector<8x64xf32>
    %c1_309 = arith.constant 1 : index
    %c0_310 = arith.constant 0 : index
    %c0_311 = arith.constant 0 : index
    %896 = vector.load %arg0[%c1_309, %c0_310, %c0_311] : memref<2x64x128xf32, #tpu.memory_space<vmem>>, vector<1x64x128xf32>
    %897 = vector.shape_cast %896 : vector<1x64x128xf32> to vector<64x128xf32>
    %cst_312 = arith.constant dense<0.000000e+00> : vector<8x128xf32>
    %898 = tpu.matmul %895, %897, %cst_312 {dimension_numbers = #tpu.dot_dimension_numbers<[1], [0], [0], [1], [0, 0, 1, 1], [], []>} : vector<8x64xf32>, vector<64x128xf32>, vector<8x128xf32> -> vector<8x128xf32>
    %c1_313 = arith.constant 1 : index
    %c0_314 = arith.constant 0 : index
    %c0_315 = arith.constant 0 : index
    %899 = vector.load %arg1[%c1_313, %c0_314, %c0_315] : memref<2x1x128xf32, #tpu.memory_space<vmem>>, vector<1x1x128xf32>
    %900 = vector.shape_cast %899 : vector<1x1x128xf32> to vector<1x128xf32>
    %901 = vector.broadcast %900 : vector<1x128xf32> to vector<8x128xf32>
    %902 = arith.addf %898, %901 : vector<8x128xf32>
    %903 = vector.extract_strided_slice %902 {offsets = [0, 0], sizes = [8, 32], strides = [1, 1]} : vector<8x128xf32> to vector<8x32xf32>
    %904 = arith.negf %903 : vector<8x32xf32>
    %905 = math.exp %904 : vector<8x32xf32>
    %cst_316 = arith.constant 1.000000e+00 : f32
    %906 = vector.broadcast %cst_316 : f32 to vector<8x32xf32>
    %907 = arith.addf %906, %905 : vector<8x32xf32>
    %908 = arith.divf %906, %907 : vector<8x32xf32>
    %909 = vector.extract_strided_slice %902 {offsets = [0, 32], sizes = [8, 32], strides = [1, 1]} : vector<8x128xf32> to vector<8x32xf32>
    %910 = arith.negf %909 : vector<8x32xf32>
    %911 = math.exp %910 : vector<8x32xf32>
    %cst_317 = arith.constant 1.000000e+00 : f32
    %912 = vector.broadcast %cst_317 : f32 to vector<8x32xf32>
    %913 = arith.addf %912, %911 : vector<8x32xf32>
    %914 = arith.divf %912, %913 : vector<8x32xf32>
    %915 = vector.extract_strided_slice %902 {offsets = [0, 64], sizes = [8, 32], strides = [1, 1]} : vector<8x128xf32> to vector<8x32xf32>
    %916 = math.tanh %915 : vector<8x32xf32>
    %917 = vector.extract_strided_slice %902 {offsets = [0, 96], sizes = [8, 32], strides = [1, 1]} : vector<8x128xf32> to vector<8x32xf32>
    %918 = arith.negf %917 : vector<8x32xf32>
    %919 = math.exp %918 : vector<8x32xf32>
    %cst_318 = arith.constant 1.000000e+00 : f32
    %920 = vector.broadcast %cst_318 : f32 to vector<8x32xf32>
    %921 = arith.addf %920, %919 : vector<8x32xf32>
    %922 = arith.divf %920, %921 : vector<8x32xf32>
    %923 = arith.mulf %914, %839 : vector<8x32xf32>
    %924 = arith.mulf %908, %916 : vector<8x32xf32>
    %925 = arith.addf %923, %924 : vector<8x32xf32>
    %926 = math.tanh %925 : vector<8x32xf32>
    %927 = arith.mulf %922, %926 : vector<8x32xf32>
    %c7 = arith.constant 7 : index
    %c0_319 = arith.constant 0 : index
    %c0_320 = arith.constant 0 : index
    %928 = vector.load %arg2[%c7, %c0_319, %c0_320] : memref<13x32x128xf32, #tpu.memory_space<vmem>>, vector<1x32x128xf32>
    %929 = vector.shape_cast %928 : vector<1x32x128xf32> to vector<32x128xf32>
    %cst_321 = arith.constant dense<0.000000e+00> : vector<8x128xf32>
    %930 = tpu.matmul %927, %929, %cst_321 {dimension_numbers = #tpu.dot_dimension_numbers<[1], [0], [0], [1], [0, 0, 1, 1], [], []>} : vector<8x32xf32>, vector<32x128xf32>, vector<8x128xf32> -> vector<8x128xf32>
    %c7_322 = arith.constant 7 : index
    %c0_323 = arith.constant 0 : index
    %c0_324 = arith.constant 0 : index
    %931 = vector.load %arg3[%c7_322, %c0_323, %c0_324] : memref<13x1x128xf32, #tpu.memory_space<vmem>>, vector<1x1x128xf32>
    %932 = vector.shape_cast %931 : vector<1x1x128xf32> to vector<1x128xf32>
    %933 = vector.broadcast %932 : vector<1x128xf32> to vector<8x128xf32>
    %934 = arith.addf %930, %933 : vector<8x128xf32>
    %935 = vector.extract_strided_slice %934 {offsets = [0, 0], sizes = [8, 1], strides = [1, 1]} : vector<8x128xf32> to vector<8x1xf32>
    %936 = vector.extract_strided_slice %934 {offsets = [0, 1], sizes = [8, 1], strides = [1, 1]} : vector<8x128xf32> to vector<8x1xf32>
    %c2_325 = arith.constant 2 : index
    %c0_326 = arith.constant 0 : index
    %c0_327 = arith.constant 0 : index
    %937 = vector.load %arg7[%c2_325, %c0_326, %c0_327] : memref<8x8x1xf32, #tpu.memory_space<vmem>>, vector<1x8x1xf32>
    %938 = vector.shape_cast %937 : vector<1x8x1xf32> to vector<8x1xf32>
    %939 = math.exp %936 : vector<8x1xf32>
    %940 = arith.mulf %939, %938 : vector<8x1xf32>
    %941 = arith.addf %935, %940 : vector<8x1xf32>
    %cst_328 = arith.constant -5.000000e-01 : f32
    %942 = vector.broadcast %cst_328 : f32 to vector<8x1xf32>
    %943 = arith.mulf %942, %938 : vector<8x1xf32>
    %944 = arith.mulf %943, %938 : vector<8x1xf32>
    %945 = arith.subf %944, %936 : vector<8x1xf32>
    %cst_329 = arith.constant 0.918938517 : f32
    %946 = vector.broadcast %cst_329 : f32 to vector<8x1xf32>
    %947 = arith.subf %945, %946 : vector<8x1xf32>
    %948 = tpu.concatenate %685, %894 in 1 : vector<8x32xf32>, vector<8x32xf32> -> vector<8x64xf32>
    %c0_330 = arith.constant 0 : index
    %c0_331 = arith.constant 0 : index
    %c0_332 = arith.constant 0 : index
    %949 = vector.load %arg0[%c0_330, %c0_331, %c0_332] : memref<2x64x128xf32, #tpu.memory_space<vmem>>, vector<1x64x128xf32>
    %950 = vector.shape_cast %949 : vector<1x64x128xf32> to vector<64x128xf32>
    %cst_333 = arith.constant dense<0.000000e+00> : vector<8x128xf32>
    %951 = tpu.matmul %948, %950, %cst_333 {dimension_numbers = #tpu.dot_dimension_numbers<[1], [0], [0], [1], [0, 0, 1, 1], [], []>} : vector<8x64xf32>, vector<64x128xf32>, vector<8x128xf32> -> vector<8x128xf32>
    %c0_334 = arith.constant 0 : index
    %c0_335 = arith.constant 0 : index
    %c0_336 = arith.constant 0 : index
    %952 = vector.load %arg1[%c0_334, %c0_335, %c0_336] : memref<2x1x128xf32, #tpu.memory_space<vmem>>, vector<1x1x128xf32>
    %953 = vector.shape_cast %952 : vector<1x1x128xf32> to vector<1x128xf32>
    %954 = vector.broadcast %953 : vector<1x128xf32> to vector<8x128xf32>
    %955 = arith.addf %951, %954 : vector<8x128xf32>
    %956 = vector.extract_strided_slice %955 {offsets = [0, 0], sizes = [8, 32], strides = [1, 1]} : vector<8x128xf32> to vector<8x32xf32>
    %957 = arith.negf %956 : vector<8x32xf32>
    %958 = math.exp %957 : vector<8x32xf32>
    %cst_337 = arith.constant 1.000000e+00 : f32
    %959 = vector.broadcast %cst_337 : f32 to vector<8x32xf32>
    %960 = arith.addf %959, %958 : vector<8x32xf32>
    %961 = arith.divf %959, %960 : vector<8x32xf32>
    %962 = vector.extract_strided_slice %955 {offsets = [0, 32], sizes = [8, 32], strides = [1, 1]} : vector<8x128xf32> to vector<8x32xf32>
    %963 = arith.negf %962 : vector<8x32xf32>
    %964 = math.exp %963 : vector<8x32xf32>
    %cst_338 = arith.constant 1.000000e+00 : f32
    %965 = vector.broadcast %cst_338 : f32 to vector<8x32xf32>
    %966 = arith.addf %965, %964 : vector<8x32xf32>
    %967 = arith.divf %965, %966 : vector<8x32xf32>
    %968 = vector.extract_strided_slice %955 {offsets = [0, 64], sizes = [8, 32], strides = [1, 1]} : vector<8x128xf32> to vector<8x32xf32>
    %969 = math.tanh %968 : vector<8x32xf32>
    %970 = vector.extract_strided_slice %955 {offsets = [0, 96], sizes = [8, 32], strides = [1, 1]} : vector<8x128xf32> to vector<8x32xf32>
    %971 = arith.negf %970 : vector<8x32xf32>
    %972 = math.exp %971 : vector<8x32xf32>
    %cst_339 = arith.constant 1.000000e+00 : f32
    %973 = vector.broadcast %cst_339 : f32 to vector<8x32xf32>
    %974 = arith.addf %973, %972 : vector<8x32xf32>
    %975 = arith.divf %973, %974 : vector<8x32xf32>
    %976 = arith.mulf %967, %892 : vector<8x32xf32>
    %977 = arith.mulf %961, %969 : vector<8x32xf32>
    %978 = arith.addf %976, %977 : vector<8x32xf32>
    %979 = math.tanh %978 : vector<8x32xf32>
    %980 = arith.mulf %975, %979 : vector<8x32xf32>
    %981 = tpu.concatenate %980, %927 in 1 : vector<8x32xf32>, vector<8x32xf32> -> vector<8x64xf32>
    %c1_340 = arith.constant 1 : index
    %c0_341 = arith.constant 0 : index
    %c0_342 = arith.constant 0 : index
    %982 = vector.load %arg0[%c1_340, %c0_341, %c0_342] : memref<2x64x128xf32, #tpu.memory_space<vmem>>, vector<1x64x128xf32>
    %983 = vector.shape_cast %982 : vector<1x64x128xf32> to vector<64x128xf32>
    %cst_343 = arith.constant dense<0.000000e+00> : vector<8x128xf32>
    %984 = tpu.matmul %981, %983, %cst_343 {dimension_numbers = #tpu.dot_dimension_numbers<[1], [0], [0], [1], [0, 0, 1, 1], [], []>} : vector<8x64xf32>, vector<64x128xf32>, vector<8x128xf32> -> vector<8x128xf32>
    %c1_344 = arith.constant 1 : index
    %c0_345 = arith.constant 0 : index
    %c0_346 = arith.constant 0 : index
    %985 = vector.load %arg1[%c1_344, %c0_345, %c0_346] : memref<2x1x128xf32, #tpu.memory_space<vmem>>, vector<1x1x128xf32>
    %986 = vector.shape_cast %985 : vector<1x1x128xf32> to vector<1x128xf32>
    %987 = vector.broadcast %986 : vector<1x128xf32> to vector<8x128xf32>
    %988 = arith.addf %984, %987 : vector<8x128xf32>
    %989 = vector.extract_strided_slice %988 {offsets = [0, 0], sizes = [8, 32], strides = [1, 1]} : vector<8x128xf32> to vector<8x32xf32>
    %990 = arith.negf %989 : vector<8x32xf32>
    %991 = math.exp %990 : vector<8x32xf32>
    %cst_347 = arith.constant 1.000000e+00 : f32
    %992 = vector.broadcast %cst_347 : f32 to vector<8x32xf32>
    %993 = arith.addf %992, %991 : vector<8x32xf32>
    %994 = arith.divf %992, %993 : vector<8x32xf32>
    %995 = vector.extract_strided_slice %988 {offsets = [0, 32], sizes = [8, 32], strides = [1, 1]} : vector<8x128xf32> to vector<8x32xf32>
    %996 = arith.negf %995 : vector<8x32xf32>
    %997 = math.exp %996 : vector<8x32xf32>
    %cst_348 = arith.constant 1.000000e+00 : f32
    %998 = vector.broadcast %cst_348 : f32 to vector<8x32xf32>
    %999 = arith.addf %998, %997 : vector<8x32xf32>
    %1000 = arith.divf %998, %999 : vector<8x32xf32>
    %1001 = vector.extract_strided_slice %988 {offsets = [0, 64], sizes = [8, 32], strides = [1, 1]} : vector<8x128xf32> to vector<8x32xf32>
    %1002 = math.tanh %1001 : vector<8x32xf32>
    %1003 = vector.extract_strided_slice %988 {offsets = [0, 96], sizes = [8, 32], strides = [1, 1]} : vector<8x128xf32> to vector<8x32xf32>
    %1004 = arith.negf %1003 : vector<8x32xf32>
    %1005 = math.exp %1004 : vector<8x32xf32>
    %cst_349 = arith.constant 1.000000e+00 : f32
    %1006 = vector.broadcast %cst_349 : f32 to vector<8x32xf32>
    %1007 = arith.addf %1006, %1005 : vector<8x32xf32>
    %1008 = arith.divf %1006, %1007 : vector<8x32xf32>
    %1009 = arith.mulf %1000, %925 : vector<8x32xf32>
    %1010 = arith.mulf %994, %1002 : vector<8x32xf32>
    %1011 = arith.addf %1009, %1010 : vector<8x32xf32>
    %1012 = math.tanh %1011 : vector<8x32xf32>
    %1013 = arith.mulf %1008, %1012 : vector<8x32xf32>
    %c8 = arith.constant 8 : index
    %c0_350 = arith.constant 0 : index
    %c0_351 = arith.constant 0 : index
    %1014 = vector.load %arg2[%c8, %c0_350, %c0_351] : memref<13x32x128xf32, #tpu.memory_space<vmem>>, vector<1x32x128xf32>
    %1015 = vector.shape_cast %1014 : vector<1x32x128xf32> to vector<32x128xf32>
    %cst_352 = arith.constant dense<0.000000e+00> : vector<8x128xf32>
    %1016 = tpu.matmul %1013, %1015, %cst_352 {dimension_numbers = #tpu.dot_dimension_numbers<[1], [0], [0], [1], [0, 0, 1, 1], [], []>} : vector<8x32xf32>, vector<32x128xf32>, vector<8x128xf32> -> vector<8x128xf32>
    %c8_353 = arith.constant 8 : index
    %c0_354 = arith.constant 0 : index
    %c0_355 = arith.constant 0 : index
    %1017 = vector.load %arg3[%c8_353, %c0_354, %c0_355] : memref<13x1x128xf32, #tpu.memory_space<vmem>>, vector<1x1x128xf32>
    %1018 = vector.shape_cast %1017 : vector<1x1x128xf32> to vector<1x128xf32>
    %1019 = vector.broadcast %1018 : vector<1x128xf32> to vector<8x128xf32>
    %1020 = arith.addf %1016, %1019 : vector<8x128xf32>
    %1021 = vector.extract_strided_slice %1020 {offsets = [0, 0], sizes = [8, 1], strides = [1, 1]} : vector<8x128xf32> to vector<8x1xf32>
    %1022 = vector.extract_strided_slice %1020 {offsets = [0, 1], sizes = [8, 1], strides = [1, 1]} : vector<8x128xf32> to vector<8x1xf32>
    %c3_356 = arith.constant 3 : index
    %c0_357 = arith.constant 0 : index
    %c0_358 = arith.constant 0 : index
    %1023 = vector.load %arg7[%c3_356, %c0_357, %c0_358] : memref<8x8x1xf32, #tpu.memory_space<vmem>>, vector<1x8x1xf32>
    %1024 = vector.shape_cast %1023 : vector<1x8x1xf32> to vector<8x1xf32>
    %1025 = math.exp %1022 : vector<8x1xf32>
    %1026 = arith.mulf %1025, %1024 : vector<8x1xf32>
    %1027 = arith.addf %1021, %1026 : vector<8x1xf32>
    %cst_359 = arith.constant -5.000000e-01 : f32
    %1028 = vector.broadcast %cst_359 : f32 to vector<8x1xf32>
    %1029 = arith.mulf %1028, %1024 : vector<8x1xf32>
    %1030 = arith.mulf %1029, %1024 : vector<8x1xf32>
    %1031 = arith.subf %1030, %1022 : vector<8x1xf32>
    %cst_360 = arith.constant 0.918938517 : f32
    %1032 = vector.broadcast %cst_360 : f32 to vector<8x1xf32>
    %1033 = arith.subf %1031, %1032 : vector<8x1xf32>
    %1034 = tpu.concatenate %685, %980 in 1 : vector<8x32xf32>, vector<8x32xf32> -> vector<8x64xf32>
    %c0_361 = arith.constant 0 : index
    %c0_362 = arith.constant 0 : index
    %c0_363 = arith.constant 0 : index
    %1035 = vector.load %arg0[%c0_361, %c0_362, %c0_363] : memref<2x64x128xf32, #tpu.memory_space<vmem>>, vector<1x64x128xf32>
    %1036 = vector.shape_cast %1035 : vector<1x64x128xf32> to vector<64x128xf32>
    %cst_364 = arith.constant dense<0.000000e+00> : vector<8x128xf32>
    %1037 = tpu.matmul %1034, %1036, %cst_364 {dimension_numbers = #tpu.dot_dimension_numbers<[1], [0], [0], [1], [0, 0, 1, 1], [], []>} : vector<8x64xf32>, vector<64x128xf32>, vector<8x128xf32> -> vector<8x128xf32>
    %c0_365 = arith.constant 0 : index
    %c0_366 = arith.constant 0 : index
    %c0_367 = arith.constant 0 : index
    %1038 = vector.load %arg1[%c0_365, %c0_366, %c0_367] : memref<2x1x128xf32, #tpu.memory_space<vmem>>, vector<1x1x128xf32>
    %1039 = vector.shape_cast %1038 : vector<1x1x128xf32> to vector<1x128xf32>
    %1040 = vector.broadcast %1039 : vector<1x128xf32> to vector<8x128xf32>
    %1041 = arith.addf %1037, %1040 : vector<8x128xf32>
    %1042 = vector.extract_strided_slice %1041 {offsets = [0, 0], sizes = [8, 32], strides = [1, 1]} : vector<8x128xf32> to vector<8x32xf32>
    %1043 = arith.negf %1042 : vector<8x32xf32>
    %1044 = math.exp %1043 : vector<8x32xf32>
    %cst_368 = arith.constant 1.000000e+00 : f32
    %1045 = vector.broadcast %cst_368 : f32 to vector<8x32xf32>
    %1046 = arith.addf %1045, %1044 : vector<8x32xf32>
    %1047 = arith.divf %1045, %1046 : vector<8x32xf32>
    %1048 = vector.extract_strided_slice %1041 {offsets = [0, 32], sizes = [8, 32], strides = [1, 1]} : vector<8x128xf32> to vector<8x32xf32>
    %1049 = arith.negf %1048 : vector<8x32xf32>
    %1050 = math.exp %1049 : vector<8x32xf32>
    %cst_369 = arith.constant 1.000000e+00 : f32
    %1051 = vector.broadcast %cst_369 : f32 to vector<8x32xf32>
    %1052 = arith.addf %1051, %1050 : vector<8x32xf32>
    %1053 = arith.divf %1051, %1052 : vector<8x32xf32>
    %1054 = vector.extract_strided_slice %1041 {offsets = [0, 64], sizes = [8, 32], strides = [1, 1]} : vector<8x128xf32> to vector<8x32xf32>
    %1055 = math.tanh %1054 : vector<8x32xf32>
    %1056 = vector.extract_strided_slice %1041 {offsets = [0, 96], sizes = [8, 32], strides = [1, 1]} : vector<8x128xf32> to vector<8x32xf32>
    %1057 = arith.negf %1056 : vector<8x32xf32>
    %1058 = math.exp %1057 : vector<8x32xf32>
    %cst_370 = arith.constant 1.000000e+00 : f32
    %1059 = vector.broadcast %cst_370 : f32 to vector<8x32xf32>
    %1060 = arith.addf %1059, %1058 : vector<8x32xf32>
    %1061 = arith.divf %1059, %1060 : vector<8x32xf32>
    %1062 = arith.mulf %1053, %978 : vector<8x32xf32>
    %1063 = arith.mulf %1047, %1055 : vector<8x32xf32>
    %1064 = arith.addf %1062, %1063 : vector<8x32xf32>
    %1065 = math.tanh %1064 : vector<8x32xf32>
    %1066 = arith.mulf %1061, %1065 : vector<8x32xf32>
    %1067 = tpu.concatenate %1066, %1013 in 1 : vector<8x32xf32>, vector<8x32xf32> -> vector<8x64xf32>
    %c1_371 = arith.constant 1 : index
    %c0_372 = arith.constant 0 : index
    %c0_373 = arith.constant 0 : index
    %1068 = vector.load %arg0[%c1_371, %c0_372, %c0_373] : memref<2x64x128xf32, #tpu.memory_space<vmem>>, vector<1x64x128xf32>
    %1069 = vector.shape_cast %1068 : vector<1x64x128xf32> to vector<64x128xf32>
    %cst_374 = arith.constant dense<0.000000e+00> : vector<8x128xf32>
    %1070 = tpu.matmul %1067, %1069, %cst_374 {dimension_numbers = #tpu.dot_dimension_numbers<[1], [0], [0], [1], [0, 0, 1, 1], [], []>} : vector<8x64xf32>, vector<64x128xf32>, vector<8x128xf32> -> vector<8x128xf32>
    %c1_375 = arith.constant 1 : index
    %c0_376 = arith.constant 0 : index
    %c0_377 = arith.constant 0 : index
    %1071 = vector.load %arg1[%c1_375, %c0_376, %c0_377] : memref<2x1x128xf32, #tpu.memory_space<vmem>>, vector<1x1x128xf32>
    %1072 = vector.shape_cast %1071 : vector<1x1x128xf32> to vector<1x128xf32>
    %1073 = vector.broadcast %1072 : vector<1x128xf32> to vector<8x128xf32>
    %1074 = arith.addf %1070, %1073 : vector<8x128xf32>
    %1075 = vector.extract_strided_slice %1074 {offsets = [0, 0], sizes = [8, 32], strides = [1, 1]} : vector<8x128xf32> to vector<8x32xf32>
    %1076 = arith.negf %1075 : vector<8x32xf32>
    %1077 = math.exp %1076 : vector<8x32xf32>
    %cst_378 = arith.constant 1.000000e+00 : f32
    %1078 = vector.broadcast %cst_378 : f32 to vector<8x32xf32>
    %1079 = arith.addf %1078, %1077 : vector<8x32xf32>
    %1080 = arith.divf %1078, %1079 : vector<8x32xf32>
    %1081 = vector.extract_strided_slice %1074 {offsets = [0, 32], sizes = [8, 32], strides = [1, 1]} : vector<8x128xf32> to vector<8x32xf32>
    %1082 = arith.negf %1081 : vector<8x32xf32>
    %1083 = math.exp %1082 : vector<8x32xf32>
    %cst_379 = arith.constant 1.000000e+00 : f32
    %1084 = vector.broadcast %cst_379 : f32 to vector<8x32xf32>
    %1085 = arith.addf %1084, %1083 : vector<8x32xf32>
    %1086 = arith.divf %1084, %1085 : vector<8x32xf32>
    %1087 = vector.extract_strided_slice %1074 {offsets = [0, 64], sizes = [8, 32], strides = [1, 1]} : vector<8x128xf32> to vector<8x32xf32>
    %1088 = math.tanh %1087 : vector<8x32xf32>
    %1089 = vector.extract_strided_slice %1074 {offsets = [0, 96], sizes = [8, 32], strides = [1, 1]} : vector<8x128xf32> to vector<8x32xf32>
    %1090 = arith.negf %1089 : vector<8x32xf32>
    %1091 = math.exp %1090 : vector<8x32xf32>
    %cst_380 = arith.constant 1.000000e+00 : f32
    %1092 = vector.broadcast %cst_380 : f32 to vector<8x32xf32>
    %1093 = arith.addf %1092, %1091 : vector<8x32xf32>
    %1094 = arith.divf %1092, %1093 : vector<8x32xf32>
    %1095 = arith.mulf %1086, %1011 : vector<8x32xf32>
    %1096 = arith.mulf %1080, %1088 : vector<8x32xf32>
    %1097 = arith.addf %1095, %1096 : vector<8x32xf32>
    %1098 = math.tanh %1097 : vector<8x32xf32>
    %1099 = arith.mulf %1094, %1098 : vector<8x32xf32>
    %c9 = arith.constant 9 : index
    %c0_381 = arith.constant 0 : index
    %c0_382 = arith.constant 0 : index
    %1100 = vector.load %arg2[%c9, %c0_381, %c0_382] : memref<13x32x128xf32, #tpu.memory_space<vmem>>, vector<1x32x128xf32>
    %1101 = vector.shape_cast %1100 : vector<1x32x128xf32> to vector<32x128xf32>
    %cst_383 = arith.constant dense<0.000000e+00> : vector<8x128xf32>
    %1102 = tpu.matmul %1099, %1101, %cst_383 {dimension_numbers = #tpu.dot_dimension_numbers<[1], [0], [0], [1], [0, 0, 1, 1], [], []>} : vector<8x32xf32>, vector<32x128xf32>, vector<8x128xf32> -> vector<8x128xf32>
    %c9_384 = arith.constant 9 : index
    %c0_385 = arith.constant 0 : index
    %c0_386 = arith.constant 0 : index
    %1103 = vector.load %arg3[%c9_384, %c0_385, %c0_386] : memref<13x1x128xf32, #tpu.memory_space<vmem>>, vector<1x1x128xf32>
    %1104 = vector.shape_cast %1103 : vector<1x1x128xf32> to vector<1x128xf32>
    %1105 = vector.broadcast %1104 : vector<1x128xf32> to vector<8x128xf32>
    %1106 = arith.addf %1102, %1105 : vector<8x128xf32>
    %1107 = vector.extract_strided_slice %1106 {offsets = [0, 0], sizes = [8, 1], strides = [1, 1]} : vector<8x128xf32> to vector<8x1xf32>
    %1108 = vector.extract_strided_slice %1106 {offsets = [0, 1], sizes = [8, 1], strides = [1, 1]} : vector<8x128xf32> to vector<8x1xf32>
    %c4_387 = arith.constant 4 : index
    %c0_388 = arith.constant 0 : index
    %c0_389 = arith.constant 0 : index
    %1109 = vector.load %arg7[%c4_387, %c0_388, %c0_389] : memref<8x8x1xf32, #tpu.memory_space<vmem>>, vector<1x8x1xf32>
    %1110 = vector.shape_cast %1109 : vector<1x8x1xf32> to vector<8x1xf32>
    %1111 = math.exp %1108 : vector<8x1xf32>
    %1112 = arith.mulf %1111, %1110 : vector<8x1xf32>
    %1113 = arith.addf %1107, %1112 : vector<8x1xf32>
    %cst_390 = arith.constant -5.000000e-01 : f32
    %1114 = vector.broadcast %cst_390 : f32 to vector<8x1xf32>
    %1115 = arith.mulf %1114, %1110 : vector<8x1xf32>
    %1116 = arith.mulf %1115, %1110 : vector<8x1xf32>
    %1117 = arith.subf %1116, %1108 : vector<8x1xf32>
    %cst_391 = arith.constant 0.918938517 : f32
    %1118 = vector.broadcast %cst_391 : f32 to vector<8x1xf32>
    %1119 = arith.subf %1117, %1118 : vector<8x1xf32>
    %1120 = tpu.concatenate %685, %1066 in 1 : vector<8x32xf32>, vector<8x32xf32> -> vector<8x64xf32>
    %c0_392 = arith.constant 0 : index
    %c0_393 = arith.constant 0 : index
    %c0_394 = arith.constant 0 : index
    %1121 = vector.load %arg0[%c0_392, %c0_393, %c0_394] : memref<2x64x128xf32, #tpu.memory_space<vmem>>, vector<1x64x128xf32>
    %1122 = vector.shape_cast %1121 : vector<1x64x128xf32> to vector<64x128xf32>
    %cst_395 = arith.constant dense<0.000000e+00> : vector<8x128xf32>
    %1123 = tpu.matmul %1120, %1122, %cst_395 {dimension_numbers = #tpu.dot_dimension_numbers<[1], [0], [0], [1], [0, 0, 1, 1], [], []>} : vector<8x64xf32>, vector<64x128xf32>, vector<8x128xf32> -> vector<8x128xf32>
    %c0_396 = arith.constant 0 : index
    %c0_397 = arith.constant 0 : index
    %c0_398 = arith.constant 0 : index
    %1124 = vector.load %arg1[%c0_396, %c0_397, %c0_398] : memref<2x1x128xf32, #tpu.memory_space<vmem>>, vector<1x1x128xf32>
    %1125 = vector.shape_cast %1124 : vector<1x1x128xf32> to vector<1x128xf32>
    %1126 = vector.broadcast %1125 : vector<1x128xf32> to vector<8x128xf32>
    %1127 = arith.addf %1123, %1126 : vector<8x128xf32>
    %1128 = vector.extract_strided_slice %1127 {offsets = [0, 0], sizes = [8, 32], strides = [1, 1]} : vector<8x128xf32> to vector<8x32xf32>
    %1129 = arith.negf %1128 : vector<8x32xf32>
    %1130 = math.exp %1129 : vector<8x32xf32>
    %cst_399 = arith.constant 1.000000e+00 : f32
    %1131 = vector.broadcast %cst_399 : f32 to vector<8x32xf32>
    %1132 = arith.addf %1131, %1130 : vector<8x32xf32>
    %1133 = arith.divf %1131, %1132 : vector<8x32xf32>
    %1134 = vector.extract_strided_slice %1127 {offsets = [0, 32], sizes = [8, 32], strides = [1, 1]} : vector<8x128xf32> to vector<8x32xf32>
    %1135 = arith.negf %1134 : vector<8x32xf32>
    %1136 = math.exp %1135 : vector<8x32xf32>
    %cst_400 = arith.constant 1.000000e+00 : f32
    %1137 = vector.broadcast %cst_400 : f32 to vector<8x32xf32>
    %1138 = arith.addf %1137, %1136 : vector<8x32xf32>
    %1139 = arith.divf %1137, %1138 : vector<8x32xf32>
    %1140 = vector.extract_strided_slice %1127 {offsets = [0, 64], sizes = [8, 32], strides = [1, 1]} : vector<8x128xf32> to vector<8x32xf32>
    %1141 = math.tanh %1140 : vector<8x32xf32>
    %1142 = vector.extract_strided_slice %1127 {offsets = [0, 96], sizes = [8, 32], strides = [1, 1]} : vector<8x128xf32> to vector<8x32xf32>
    %1143 = arith.negf %1142 : vector<8x32xf32>
    %1144 = math.exp %1143 : vector<8x32xf32>
    %cst_401 = arith.constant 1.000000e+00 : f32
    %1145 = vector.broadcast %cst_401 : f32 to vector<8x32xf32>
    %1146 = arith.addf %1145, %1144 : vector<8x32xf32>
    %1147 = arith.divf %1145, %1146 : vector<8x32xf32>
    %1148 = arith.mulf %1139, %1064 : vector<8x32xf32>
    %1149 = arith.mulf %1133, %1141 : vector<8x32xf32>
    %1150 = arith.addf %1148, %1149 : vector<8x32xf32>
    %1151 = math.tanh %1150 : vector<8x32xf32>
    %1152 = arith.mulf %1147, %1151 : vector<8x32xf32>
    %1153 = tpu.concatenate %1152, %1099 in 1 : vector<8x32xf32>, vector<8x32xf32> -> vector<8x64xf32>
    %c1_402 = arith.constant 1 : index
    %c0_403 = arith.constant 0 : index
    %c0_404 = arith.constant 0 : index
    %1154 = vector.load %arg0[%c1_402, %c0_403, %c0_404] : memref<2x64x128xf32, #tpu.memory_space<vmem>>, vector<1x64x128xf32>
    %1155 = vector.shape_cast %1154 : vector<1x64x128xf32> to vector<64x128xf32>
    %cst_405 = arith.constant dense<0.000000e+00> : vector<8x128xf32>
    %1156 = tpu.matmul %1153, %1155, %cst_405 {dimension_numbers = #tpu.dot_dimension_numbers<[1], [0], [0], [1], [0, 0, 1, 1], [], []>} : vector<8x64xf32>, vector<64x128xf32>, vector<8x128xf32> -> vector<8x128xf32>
    %c1_406 = arith.constant 1 : index
    %c0_407 = arith.constant 0 : index
    %c0_408 = arith.constant 0 : index
    %1157 = vector.load %arg1[%c1_406, %c0_407, %c0_408] : memref<2x1x128xf32, #tpu.memory_space<vmem>>, vector<1x1x128xf32>
    %1158 = vector.shape_cast %1157 : vector<1x1x128xf32> to vector<1x128xf32>
    %1159 = vector.broadcast %1158 : vector<1x128xf32> to vector<8x128xf32>
    %1160 = arith.addf %1156, %1159 : vector<8x128xf32>
    %1161 = vector.extract_strided_slice %1160 {offsets = [0, 0], sizes = [8, 32], strides = [1, 1]} : vector<8x128xf32> to vector<8x32xf32>
    %1162 = arith.negf %1161 : vector<8x32xf32>
    %1163 = math.exp %1162 : vector<8x32xf32>
    %cst_409 = arith.constant 1.000000e+00 : f32
    %1164 = vector.broadcast %cst_409 : f32 to vector<8x32xf32>
    %1165 = arith.addf %1164, %1163 : vector<8x32xf32>
    %1166 = arith.divf %1164, %1165 : vector<8x32xf32>
    %1167 = vector.extract_strided_slice %1160 {offsets = [0, 32], sizes = [8, 32], strides = [1, 1]} : vector<8x128xf32> to vector<8x32xf32>
    %1168 = arith.negf %1167 : vector<8x32xf32>
    %1169 = math.exp %1168 : vector<8x32xf32>
    %cst_410 = arith.constant 1.000000e+00 : f32
    %1170 = vector.broadcast %cst_410 : f32 to vector<8x32xf32>
    %1171 = arith.addf %1170, %1169 : vector<8x32xf32>
    %1172 = arith.divf %1170, %1171 : vector<8x32xf32>
    %1173 = vector.extract_strided_slice %1160 {offsets = [0, 64], sizes = [8, 32], strides = [1, 1]} : vector<8x128xf32> to vector<8x32xf32>
    %1174 = math.tanh %1173 : vector<8x32xf32>
    %1175 = vector.extract_strided_slice %1160 {offsets = [0, 96], sizes = [8, 32], strides = [1, 1]} : vector<8x128xf32> to vector<8x32xf32>
    %1176 = arith.negf %1175 : vector<8x32xf32>
    %1177 = math.exp %1176 : vector<8x32xf32>
    %cst_411 = arith.constant 1.000000e+00 : f32
    %1178 = vector.broadcast %cst_411 : f32 to vector<8x32xf32>
    %1179 = arith.addf %1178, %1177 : vector<8x32xf32>
    %1180 = arith.divf %1178, %1179 : vector<8x32xf32>
    %1181 = arith.mulf %1172, %1097 : vector<8x32xf32>
    %1182 = arith.mulf %1166, %1174 : vector<8x32xf32>
    %1183 = arith.addf %1181, %1182 : vector<8x32xf32>
    %1184 = math.tanh %1183 : vector<8x32xf32>
    %1185 = arith.mulf %1180, %1184 : vector<8x32xf32>
    %c10 = arith.constant 10 : index
    %c0_412 = arith.constant 0 : index
    %c0_413 = arith.constant 0 : index
    %1186 = vector.load %arg2[%c10, %c0_412, %c0_413] : memref<13x32x128xf32, #tpu.memory_space<vmem>>, vector<1x32x128xf32>
    %1187 = vector.shape_cast %1186 : vector<1x32x128xf32> to vector<32x128xf32>
    %cst_414 = arith.constant dense<0.000000e+00> : vector<8x128xf32>
    %1188 = tpu.matmul %1185, %1187, %cst_414 {dimension_numbers = #tpu.dot_dimension_numbers<[1], [0], [0], [1], [0, 0, 1, 1], [], []>} : vector<8x32xf32>, vector<32x128xf32>, vector<8x128xf32> -> vector<8x128xf32>
    %c10_415 = arith.constant 10 : index
    %c0_416 = arith.constant 0 : index
    %c0_417 = arith.constant 0 : index
    %1189 = vector.load %arg3[%c10_415, %c0_416, %c0_417] : memref<13x1x128xf32, #tpu.memory_space<vmem>>, vector<1x1x128xf32>
    %1190 = vector.shape_cast %1189 : vector<1x1x128xf32> to vector<1x128xf32>
    %1191 = vector.broadcast %1190 : vector<1x128xf32> to vector<8x128xf32>
    %1192 = arith.addf %1188, %1191 : vector<8x128xf32>
    %1193 = vector.extract_strided_slice %1192 {offsets = [0, 0], sizes = [8, 1], strides = [1, 1]} : vector<8x128xf32> to vector<8x1xf32>
    %1194 = vector.extract_strided_slice %1192 {offsets = [0, 1], sizes = [8, 1], strides = [1, 1]} : vector<8x128xf32> to vector<8x1xf32>
    %c5_418 = arith.constant 5 : index
    %c0_419 = arith.constant 0 : index
    %c0_420 = arith.constant 0 : index
    %1195 = vector.load %arg7[%c5_418, %c0_419, %c0_420] : memref<8x8x1xf32, #tpu.memory_space<vmem>>, vector<1x8x1xf32>
    %1196 = vector.shape_cast %1195 : vector<1x8x1xf32> to vector<8x1xf32>
    %1197 = math.exp %1194 : vector<8x1xf32>
    %1198 = arith.mulf %1197, %1196 : vector<8x1xf32>
    %1199 = arith.addf %1193, %1198 : vector<8x1xf32>
    %cst_421 = arith.constant -5.000000e-01 : f32
    %1200 = vector.broadcast %cst_421 : f32 to vector<8x1xf32>
    %1201 = arith.mulf %1200, %1196 : vector<8x1xf32>
    %1202 = arith.mulf %1201, %1196 : vector<8x1xf32>
    %1203 = arith.subf %1202, %1194 : vector<8x1xf32>
    %cst_422 = arith.constant 0.918938517 : f32
    %1204 = vector.broadcast %cst_422 : f32 to vector<8x1xf32>
    %1205 = arith.subf %1203, %1204 : vector<8x1xf32>
    %1206 = tpu.concatenate %685, %1152 in 1 : vector<8x32xf32>, vector<8x32xf32> -> vector<8x64xf32>
    %c0_423 = arith.constant 0 : index
    %c0_424 = arith.constant 0 : index
    %c0_425 = arith.constant 0 : index
    %1207 = vector.load %arg0[%c0_423, %c0_424, %c0_425] : memref<2x64x128xf32, #tpu.memory_space<vmem>>, vector<1x64x128xf32>
    %1208 = vector.shape_cast %1207 : vector<1x64x128xf32> to vector<64x128xf32>
    %cst_426 = arith.constant dense<0.000000e+00> : vector<8x128xf32>
    %1209 = tpu.matmul %1206, %1208, %cst_426 {dimension_numbers = #tpu.dot_dimension_numbers<[1], [0], [0], [1], [0, 0, 1, 1], [], []>} : vector<8x64xf32>, vector<64x128xf32>, vector<8x128xf32> -> vector<8x128xf32>
    %c0_427 = arith.constant 0 : index
    %c0_428 = arith.constant 0 : index
    %c0_429 = arith.constant 0 : index
    %1210 = vector.load %arg1[%c0_427, %c0_428, %c0_429] : memref<2x1x128xf32, #tpu.memory_space<vmem>>, vector<1x1x128xf32>
    %1211 = vector.shape_cast %1210 : vector<1x1x128xf32> to vector<1x128xf32>
    %1212 = vector.broadcast %1211 : vector<1x128xf32> to vector<8x128xf32>
    %1213 = arith.addf %1209, %1212 : vector<8x128xf32>
    %1214 = vector.extract_strided_slice %1213 {offsets = [0, 0], sizes = [8, 32], strides = [1, 1]} : vector<8x128xf32> to vector<8x32xf32>
    %1215 = arith.negf %1214 : vector<8x32xf32>
    %1216 = math.exp %1215 : vector<8x32xf32>
    %cst_430 = arith.constant 1.000000e+00 : f32
    %1217 = vector.broadcast %cst_430 : f32 to vector<8x32xf32>
    %1218 = arith.addf %1217, %1216 : vector<8x32xf32>
    %1219 = arith.divf %1217, %1218 : vector<8x32xf32>
    %1220 = vector.extract_strided_slice %1213 {offsets = [0, 32], sizes = [8, 32], strides = [1, 1]} : vector<8x128xf32> to vector<8x32xf32>
    %1221 = arith.negf %1220 : vector<8x32xf32>
    %1222 = math.exp %1221 : vector<8x32xf32>
    %cst_431 = arith.constant 1.000000e+00 : f32
    %1223 = vector.broadcast %cst_431 : f32 to vector<8x32xf32>
    %1224 = arith.addf %1223, %1222 : vector<8x32xf32>
    %1225 = arith.divf %1223, %1224 : vector<8x32xf32>
    %1226 = vector.extract_strided_slice %1213 {offsets = [0, 64], sizes = [8, 32], strides = [1, 1]} : vector<8x128xf32> to vector<8x32xf32>
    %1227 = math.tanh %1226 : vector<8x32xf32>
    %1228 = vector.extract_strided_slice %1213 {offsets = [0, 96], sizes = [8, 32], strides = [1, 1]} : vector<8x128xf32> to vector<8x32xf32>
    %1229 = arith.negf %1228 : vector<8x32xf32>
    %1230 = math.exp %1229 : vector<8x32xf32>
    %cst_432 = arith.constant 1.000000e+00 : f32
    %1231 = vector.broadcast %cst_432 : f32 to vector<8x32xf32>
    %1232 = arith.addf %1231, %1230 : vector<8x32xf32>
    %1233 = arith.divf %1231, %1232 : vector<8x32xf32>
    %1234 = arith.mulf %1225, %1150 : vector<8x32xf32>
    %1235 = arith.mulf %1219, %1227 : vector<8x32xf32>
    %1236 = arith.addf %1234, %1235 : vector<8x32xf32>
    %1237 = math.tanh %1236 : vector<8x32xf32>
    %1238 = arith.mulf %1233, %1237 : vector<8x32xf32>
    %1239 = tpu.concatenate %1238, %1185 in 1 : vector<8x32xf32>, vector<8x32xf32> -> vector<8x64xf32>
    %c1_433 = arith.constant 1 : index
    %c0_434 = arith.constant 0 : index
    %c0_435 = arith.constant 0 : index
    %1240 = vector.load %arg0[%c1_433, %c0_434, %c0_435] : memref<2x64x128xf32, #tpu.memory_space<vmem>>, vector<1x64x128xf32>
    %1241 = vector.shape_cast %1240 : vector<1x64x128xf32> to vector<64x128xf32>
    %cst_436 = arith.constant dense<0.000000e+00> : vector<8x128xf32>
    %1242 = tpu.matmul %1239, %1241, %cst_436 {dimension_numbers = #tpu.dot_dimension_numbers<[1], [0], [0], [1], [0, 0, 1, 1], [], []>} : vector<8x64xf32>, vector<64x128xf32>, vector<8x128xf32> -> vector<8x128xf32>
    %c1_437 = arith.constant 1 : index
    %c0_438 = arith.constant 0 : index
    %c0_439 = arith.constant 0 : index
    %1243 = vector.load %arg1[%c1_437, %c0_438, %c0_439] : memref<2x1x128xf32, #tpu.memory_space<vmem>>, vector<1x1x128xf32>
    %1244 = vector.shape_cast %1243 : vector<1x1x128xf32> to vector<1x128xf32>
    %1245 = vector.broadcast %1244 : vector<1x128xf32> to vector<8x128xf32>
    %1246 = arith.addf %1242, %1245 : vector<8x128xf32>
    %1247 = vector.extract_strided_slice %1246 {offsets = [0, 0], sizes = [8, 32], strides = [1, 1]} : vector<8x128xf32> to vector<8x32xf32>
    %1248 = arith.negf %1247 : vector<8x32xf32>
    %1249 = math.exp %1248 : vector<8x32xf32>
    %cst_440 = arith.constant 1.000000e+00 : f32
    %1250 = vector.broadcast %cst_440 : f32 to vector<8x32xf32>
    %1251 = arith.addf %1250, %1249 : vector<8x32xf32>
    %1252 = arith.divf %1250, %1251 : vector<8x32xf32>
    %1253 = vector.extract_strided_slice %1246 {offsets = [0, 32], sizes = [8, 32], strides = [1, 1]} : vector<8x128xf32> to vector<8x32xf32>
    %1254 = arith.negf %1253 : vector<8x32xf32>
    %1255 = math.exp %1254 : vector<8x32xf32>
    %cst_441 = arith.constant 1.000000e+00 : f32
    %1256 = vector.broadcast %cst_441 : f32 to vector<8x32xf32>
    %1257 = arith.addf %1256, %1255 : vector<8x32xf32>
    %1258 = arith.divf %1256, %1257 : vector<8x32xf32>
    %1259 = vector.extract_strided_slice %1246 {offsets = [0, 64], sizes = [8, 32], strides = [1, 1]} : vector<8x128xf32> to vector<8x32xf32>
    %1260 = math.tanh %1259 : vector<8x32xf32>
    %1261 = vector.extract_strided_slice %1246 {offsets = [0, 96], sizes = [8, 32], strides = [1, 1]} : vector<8x128xf32> to vector<8x32xf32>
    %1262 = arith.negf %1261 : vector<8x32xf32>
    %1263 = math.exp %1262 : vector<8x32xf32>
    %cst_442 = arith.constant 1.000000e+00 : f32
    %1264 = vector.broadcast %cst_442 : f32 to vector<8x32xf32>
    %1265 = arith.addf %1264, %1263 : vector<8x32xf32>
    %1266 = arith.divf %1264, %1265 : vector<8x32xf32>
    %1267 = arith.mulf %1258, %1183 : vector<8x32xf32>
    %1268 = arith.mulf %1252, %1260 : vector<8x32xf32>
    %1269 = arith.addf %1267, %1268 : vector<8x32xf32>
    %1270 = math.tanh %1269 : vector<8x32xf32>
    %1271 = arith.mulf %1266, %1270 : vector<8x32xf32>
    %c11 = arith.constant 11 : index
    %c0_443 = arith.constant 0 : index
    %c0_444 = arith.constant 0 : index
    %1272 = vector.load %arg2[%c11, %c0_443, %c0_444] : memref<13x32x128xf32, #tpu.memory_space<vmem>>, vector<1x32x128xf32>
    %1273 = vector.shape_cast %1272 : vector<1x32x128xf32> to vector<32x128xf32>
    %cst_445 = arith.constant dense<0.000000e+00> : vector<8x128xf32>
    %1274 = tpu.matmul %1271, %1273, %cst_445 {dimension_numbers = #tpu.dot_dimension_numbers<[1], [0], [0], [1], [0, 0, 1, 1], [], []>} : vector<8x32xf32>, vector<32x128xf32>, vector<8x128xf32> -> vector<8x128xf32>
    %c11_446 = arith.constant 11 : index
    %c0_447 = arith.constant 0 : index
    %c0_448 = arith.constant 0 : index
    %1275 = vector.load %arg3[%c11_446, %c0_447, %c0_448] : memref<13x1x128xf32, #tpu.memory_space<vmem>>, vector<1x1x128xf32>
    %1276 = vector.shape_cast %1275 : vector<1x1x128xf32> to vector<1x128xf32>
    %1277 = vector.broadcast %1276 : vector<1x128xf32> to vector<8x128xf32>
    %1278 = arith.addf %1274, %1277 : vector<8x128xf32>
    %1279 = vector.extract_strided_slice %1278 {offsets = [0, 0], sizes = [8, 1], strides = [1, 1]} : vector<8x128xf32> to vector<8x1xf32>
    %1280 = vector.extract_strided_slice %1278 {offsets = [0, 1], sizes = [8, 1], strides = [1, 1]} : vector<8x128xf32> to vector<8x1xf32>
    %c6_449 = arith.constant 6 : index
    %c0_450 = arith.constant 0 : index
    %c0_451 = arith.constant 0 : index
    %1281 = vector.load %arg7[%c6_449, %c0_450, %c0_451] : memref<8x8x1xf32, #tpu.memory_space<vmem>>, vector<1x8x1xf32>
    %1282 = vector.shape_cast %1281 : vector<1x8x1xf32> to vector<8x1xf32>
    %1283 = math.exp %1280 : vector<8x1xf32>
    %1284 = arith.mulf %1283, %1282 : vector<8x1xf32>
    %1285 = arith.addf %1279, %1284 : vector<8x1xf32>
    %cst_452 = arith.constant -5.000000e-01 : f32
    %1286 = vector.broadcast %cst_452 : f32 to vector<8x1xf32>
    %1287 = arith.mulf %1286, %1282 : vector<8x1xf32>
    %1288 = arith.mulf %1287, %1282 : vector<8x1xf32>
    %1289 = arith.subf %1288, %1280 : vector<8x1xf32>
    %cst_453 = arith.constant 0.918938517 : f32
    %1290 = vector.broadcast %cst_453 : f32 to vector<8x1xf32>
    %1291 = arith.subf %1289, %1290 : vector<8x1xf32>
    %1292 = tpu.concatenate %685, %1238 in 1 : vector<8x32xf32>, vector<8x32xf32> -> vector<8x64xf32>
    %c0_454 = arith.constant 0 : index
    %c0_455 = arith.constant 0 : index
    %c0_456 = arith.constant 0 : index
    %1293 = vector.load %arg0[%c0_454, %c0_455, %c0_456] : memref<2x64x128xf32, #tpu.memory_space<vmem>>, vector<1x64x128xf32>
    %1294 = vector.shape_cast %1293 : vector<1x64x128xf32> to vector<64x128xf32>
    %cst_457 = arith.constant dense<0.000000e+00> : vector<8x128xf32>
    %1295 = tpu.matmul %1292, %1294, %cst_457 {dimension_numbers = #tpu.dot_dimension_numbers<[1], [0], [0], [1], [0, 0, 1, 1], [], []>} : vector<8x64xf32>, vector<64x128xf32>, vector<8x128xf32> -> vector<8x128xf32>
    %c0_458 = arith.constant 0 : index
    %c0_459 = arith.constant 0 : index
    %c0_460 = arith.constant 0 : index
    %1296 = vector.load %arg1[%c0_458, %c0_459, %c0_460] : memref<2x1x128xf32, #tpu.memory_space<vmem>>, vector<1x1x128xf32>
    %1297 = vector.shape_cast %1296 : vector<1x1x128xf32> to vector<1x128xf32>
    %1298 = vector.broadcast %1297 : vector<1x128xf32> to vector<8x128xf32>
    %1299 = arith.addf %1295, %1298 : vector<8x128xf32>
    %1300 = vector.extract_strided_slice %1299 {offsets = [0, 0], sizes = [8, 32], strides = [1, 1]} : vector<8x128xf32> to vector<8x32xf32>
    %1301 = arith.negf %1300 : vector<8x32xf32>
    %1302 = math.exp %1301 : vector<8x32xf32>
    %cst_461 = arith.constant 1.000000e+00 : f32
    %1303 = vector.broadcast %cst_461 : f32 to vector<8x32xf32>
    %1304 = arith.addf %1303, %1302 : vector<8x32xf32>
    %1305 = arith.divf %1303, %1304 : vector<8x32xf32>
    %1306 = vector.extract_strided_slice %1299 {offsets = [0, 32], sizes = [8, 32], strides = [1, 1]} : vector<8x128xf32> to vector<8x32xf32>
    %1307 = arith.negf %1306 : vector<8x32xf32>
    %1308 = math.exp %1307 : vector<8x32xf32>
    %cst_462 = arith.constant 1.000000e+00 : f32
    %1309 = vector.broadcast %cst_462 : f32 to vector<8x32xf32>
    %1310 = arith.addf %1309, %1308 : vector<8x32xf32>
    %1311 = arith.divf %1309, %1310 : vector<8x32xf32>
    %1312 = vector.extract_strided_slice %1299 {offsets = [0, 64], sizes = [8, 32], strides = [1, 1]} : vector<8x128xf32> to vector<8x32xf32>
    %1313 = math.tanh %1312 : vector<8x32xf32>
    %1314 = vector.extract_strided_slice %1299 {offsets = [0, 96], sizes = [8, 32], strides = [1, 1]} : vector<8x128xf32> to vector<8x32xf32>
    %1315 = arith.negf %1314 : vector<8x32xf32>
    %1316 = math.exp %1315 : vector<8x32xf32>
    %cst_463 = arith.constant 1.000000e+00 : f32
    %1317 = vector.broadcast %cst_463 : f32 to vector<8x32xf32>
    %1318 = arith.addf %1317, %1316 : vector<8x32xf32>
    %1319 = arith.divf %1317, %1318 : vector<8x32xf32>
    %1320 = arith.mulf %1311, %1236 : vector<8x32xf32>
    %1321 = arith.mulf %1305, %1313 : vector<8x32xf32>
    %1322 = arith.addf %1320, %1321 : vector<8x32xf32>
    %1323 = math.tanh %1322 : vector<8x32xf32>
    %1324 = arith.mulf %1319, %1323 : vector<8x32xf32>
    %1325 = tpu.concatenate %1324, %1271 in 1 : vector<8x32xf32>, vector<8x32xf32> -> vector<8x64xf32>
    %c1_464 = arith.constant 1 : index
    %c0_465 = arith.constant 0 : index
    %c0_466 = arith.constant 0 : index
    %1326 = vector.load %arg0[%c1_464, %c0_465, %c0_466] : memref<2x64x128xf32, #tpu.memory_space<vmem>>, vector<1x64x128xf32>
    %1327 = vector.shape_cast %1326 : vector<1x64x128xf32> to vector<64x128xf32>
    %cst_467 = arith.constant dense<0.000000e+00> : vector<8x128xf32>
    %1328 = tpu.matmul %1325, %1327, %cst_467 {dimension_numbers = #tpu.dot_dimension_numbers<[1], [0], [0], [1], [0, 0, 1, 1], [], []>} : vector<8x64xf32>, vector<64x128xf32>, vector<8x128xf32> -> vector<8x128xf32>
    %c1_468 = arith.constant 1 : index
    %c0_469 = arith.constant 0 : index
    %c0_470 = arith.constant 0 : index
    %1329 = vector.load %arg1[%c1_468, %c0_469, %c0_470] : memref<2x1x128xf32, #tpu.memory_space<vmem>>, vector<1x1x128xf32>
    %1330 = vector.shape_cast %1329 : vector<1x1x128xf32> to vector<1x128xf32>
    %1331 = vector.broadcast %1330 : vector<1x128xf32> to vector<8x128xf32>
    %1332 = arith.addf %1328, %1331 : vector<8x128xf32>
    %1333 = vector.extract_strided_slice %1332 {offsets = [0, 0], sizes = [8, 32], strides = [1, 1]} : vector<8x128xf32> to vector<8x32xf32>
    %1334 = arith.negf %1333 : vector<8x32xf32>
    %1335 = math.exp %1334 : vector<8x32xf32>
    %cst_471 = arith.constant 1.000000e+00 : f32
    %1336 = vector.broadcast %cst_471 : f32 to vector<8x32xf32>
    %1337 = arith.addf %1336, %1335 : vector<8x32xf32>
    %1338 = arith.divf %1336, %1337 : vector<8x32xf32>
    %1339 = vector.extract_strided_slice %1332 {offsets = [0, 32], sizes = [8, 32], strides = [1, 1]} : vector<8x128xf32> to vector<8x32xf32>
    %1340 = arith.negf %1339 : vector<8x32xf32>
    %1341 = math.exp %1340 : vector<8x32xf32>
    %cst_472 = arith.constant 1.000000e+00 : f32
    %1342 = vector.broadcast %cst_472 : f32 to vector<8x32xf32>
    %1343 = arith.addf %1342, %1341 : vector<8x32xf32>
    %1344 = arith.divf %1342, %1343 : vector<8x32xf32>
    %1345 = vector.extract_strided_slice %1332 {offsets = [0, 64], sizes = [8, 32], strides = [1, 1]} : vector<8x128xf32> to vector<8x32xf32>
    %1346 = math.tanh %1345 : vector<8x32xf32>
    %1347 = vector.extract_strided_slice %1332 {offsets = [0, 96], sizes = [8, 32], strides = [1, 1]} : vector<8x128xf32> to vector<8x32xf32>
    %1348 = arith.negf %1347 : vector<8x32xf32>
    %1349 = math.exp %1348 : vector<8x32xf32>
    %cst_473 = arith.constant 1.000000e+00 : f32
    %1350 = vector.broadcast %cst_473 : f32 to vector<8x32xf32>
    %1351 = arith.addf %1350, %1349 : vector<8x32xf32>
    %1352 = arith.divf %1350, %1351 : vector<8x32xf32>
    %1353 = arith.mulf %1344, %1269 : vector<8x32xf32>
    %1354 = arith.mulf %1338, %1346 : vector<8x32xf32>
    %1355 = arith.addf %1353, %1354 : vector<8x32xf32>
    %1356 = math.tanh %1355 : vector<8x32xf32>
    %1357 = arith.mulf %1352, %1356 : vector<8x32xf32>
    %c12 = arith.constant 12 : index
    %c0_474 = arith.constant 0 : index
    %c0_475 = arith.constant 0 : index
    %1358 = vector.load %arg2[%c12, %c0_474, %c0_475] : memref<13x32x128xf32, #tpu.memory_space<vmem>>, vector<1x32x128xf32>
    %1359 = vector.shape_cast %1358 : vector<1x32x128xf32> to vector<32x128xf32>
    %cst_476 = arith.constant dense<0.000000e+00> : vector<8x128xf32>
    %1360 = tpu.matmul %1357, %1359, %cst_476 {dimension_numbers = #tpu.dot_dimension_numbers<[1], [0], [0], [1], [0, 0, 1, 1], [], []>} : vector<8x32xf32>, vector<32x128xf32>, vector<8x128xf32> -> vector<8x128xf32>
    %c12_477 = arith.constant 12 : index
    %c0_478 = arith.constant 0 : index
    %c0_479 = arith.constant 0 : index
    %1361 = vector.load %arg3[%c12_477, %c0_478, %c0_479] : memref<13x1x128xf32, #tpu.memory_space<vmem>>, vector<1x1x128xf32>
    %1362 = vector.shape_cast %1361 : vector<1x1x128xf32> to vector<1x128xf32>
    %1363 = vector.broadcast %1362 : vector<1x128xf32> to vector<8x128xf32>
    %1364 = arith.addf %1360, %1363 : vector<8x128xf32>
    %1365 = vector.extract_strided_slice %1364 {offsets = [0, 0], sizes = [8, 1], strides = [1, 1]} : vector<8x128xf32> to vector<8x1xf32>
    %1366 = vector.extract_strided_slice %1364 {offsets = [0, 1], sizes = [8, 1], strides = [1, 1]} : vector<8x128xf32> to vector<8x1xf32>
    %c7_480 = arith.constant 7 : index
    %c0_481 = arith.constant 0 : index
    %c0_482 = arith.constant 0 : index
    %1367 = vector.load %arg7[%c7_480, %c0_481, %c0_482] : memref<8x8x1xf32, #tpu.memory_space<vmem>>, vector<1x8x1xf32>
    %1368 = vector.shape_cast %1367 : vector<1x8x1xf32> to vector<8x1xf32>
    %1369 = math.exp %1366 : vector<8x1xf32>
    %1370 = arith.mulf %1369, %1368 : vector<8x1xf32>
    %1371 = arith.addf %1365, %1370 : vector<8x1xf32>
    %cst_483 = arith.constant -5.000000e-01 : f32
    %1372 = vector.broadcast %cst_483 : f32 to vector<8x1xf32>
    %1373 = arith.mulf %1372, %1368 : vector<8x1xf32>
    %1374 = arith.mulf %1373, %1368 : vector<8x1xf32>
    %1375 = arith.subf %1374, %1366 : vector<8x1xf32>
    %cst_484 = arith.constant 0.918938517 : f32
    %1376 = vector.broadcast %cst_484 : f32 to vector<8x1xf32>
    %1377 = arith.subf %1375, %1376 : vector<8x1xf32>
    %1378 = tpu.concatenate %769, %855, %941, %1027, %1113, %1199, %1285, %1371 in 1 : vector<8x1xf32>, vector<8x1xf32>, vector<8x1xf32>, vector<8x1xf32>, vector<8x1xf32>, vector<8x1xf32>, vector<8x1xf32>, vector<8x1xf32> -> vector<8x8xf32>
    %c0_485 = arith.constant 0 : index
    %c0_486 = arith.constant 0 : index
    %1379 = vector.load %arg10[%c0_485, %c0_486] : memref<8x8xf32, #tpu.memory_space<vmem>>, vector<8x8xf32>
    tpu.vector_store %arg10[%c0_485, %c0_486], %1378 {strides = array<i32>} : memref<8x8xf32, #tpu.memory_space<vmem>>, vector<8x8xf32>,
    %1380 = tpu.concatenate %775, %861, %947, %1033, %1119, %1205, %1291, %1377 in 1 : vector<8x1xf32>, vector<8x1xf32>, vector<8x1xf32>, vector<8x1xf32>, vector<8x1xf32>, vector<8x1xf32>, vector<8x1xf32>, vector<8x1xf32> -> vector<8x8xf32>
    %c0_487 = arith.constant 0 : index
    %c0_488 = arith.constant 0 : index
    %1381 = vector.load %arg11[%c0_487, %c0_488] : memref<8x8xf32, #tpu.memory_space<vmem>>, vector<8x8xf32>
    tpu.vector_store %arg11[%c0_487, %c0_488], %1380 {strides = array<i32>} : memref<8x8xf32, #tpu.memory_space<vmem>>, vector<8x8xf32>,
    return
  }
}

</mosaic_0001>

<bundles_post_ra>
// kernel: tpu_custom_call.1
= control target key start
LH: loop header
LB: loop body
LE: loop exit
PB: predicated region body
PF: predicated region fallthrough
CT: control target
= control target key end

     0   :  { %17 = vsyncpa [#allocation3], 0  ;;  %s7860_s0 = inlined_call_operand.hbm [shape: f32[2,64,128], index: 0, kind: input, shape index: {}]   ;;  %s7861_s1 = inlined_call_operand.vmem [shape: f32[2,1,128], index: 1, kind: input, shape index: {}]   ;;  %s7862_s2 = inlined_call_operand.hbm [shape: f32[13,32,128], index: 2, kind: input, shape index: {}]   ;;  %s7863_s3 = inlined_call_operand.hbm [shape: f32[13,1,128], index: 3, kind: input, shape index: {}]   ;;  %s7864_s4 = inlined_call_operand.vmem [shape: f32[5,8,32], index: 4, kind: input, shape index: {}]   ;;  %s7865_s5 = inlined_call_operand.hbm [shape: f32[5,1,128], index: 5, kind: input, shape index: {}]   ;;  %s7866_s6 = inlined_call_operand.vmem [shape: f32[5,8,128], index: 6, kind: input, shape index: {}]   ;;  %s7867_s7 = inlined_call_operand.vmem [shape: f32[8,8,1], index: 7, kind: input, shape index: {}]   ;;  %s7868_s8 = inlined_call_operand.hbm [shape: s32[8,5], index: 8, kind: output, shape index: {0}]   ;;  %s7869_s9 = inlined_call_operand.hbm [shape: f32[8,5], index: 9, kind: output, shape index: {1}]   ;;  %s7870_s10 = inlined_call_operand.hbm [shape: f32[8,8], index: 10, kind: output, shape index: {2}]   ;;  %s7871_s11 = inlined_call_operand.hbm [shape: f32[8,8], index: 11, kind: output, shape index: {3}]  }
   0x1   :  { %18 = vsyncpa [#allocation6], 0 }
   0x2   :  { %19 = vsyncpa [#allocation9], 0 }
   0x3   :  { %20 = vsyncpa [#allocation4], 0 }
   0x4   :  { %21 = vsyncpa [#allocation12], 0 }
   0x5   :  { %22 = vsyncpa [#allocation15], 0  ;;  %s6562_s17 = smov [#allocation5]   ;;  %s6563_s19 = smov [#allocation2]  }
   0x6   :  { %s42_s18 = sshll.u32 %s6562_s17, 4  ;;  %s28_s20 = sshll.u32 %s6563_s19, 4  ;;  %s43_s18 = int_to_ptr.vmem [resolvable:$true] %s42_s18  ;;  %s6646_s20 = int_to_ptr.vmem [resolvable:$true] %s28_s20 }
   0x7   :  { %s6374_s23 = scalar_lea.hbm %s7862_s2, 6656 }
   0x8   :  { %p6375_p0 = scmp.ne.s32.totalorder %s7862_s2, %s6374_s23  ;;  %p6378_p1 = scmp.lt.u32.totalorder %s6374_s23, %s7862_s2 }
   0xa   :  { %p6380_p2 = pnand %p6378_p1, %p6375_p0 }
   0xc   :  { %6383 = shalt.err (!%p6380_p2)
}
   0xd   :  { %s6384_s28 = scalar_lea.vmem %s43_s18, 6656  ;;  %p6389_p4 = scmp.lt.s32.totalorder %s43_s18, %s43_s18 }
   0xe   :  { %p6385_p3 = scmp.ne.s32.totalorder %s43_s18, %s6384_s28  ;;  %p6390_p5 = scmp.lt.s32.totalorder %s6384_s28, %s6384_s28 }
  0x10   :  { %p6391_p6 = por %p6390_p5, %p6389_p4 }
  0x12   :  { %p6392_p7 = pnand %p6391_p6, %p6385_p3 }
  0x14   :  { %6395 = shalt.err (!%p6392_p7)
}
  0x15   :  { %s6564_s29 = smov 128   ;;  %s6565_s30 = smov 8  }
  0x16   :  { %48 = dma.hbm_to_vmem [thread:$0]  %s7862_s2, 6656, %s43_s18, [#allocation6], %s6564_s29, %s6564_s29, %s6565_s30  }
  0x17   :  { %s6396_s16 = scalar_lea.hbm %s7860_s0, 2048 }
  0x18   :  { %p6397_p8 = scmp.ne.s32.totalorder %s7860_s0, %s6396_s16  ;;  %p6400_p9 = scmp.lt.u32.totalorder %s6396_s16, %s7860_s0 }
  0x1a   :  { %p6402_p10 = pnand %p6400_p9, %p6397_p8 }
  0x1c   :  { %6405 = shalt.err (!%p6402_p10)
}
  0x1d   :  { %s6406_s23 = scalar_lea.vmem %s6646_s20, 2048  ;;  %p6411_p12 = scmp.lt.s32.totalorder %s6646_s20, %s6646_s20 }
  0x1e   :  { %p6407_p11 = scmp.ne.s32.totalorder %s6646_s20, %s6406_s23  ;;  %p6412_p13 = scmp.lt.s32.totalorder %s6406_s23, %s6406_s23 }
  0x20   :  { %p6413_p0 = por %p6412_p13, %p6411_p12 }
  0x22   :  { %p6414_p1 = pnand %p6413_p0, %p6407_p11 }
  0x24   :  { %6417 = shalt.err (!%p6414_p1)
}
  0x25   :  { %34 = dma.hbm_to_vmem [thread:$0]  %s7860_s0, 2048, %s6646_s20, [#allocation3], %s6564_s29, %s6564_s29, %s6565_s30  }
  0x26   :  { %s6566_s24 = smov [#allocation7]   ;;  %s6418_s28 = scalar_lea.hbm %s7863_s3, 208 }
  0x27   :  { %s54_s25 = sshll.u32 %s6566_s24, 4  ;;  %p6419_p2 = scmp.ne.s32.totalorder %s7863_s3, %s6418_s28  ;;  %s55_s25 = int_to_ptr.vmem [resolvable:$true] %s54_s25 }
  0x28   :  { %p6422_p3 = scmp.lt.u32.totalorder %s6418_s28, %s7863_s3 }
  0x2a   :  { %p6424_p4 = pnand %p6422_p3, %p6419_p2 }
  0x2c   :  { %6427 = shalt.err (!%p6424_p4)
}
  0x2d   :  { %s6428_s16 = scalar_lea.vmem %s55_s25, 208  ;;  %s6432_s0 = scalar_lea.vmem %s55_s25, 224 }
  0x2e   :  { %p6429_p5 = scmp.ne.s32.totalorder %s55_s25, %s6428_s16  ;;  %p6433_p6 = scmp.lt.s32.totalorder %s55_s25, %s55_s25 }
  0x2f   :  { %p6434_p7 = scmp.lt.s32.totalorder %s6432_s0, %s6428_s16 }
  0x31   :  { %p6435_p8 = por %p6434_p7, %p6433_p6 }
  0x33   :  { %p6436_p9 = pnand %p6435_p8, %p6429_p5 }
  0x35   :  { %6439 = shalt.err (!%p6436_p9)
}
  0x36   :  { %s6567_s20 = smov 16   ;;  %s6568_s29 = smov 1  }
  0x37   :  { %60 = dma.hbm_to_vmem [thread:$0]  %s7863_s3, 208, %s55_s25, [#allocation6], %s6567_s20, %s6567_s20, %s6568_s29  }
  0x38   :  { %s6569_s19 = smov [#allocation8]   ;;  %s6440_s2 = scalar_lea.hbm %s7865_s5, 80 }
  0x39   :  { %s68_s21 = sshll.u32 %s6569_s19, 4  ;;  %p6441_p10 = scmp.ne.s32.totalorder %s7865_s5, %s6440_s2  ;;  %s69_s21 = int_to_ptr.vmem [resolvable:$true] %s68_s21 }
  0x3a   :  { %p6444_p11 = scmp.lt.u32.totalorder %s6440_s2, %s7865_s5 }
  0x3c   :  { %p6446_p12 = pnand %p6444_p11, %p6441_p10 }
  0x3e   :  { %6449 = shalt.err (!%p6446_p12)
}
  0x3f   :  { %s6450_s28 = scalar_lea.vmem %s69_s21, 80  ;;  %s6454_s3 = scalar_lea.vmem %s69_s21, 96 }
  0x40   :  { %p6451_p13 = scmp.ne.s32.totalorder %s69_s21, %s6450_s28  ;;  %p6455_p0 = scmp.lt.s32.totalorder %s69_s21, %s69_s21 }
  0x41   :  { %p6456_p1 = scmp.lt.s32.totalorder %s6454_s3, %s6450_s28 }
  0x43   :  { %p6457_p2 = por %p6456_p1, %p6455_p0 }
  0x45   :  { %p6458_p3 = pnand %p6457_p2, %p6451_p13 }
  0x47   :  { %6461 = shalt.err (!%p6458_p3)
}
  0x48   :  { %74 = dma.hbm_to_vmem [thread:$0]  %s7865_s5, 80, %s69_s21, [#allocation9], %s6567_s20, %s6567_s20, %s6568_s29  }
  0x49   :  { %6550 = dma.done.wait [#allocation3], 2048  }
  0x4a   :  { %6551 = vsyncadd [#allocation3], 4294965248 }
  0x4b   :  { %6552 = dma.done.wait [#allocation6], 6864  }
  0x4c   :  { %6553 = vsyncadd [#allocation6], 4294960432 }
  0x4d   :  { %6554 = dma.done.wait [#allocation9], 80  }
  0x4e   :  { %6555 = vsyncadd [#allocation9], 4294967216  ;;  %v6570_v0 = vmov 0.0|0.0   ;;  %vm6571_vm0 = vmmov 0   ;;  %v6572_v1 = vmov 0.0   ;;  %v91_v2 = vld [vmem:[#allocation2] sm:$0xff] }
  0x4f   :  { %5712 = vmatprep.subr.bf16.mxu0 %v6570_v0  ;;  %5091 = vmatprep.mubr.msk.f32.mxu0 %vm6571_vm0, %v6572_v1  ;;  %v92_v3 = vld [vmem:[#allocation2 + $0x8] sm:$0xff]  ;;  %v93_v4 = vld [vmem:[#allocation2 + $0x10] sm:$0xff]  ;;  %v94_v6 = vld [vmem:[#allocation2 + $0x18] sm:$0xff]  ;;  %s6573_s14 = smov 64   ;;  %s6574_s15 = smov 32   ;;  %vm208_vm1 = vcmask 261120  }
  0x50   :  { %5724 = vmatprep.subr.bf16.mxu1 %v6570_v0  ;;  %5110 = vmatprep.mubr.msk.f32.mxu1 %vm6571_vm0, %v6572_v1  ;;  %v6709_v5 = vpack.c.bf16 %v92_v3, %v91_v2  ;;  %v6712_v7 = vpack.c.bf16 %v94_v6, %v93_v4  ;;  %v95_v8 = vld [vmem:[#allocation2 + $0x20] sm:$0xff]  ;;  %v96_v9 = vld [vmem:[#allocation2 + $0x28] sm:$0xff]  ;;  %v97_v11 = vld [vmem:[#allocation2 + $0x30] sm:$0xff]  ;;  %vm106_vm2 = vcmask 523264   ;;  %vm1946_vm15 = vcmask 7168   ;;  %s6575_s17 = smov 127  }
  0x51   :  { %v6716_v10 = vpack.c.bf16 %v96_v9, %v95_v8  ;;  %v98_v12 = vld [vmem:[#allocation2 + $0x38] sm:$0xff]  ;;  %v6731_v14 = vld [vmem:[%s7861_s1] ss:$0 sm:$0xff]  ;;  %v212_v29 = vld [vmem:[#allocation2 + $0x48] sm:$0xff]  ;;  %s6579_s19 = smov 5   ;;  %s6580_s21 = smov 6  }
  0x52   :  { %5714 = vmatpush3.bf16.msra.mxu0 %v6709_v5  ;;  %v6720_v13 = vpack.c.bf16 %v98_v12, %v97_v11  ;;  %v211_v28 = vld [vmem:[#allocation2 + $0x40] sm:$0xff]  ;;  %v213_v30 = vld [vmem:[#allocation2 + $0x50] sm:$0xff]  ;;  %v214_v32 = vld [vmem:[#allocation2 + $0x58] sm:$0xff]  ;;  %s6581_s22 = smov [#allocation10]  }
  0x53   :  { %5715 = vmatprep.subr.bf16.mxu0 %v6570_v0  ;;  %v6739_v31 = vpack.c.bf16 %v212_v29, %v211_v28  ;;  %v6742_v33 = vpack.c.bf16 %v214_v32, %v213_v30  ;;  %v215_v34 = vld [vmem:[#allocation2 + $0x60] sm:$0xff]  ;;  %v216_v35 = vld [vmem:[#allocation2 + $0x68] sm:$0xff]  ;;  %v217_v37 = vld [vmem:[#allocation2 + $0x70] sm:$0xff]  ;;  %s4599_s23 = sshll.u32 %s6581_s22, 4  ;;  %s4600_s23 = int_to_ptr.vmem [resolvable:$true] %s4599_s23 }
  0x54   :  { %v6746_v36 = vpack.c.bf16 %v216_v35, %v215_v34  ;;  %v218_v38 = vld [vmem:[#allocation2 + $0x78] sm:$0xff]  ;;  %v6775_v45 = vld [vmem:[%s7861_s1 + $0x1] ss:$0 sm:$0xff]  ;;  %v325_v60 = vld [vmem:[#allocation5 + $0x8] sm:$0xff]  ;;  %s6462_s2 = scalar_lea.vmem %s4600_s23, 128  ;;  %p6467_p5 = scmp.lt.s32.totalorder %s4600_s23, %s4600_s23 }
  0x55   :  { %5726 = vmatpush3.bf16.msra.mxu1 %v6739_v31  ;;  %v6751_v40 = vpack.c.bf16 %v218_v38, %v217_v37  ;;  %v324_v59 = vld [vmem:[#allocation5] sm:$0xff]  ;;  %v326_v61 = vld [vmem:[#allocation5 + $0x10] sm:$0xff]  ;;  %v327_v63 = vld [vmem:[#allocation5 + $0x18] sm:$0xff]  ;;  %p6463_p4 = scmp.ne.s32.totalorder %s4600_s23, %s6462_s2  ;;  %p6468_p6 = scmp.lt.s32.totalorder %s6462_s2, %s6462_s2 }
  0x56   :  { %5717 = vmatpush3.bf16.msra.mxu0 %v6712_v7  ;;  %5727 = vmatprep.subr.bf16.mxu1 %v6570_v0  ;;  %v5737_v62 = vpack.c.bf16 %v325_v60, %v324_v59  ;;  %v5740_v2 = vpack.c.bf16 %v327_v63, %v326_v61  ;;  %v4657_v9 = vld [vmem:[#allocation7] ss:$0 sm:$0xff]  ;;  %v4659_v12 = vld [vmem:[#allocation8] ss:$0 sm:$0xff] }
  0x57   :  { %5718 = vmatprep.subr.bf16.mxu0 %v6570_v0  ;;  %p6469_p7 = por %p6468_p6, %p6467_p5 }
  0x59   :  { %5729 = vmatpush3.bf16.msra.mxu1 %v6742_v33  ;;  %p6470_p8 = pnand %p6469_p7, %p6463_p4 }
  0x5a   :  { %5720 = vmatpush3.bf16.msra.mxu0 %v6716_v10  ;;  %5730 = vmatprep.subr.bf16.mxu1 %v6570_v0 }
  0x5b   :  { %5721 = vmatprep.subr.bf16.mxu0 %v6570_v0 }
  0x5d   :  { %5732 = vmatpush3.bf16.msra.mxu1 %v6746_v36 }
  0x5e   :  { %5723 = vmatpush3.bf16.msra.mxu0 %v6720_v13  ;;  %5733 = vmatprep.subr.bf16.mxu1 %v6570_v0 }
  0x5f   :  { %5736 = vmatprep.subr.bf16.mxu0 %v6570_v0 }
  0x61   :  { %5092 = vmatmul.mubr.f32.vlgmr.msra.gmra.mrb[0].mxu0 %v6572_v1  ;;  %5735 = vmatpush3.bf16.msra.mxu1 %v6751_v40 }
  0x62   :  { %5121 = vmatprep.mubr.msk.f32.mxu0 %vm6571_vm0, %v6572_v1  ;;  %5742 = vmatprep.subr.bf16.mxu1 %v6570_v0 }
  0x63   :  { %5738 = vmatpush3.bf16.msra.mxu0 %v5737_v62 }
  0x64   :  { %5739 = vmatprep.subr.bf16.mxu0 %v6570_v0 }
  0x67   :  { %5741 = vmatpush3.bf16.msra.mxu0 %v5740_v2 }
  0x68   :  { %5754 = vmatprep.subr.bf16.mxu0 %v6570_v0 }
 0x134   :  { %v176_v15 = vpop.f32.mrb[0].mxu0 }
 0x135   :  { %v177_v16 = vadd.f32 %v6731_v14, %v176_v15  ;;  %v5093_v17 = vpop.f32.mrb[1].mxu0 }
 0x136   :  { %v418_v17 = vld [vmem:[%s7866_s6] sm:$0xff] }
 0x137   :  { %6126 = vtanh.f32 %v177_v16  ;;  %v4652_v19 = vmul.f32 -1.442695, %v177_v16 }
 0x139   :  { %6128 = vpow2.f32 %v4652_v19 }
 0x141   :  { %v6127_v18 = vpop.eup %6126 }
 0x142   :  { %189 = vrot.lane.b32.xlu0 %v6127_v18, %s6573_s14 }
 0x143   :  { %v6129_v20 = vpop.eup %6128 }
 0x144   :  { %v183_v21 = vadd.f32 1.0, %v6129_v20  ;;  %v420_v20 = vlaneseq }
 0x146   :  { %6130 = vrcp.f32 %v183_v21  ;;  %v6807_v21 = vand.u32 127, %v420_v20  ;;  %v6812_v32 = vshrl.u32 %v420_v20, 7 }
 0x148   :  { %v6815_v35 = vsub.s32 0, %v6812_v32  ;;  %v6818_v37 = vsub.s32 1, %v6812_v32 }
 0x150   :  { %v6131_v22 = vpop.eup %6130 }
 0x151   :  { %v187_v25 = vmul.f32 0.0, %v6131_v22 }
 0x1b4   :  { %v190_v23 = vpop.permute.xlu0 %189 }
 0x1b5   :  { %v192_v24 = vmul.f32 %v6131_v22, %v190_v23 }
 0x1b7   :  { %194 = vrot.lane.b32.xlu0 %v192_v24, %s6574_s15 }
 0x229   :  { %v195_v26 = vpop.permute.xlu0 %194 }
 0x22a   :  { %v6736_v27 = vadd.f32 %v195_v26, %v187_v25 }
 0x22c   :  { %6132 = vtanh.f32 %v6736_v27 }
 0x236   :  { %v6133_v39 = vpop.eup %6132 }
 0x237   :  { %200 = vrot.lane.b32.xlu1 %v6133_v39, %s6573_s14  ;;  %v455_v39 = vld [vmem:[%s7864_s4] sm:$0xff] }
 0x2a9   :  { %v201_v41 = vpop.permute.xlu1 %200 }
 0x2aa   :  { %v6756_v42 = vmul.f32 %v6131_v22, %v201_v41 }
 0x2ac   :  { %205 = vrot.lane.b32.xlu1 %v6756_v42, %s6574_s15 }
 0x31e   :  { %v206_v43 = vpop.permute.xlu1 %205 }
 0x31f   :  { %v209_v44 = vsel %vm208_vm1, %v206_v43, 0.0 }
 0x320   :  { %5111 = vmatmul.mubr.msk.f32.vlgmr.msra.gmra.mrb[0].mxu1 %vm106_vm2, %v209_v44  ;;  %v6824_v44 = vsub.s32 2, %v6812_v32 }
 0x321   :  { %5744 = vmatpush3.bf16.msra.mxu1 %v6709_v5  ;;  %5140 = vmatprep.mubr.msk.f32.mxu1 %vm6571_vm0, %v6572_v1 }
 0x322   :  { %5745 = vmatprep.subr.bf16.mxu1 %v6570_v0 }
 0x325   :  { %5747 = vmatpush3.bf16.msra.mxu1 %v6712_v7 }
 0x326   :  { %5748 = vmatprep.subr.bf16.mxu1 %v6570_v0 }
 0x329   :  { %5750 = vmatpush3.bf16.msra.mxu1 %v6716_v10 }
 0x32a   :  { %5751 = vmatprep.subr.bf16.mxu1 %v6570_v0 }
 0x32d   :  { %5753 = vmatpush3.bf16.msra.mxu1 %v6720_v13 }
 0x32e   :  { %5766 = vmatprep.subr.bf16.mxu1 %v6570_v0 }
 0x3f3   :  { %v296_v46 = vpop.f32.mrb[0].mxu1 }
 0x3f4   :  { %v297_v47 = vadd.f32 %v6775_v45, %v296_v46  ;;  %v5112_v48 = vpop.f32.mrb[1].mxu1  ;;  %v462_v46 = vrot.slane %v455_v39, %v6815_v35 }
 0x3f5   :  { %v480_v48 = vrot.slane %v455_v39, %v6824_v44 }
 0x3f6   :  { %6134 = vtanh.f32 %v297_v47  ;;  %v4656_v50 = vmul.f32 -1.442695, %v297_v47  ;;  %v471_v47 = vrot.slane %v455_v39, %v6818_v37 }
 0x3f8   :  { %6136 = vpow2.f32 %v4656_v50 }
 0x400   :  { %v6135_v49 = vpop.eup %6134 }
 0x401   :  { %309 = vrot.lane.b32.xlu0 %v6135_v49, %s6573_s14 }
 0x402   :  { %v6137_v51 = vpop.eup %6136 }
 0x403   :  { %v303_v52 = vadd.f32 1.0, %v6137_v51 }
 0x405   :  { %6138 = vrcp.f32 %v303_v52 }
 0x40f   :  { %v6139_v53 = vpop.eup %6138 }
 0x410   :  { %v307_v56 = vmul.f32 0.0, %v6139_v53 }
 0x473   :  { %v310_v54 = vpop.permute.xlu0 %309 }
 0x474   :  { %v312_v55 = vmul.f32 %v6139_v53, %v310_v54 }
 0x476   :  { %314 = vrot.lane.b32.xlu1 %v312_v55, %s6574_s15 }
 0x4e8   :  { %v315_v57 = vpop.permute.xlu1 %314 }
 0x4e9   :  { %v6780_v58 = vadd.f32 %v315_v57, %v307_v56 }
 0x4eb   :  { %6140 = vtanh.f32 %v6780_v58 }
 0x4f5   :  { %v6141_v3 = vpop.eup %6140 }
 0x4f6   :  { %320 = vrot.lane.b32.xlu0 %v6141_v3, %s6573_s14 }
 0x568   :  { %v321_v4 = vpop.permute.xlu0 %320 }
 0x569   :  { %v6786_v6 = vmul.f32 %v6139_v53, %v321_v4 }
 0x56b   :  { %336 = vrot.lane.b32.xlu1 %v6786_v6, %s6574_s15 }
 0x5dd   :  { %v337_v8 = vpop.permute.xlu1 %336 }
 0x5de   :  { %5122 = vmatmul.mubr.msk.f32.vlgmr.msra.gmra.mrb[2].mxu0 %vm208_vm1, %v337_v8 }
 0x5df   :  { %5756 = vmatpush3.bf16.msra.mxu0 %v6739_v31  ;;  %5159 = vmatprep.mubr.msk.f32.mxu0 %vm6571_vm0, %v6572_v1 }
 0x5e0   :  { %5757 = vmatprep.subr.bf16.mxu0 %v6570_v0 }
 0x5e3   :  { %5759 = vmatpush3.bf16.msra.mxu0 %v6742_v33 }
 0x5e4   :  { %5760 = vmatprep.subr.bf16.mxu0 %v6570_v0 }
 0x5e7   :  { %5762 = vmatpush3.bf16.msra.mxu0 %v6746_v36 }
 0x5e8   :  { %5763 = vmatprep.subr.bf16.mxu0 %v6570_v0 }
 0x5eb   :  { %5765 = vmatpush3.bf16.msra.mxu0 %v6751_v40 }
 0x5ec   :  { %5772 = vmatprep.subr.bf16.mxu0 %v6570_v0 }
 0x6b1   :  { %v406_v11 = vpop.f32.mrb[2].mxu0 }
 0x6b2   :  { %v407_v15 = vadd.f32 %v4657_v9, %v406_v11  ;;  %v5123_v16 = vpop.f32.mrb[3].mxu0 }
 0x6b4   :  { %v6804_v18 = vadd.f32 %v4659_v12, %v407_v15 }
 0x6b6   :  { %v419_v19 = vadd.f32 %v418_v17, %v6804_v18 }
 0x6b8   :  { %422 = vmax.xlane.f32.xlu0 %v419_v19 }
 0x745   :  { %v423_v22 = vpop.xlane.xlu0 %422 }
 0x746   :  { %vm424_vm3 = vcmp.ge.f32.partialorder %v419_v19, %v423_v22 }
 0x747   :  { %v425_v23 = vsel %vm424_vm3, %v6807_v21, 128  ;;  %vm1948_vm3 = vcmask 15360  }
 0x748   :  { %v427_v24 = vshra.s32 %v425_v23, 16  ;;  %v426_v26 = vand.u32 65535, %v425_v23 }
 0x74a   :  { %v429_v25 = vcvt.s32.f32 %v427_v24  ;;  %v428_v29 = vcvt.s32.f32 %v426_v26 }
 0x74c   :  { %430 = vmin.xlane.f32.xlu1 %v429_v25 }
 0x7d9   :  { %v431_v28 = vpop.xlane.xlu1 %430 }
 0x7da   :  { %vm432_vm4 = vcmp.eq.f32.partialorder %v429_v25, %v431_v28  ;;  %v437_v34 = vcvt.f32.s32 %v431_v28 }
 0x7db   :  { %v433_v30 = vsel %vm432_vm4, %v428_v29, inf }
 0x7dc   :  { %434 = vmin.xlane.f32.xlu0 %v433_v30  ;;  %v438_v41 = vshll.u32 %v437_v34, 16 }
 0x7f2   :  { %483 = vrot.lane.b32.xlu0 %v6756_v42, %s6573_s14 }
 0x869   :  { %v435_v38 = vpop.xlane.xlu0 %434 }
 0x86a   :  { %v436_v43 = vcvt.f32.s32 %v435_v38 }
 0x86c   :  { %v6826_v42 = vadd.s32 %v438_v41, %v436_v43 }
 0x86d   :  { %v484_v57 = vpop.permute.xlu0 %483 }
 0x86e   :  { %vm456_vm5 = vcmp.eq.s32.totalorder %v6826_v42, 0  ;;  %vm465_vm6 = vcmp.eq.s32.totalorder %v6826_v42, 1  ;;  %vm474_vm7 = vcmp.eq.s32.totalorder %v6826_v42, 2 }
 0x86f   :  { %v4660_v49 = vsel %vm456_vm5, 1.0, %v6572_v1  ;;  %v4661_v50 = vsel %vm465_vm6, 1.0, %v6572_v1  ;;  %v4662_v51 = vsel %vm474_vm7, 1.0, %v6572_v1 }
 0x870   :  { %v463_v52 = vmul.f32 %v4660_v49, %v462_v46  ;;  %v472_v53 = vmul.f32 %v4661_v50, %v471_v47  ;;  %v481_v55 = vmul.f32 %v4662_v51, %v480_v48  ;;  %v690_v47 = vld [vmem:[#allocation5 + $0x20] sm:$0xff]  ;;  %v691_v48 = vld [vmem:[#allocation5 + $0x28] sm:$0xff]  ;;  %v692_v49 = vld [vmem:[#allocation5 + $0x30] sm:$0xff] }
 0x871   :  { %v5767_v50 = vpack.c.bf16 %v691_v48, %v690_v47  ;;  %v693_v51 = vld [vmem:[#allocation5 + $0x38] sm:$0xff] }
 0x872   :  { %v473_v54 = vadd.f32 %v472_v53, %v463_v52  ;;  %v5770_v52 = vpack.c.bf16 %v693_v51, %v692_v49 }
 0x874   :  { %v482_v56 = vadd.f32 %v481_v55, %v473_v54 }
 0x876   :  { %v486_v59 = vsel %vm208_vm1, %v482_v56, %v484_v57  ;;  %v4667_v56 = vld [vmem:[#allocation7 + $0x1] ss:$0 sm:$0xff] }
 0x877   :  { %5141 = vmatmul.mubr.msk.f32.vlgmr.msra.gmra.mrb[2].mxu1 %vm106_vm2, %v486_v59  ;;  %v4669_v59 = vld [vmem:[#allocation8 + $0x1] ss:$0 sm:$0xff] }
 0x878   :  { %5170 = vmatprep.mubr.msk.f32.mxu1 %vm6571_vm0, %v6572_v1  ;;  %5768 = vmatpush3.bf16.msra.mxu1 %v5767_v50 }
 0x879   :  { %5769 = vmatprep.subr.bf16.mxu1 %v6570_v0 }
 0x87c   :  { %5771 = vmatpush3.bf16.msra.mxu1 %v5770_v52 }
 0x87d   :  { %5784 = vmatprep.subr.bf16.mxu1 %v6570_v0 }
 0x94a   :  { %v556_v60 = vpop.f32.mrb[2].mxu1 }
 0x94b   :  { %v557_v61 = vadd.f32 %v6731_v14, %v556_v60  ;;  %v5142_v62 = vpop.f32.mrb[3].mxu1 }
 0x94c   :  { %v4670_v62 = vld [vmem:[%s7866_s6 + $0x8] sm:$0xff] }
 0x94d   :  { %6142 = vtanh.f32 %v557_v61  ;;  %v4664_v2 = vmul.f32 -1.442695, %v557_v61 }
 0x94f   :  { %6144 = vpow2.f32 %v4664_v2 }
 0x957   :  { %v6143_v63 = vpop.eup %6142 }
 0x958   :  { %569 = vrot.lane.b32.xlu1 %v6143_v63, %s6573_s14 }
 0x959   :  { %v6145_v3 = vpop.eup %6144 }
 0x95a   :  { %v563_v4 = vadd.f32 1.0, %v6145_v3 }
 0x95c   :  { %6146 = vrcp.f32 %v563_v4 }
 0x966   :  { %v6147_v8 = vpop.eup %6146 }
 0x967   :  { %v567_v12 = vmul.f32 %v6147_v8, %v6736_v27 }
 0x9ca   :  { %v570_v9 = vpop.permute.xlu1 %569 }
 0x9cb   :  { %v572_v11 = vmul.f32 %v6147_v8, %v570_v9 }
 0x9cd   :  { %574 = vrot.lane.b32.xlu1 %v572_v11, %s6574_s15 }
 0xa3f   :  { %v575_v15 = vpop.permute.xlu1 %574 }
 0xa40   :  { %v6845_v16 = vadd.f32 %v575_v15, %v567_v12 }
 0xa42   :  { %6148 = vtanh.f32 %v6845_v16 }
 0xa4c   :  { %v6149_v17 = vpop.eup %6148 }
 0xa4d   :  { %580 = vrot.lane.b32.xlu0 %v6149_v17, %s6573_s14 }
 0xa51   :  { %588 = vrot.lane.b32.xlu0 %v6786_v6, %s6573_s14 }
 0xabf   :  { %v581_v19 = vpop.permute.xlu0 %580 }
 0xac0   :  { %v6851_v20 = vmul.f32 %v6147_v8, %v581_v19 }
 0xac2   :  { %585 = vrot.lane.b32.xlu1 %v6851_v20, %s6574_s15 }
 0xac3   :  { %v589_v22 = vpop.permute.xlu0 %588 }
 0xb34   :  { %v586_v23 = vpop.permute.xlu1 %585 }
 0xb35   :  { %v591_v27 = vsel %vm208_vm1, %v586_v23, %v589_v22  ;;  %v4671_v23 = vld [vmem:[%s7864_s4 + $0x8] sm:$0xff] }
 0xb36   :  { %5160 = vmatmul.mubr.msk.f32.vlgmr.msra.gmra.mrb[4].mxu0 %vm106_vm2, %v591_v27 }
 0xb37   :  { %5774 = vmatpush3.bf16.msra.mxu0 %v6709_v5  ;;  %5189 = vmatprep.mubr.msk.f32.mxu0 %vm6571_vm0, %v6572_v1 }
 0xb38   :  { %5775 = vmatprep.subr.bf16.mxu0 %v6570_v0 }
 0xb3b   :  { %5777 = vmatpush3.bf16.msra.mxu0 %v6712_v7 }
 0xb3c   :  { %5778 = vmatprep.subr.bf16.mxu0 %v6570_v0 }
 0xb3f   :  { %5780 = vmatpush3.bf16.msra.mxu0 %v6716_v10 }
 0xb40   :  { %5781 = vmatprep.subr.bf16.mxu0 %v6570_v0 }
 0xb43   :  { %5783 = vmatpush3.bf16.msra.mxu0 %v6720_v13 }
 0xb44   :  { %5796 = vmatprep.subr.bf16.mxu0 %v6570_v0 }
 0xc09   :  { %v661_v6 = vpop.f32.mrb[4].mxu0 }
 0xc0a   :  { %v662_v24 = vadd.f32 %v6775_v45, %v661_v6  ;;  %v5161_v25 = vpop.f32.mrb[5].mxu0 }
 0xc0b   :  { %v839_v25 = vrot.slane %v4671_v23, %v6818_v37 }
 0xc0c   :  { %6150 = vtanh.f32 %v662_v24  ;;  %v4666_v28 = vmul.f32 -1.442695, %v662_v24  ;;  %v830_v24 = vrot.slane %v4671_v23, %v6815_v35 }
 0xc0e   :  { %6152 = vpow2.f32 %v4666_v28 }
 0xc16   :  { %v6151_v26 = vpop.eup %6150 }
 0xc17   :  { %674 = vrot.lane.b32.xlu1 %v6151_v26, %s6573_s14  ;;  %v848_v26 = vrot.slane %v4671_v23, %v6824_v44 }
 0xc18   :  { %v6153_v29 = vpop.eup %6152 }
 0xc19   :  { %v668_v30 = vadd.f32 1.0, %v6153_v29 }
 0xc1b   :  { %6154 = vrcp.f32 %v668_v30 }
 0xc25   :  { %v6155_v34 = vpop.eup %6154 }
 0xc26   :  { %v672_v41 = vmul.f32 %v6155_v34, %v6780_v58 }
 0xc89   :  { %v675_v38 = vpop.permute.xlu1 %674 }
 0xc8a   :  { %v677_v39 = vmul.f32 %v6155_v34, %v675_v38 }
 0xc8c   :  { %679 = vrot.lane.b32.xlu0 %v677_v39, %s6574_s15 }
 0xcfe   :  { %v680_v43 = vpop.permute.xlu0 %679 }
 0xcff   :  { %v6871_v46 = vadd.f32 %v680_v43, %v672_v41 }
 0xd01   :  { %6156 = vtanh.f32 %v6871_v46 }
 0xd0b   :  { %v6157_v53 = vpop.eup %6156 }
 0xd0c   :  { %685 = vrot.lane.b32.xlu1 %v6157_v53, %s6573_s14 }
 0xd7e   :  { %v686_v58 = vpop.permute.xlu1 %685 }
 0xd7f   :  { %v6877_v54 = vmul.f32 %v6155_v34, %v686_v58 }
 0xd81   :  { %703 = vrot.lane.b32.xlu0 %v6877_v54, %s6574_s15 }
 0xdf3   :  { %v704_v55 = vpop.permute.xlu0 %703 }
 0xdf4   :  { %5171 = vmatmul.mubr.msk.f32.vlgmr.msra.gmra.mrb[4].mxu1 %vm208_vm1, %v704_v55 }
 0xdf5   :  { %5786 = vmatpush3.bf16.msra.mxu1 %v6739_v31  ;;  %5208 = vmatprep.mubr.msk.f32.mxu1 %vm6571_vm0, %v6572_v1 }
 0xdf6   :  { %5787 = vmatprep.subr.bf16.mxu1 %v6570_v0 }
 0xdf9   :  { %5789 = vmatpush3.bf16.msra.mxu1 %v6742_v33 }
 0xdfa   :  { %5790 = vmatprep.subr.bf16.mxu1 %v6570_v0 }
 0xdfd   :  { %5792 = vmatpush3.bf16.msra.mxu1 %v6746_v36 }
 0xdfe   :  { %5793 = vmatprep.subr.bf16.mxu1 %v6570_v0 }
 0xe01   :  { %5795 = vmatpush3.bf16.msra.mxu1 %v6751_v40 }
 0xe02   :  { %5802 = vmatprep.subr.bf16.mxu1 %v6570_v0 }
 0xec7   :  { %v773_v57 = vpop.f32.mrb[4].mxu1 }
 0xec8   :  { %v774_v60 = vadd.f32 %v4667_v56, %v773_v57  ;;  %v5172_v61 = vpop.f32.mrb[5].mxu1 }
 0xeca   :  { %v6895_v63 = vadd.f32 %v4669_v59, %v774_v60 }
 0xecc   :  { %v788_v2 = vadd.f32 %v4670_v62, %v6895_v63 }
 0xece   :  { %789 = vmax.xlane.f32.xlu1 %v788_v2 }
 0xedf   :  { %851 = vrot.lane.b32.xlu1 %v6851_v20, %s6573_s14 }
 0xf5b   :  { %v790_v3 = vpop.xlane.xlu1 %789 }
 0xf5c   :  { %vm791_vm8 = vcmp.ge.f32.partialorder %v788_v2, %v790_v3 }
 0xf5d   :  { %v792_v4 = vsel %vm791_vm8, %v6807_v21, 128  ;;  %vm1950_vm8 = vcmask 23552  }
 0xf5e   :  { %v794_v8 = vshra.s32 %v792_v4, 16  ;;  %v793_v11 = vand.u32 65535, %v792_v4 }
 0xf5f   :  { %v852_v47 = vpop.permute.xlu1 %851 }
 0xf60   :  { %v796_v9 = vcvt.s32.f32 %v794_v8  ;;  %v795_v15 = vcvt.s32.f32 %v793_v11 }
 0xf62   :  { %797 = vmin.xlane.f32.xlu0 %v796_v9 }
 0xfef   :  { %v798_v12 = vpop.xlane.xlu0 %797 }
 0xff0   :  { %vm799_vm9 = vcmp.eq.f32.partialorder %v796_v9, %v798_v12  ;;  %v804_v19 = vcvt.f32.s32 %v798_v12 }
 0xff1   :  { %v800_v17 = vsel %vm799_vm9, %v795_v15, inf }
 0xff2   :  { %801 = vmin.xlane.f32.xlu0 %v800_v17  ;;  %v805_v20 = vshll.u32 %v804_v19, 16 }
0x107f   :  { %v802_v22 = vpop.xlane.xlu0 %801 }
0x1080   :  { %v803_v27 = vcvt.f32.s32 %v802_v22 }
0x1082   :  { %v6904_v6 = vadd.s32 %v805_v20, %v803_v27 }
0x1084   :  { %vm824_vm10 = vcmp.eq.s32.totalorder %v6904_v6, 0  ;;  %vm833_vm11 = vcmp.eq.s32.totalorder %v6904_v6, 1  ;;  %vm842_vm12 = vcmp.eq.s32.totalorder %v6904_v6, 2 }
0x1085   :  { %v4672_v28 = vsel %vm824_vm10, 1.0, %v6572_v1  ;;  %v4673_v29 = vsel %vm833_vm11, 1.0, %v6572_v1  ;;  %v4674_v30 = vsel %vm842_vm12, 1.0, %v6572_v1 }
0x1086   :  { %v831_v34 = vmul.f32 %v4672_v28, %v830_v24  ;;  %v840_v38 = vmul.f32 %v4673_v29, %v839_v25  ;;  %v849_v41 = vmul.f32 %v4674_v30, %v848_v26  ;;  %v1058_v28 = vld [vmem:[#allocation5 + $0x40] sm:$0xff]  ;;  %v1059_v29 = vld [vmem:[#allocation5 + $0x48] sm:$0xff]  ;;  %v1060_v30 = vld [vmem:[#allocation5 + $0x50] sm:$0xff] }
0x1088   :  { %v841_v39 = vadd.f32 %v840_v38, %v831_v34  ;;  %v5797_v34 = vpack.c.bf16 %v1059_v29, %v1058_v28  ;;  %v1061_v38 = vld [vmem:[#allocation5 + $0x58] sm:$0xff] }
0x108a   :  { %v850_v43 = vadd.f32 %v849_v41, %v841_v39  ;;  %v5800_v39 = vpack.c.bf16 %v1061_v38, %v1060_v30 }
0x108c   :  { %v854_v48 = vsel %vm208_vm1, %v850_v43, %v852_v47 }
0x108d   :  { %5190 = vmatmul.mubr.msk.f32.vlgmr.msra.gmra.mrb[6].mxu0 %vm106_vm2, %v854_v48  ;;  %v4679_v48 = vld [vmem:[#allocation7 + $0x2] ss:$0 sm:$0xff] }
0x108e   :  { %5219 = vmatprep.mubr.msk.f32.mxu0 %vm6571_vm0, %v6572_v1  ;;  %5798 = vmatpush3.bf16.msra.mxu0 %v5797_v34 }
0x108f   :  { %5799 = vmatprep.subr.bf16.mxu0 %v6570_v0 }
0x1092   :  { %5801 = vmatpush3.bf16.msra.mxu0 %v5800_v39 }
0x1093   :  { %5814 = vmatprep.subr.bf16.mxu0 %v6570_v0 }
0x1160   :  { %v924_v49 = vpop.f32.mrb[6].mxu0 }
0x1161   :  { %v925_v50 = vadd.f32 %v6731_v14, %v924_v49  ;;  %v5191_v51 = vpop.f32.mrb[7].mxu0 }
0x1163   :  { %6158 = vtanh.f32 %v925_v50  ;;  %v4676_v53 = vmul.f32 -1.442695, %v925_v50  ;;  %v4681_v50 = vld [vmem:[#allocation8 + $0x2] ss:$0 sm:$0xff] }
0x1165   :  { %6160 = vpow2.f32 %v4676_v53  ;;  %v4682_v53 = vld [vmem:[%s7866_s6 + $0x10] sm:$0xff] }
0x116d   :  { %v6159_v52 = vpop.eup %6158 }
0x116e   :  { %937 = vrot.lane.b32.xlu0 %v6159_v52, %s6573_s14 }
0x116f   :  { %v6161_v58 = vpop.eup %6160 }
0x1170   :  { %v931_v55 = vadd.f32 1.0, %v6161_v58 }
0x1172   :  { %6162 = vrcp.f32 %v931_v55 }
0x117c   :  { %v6163_v56 = vpop.eup %6162 }
0x117d   :  { %v935_v60 = vmul.f32 %v6163_v56, %v6845_v16 }
0x11e0   :  { %v938_v57 = vpop.permute.xlu0 %937 }
0x11e1   :  { %v940_v59 = vmul.f32 %v6163_v56, %v938_v57 }
0x11e3   :  { %942 = vrot.lane.b32.xlu1 %v940_v59, %s6574_s15 }
0x1255   :  { %v943_v61 = vpop.permute.xlu1 %942 }
0x1256   :  { %v6923_v62 = vadd.f32 %v943_v61, %v935_v60 }
0x1258   :  { %6164 = vtanh.f32 %v6923_v62 }
0x1262   :  { %v6165_v2 = vpop.eup %6164 }
0x1263   :  { %948 = vrot.lane.b32.xlu1 %v6165_v2, %s6573_s14 }
0x1267   :  { %956 = vrot.lane.b32.xlu1 %v6877_v54, %s6573_s14 }
0x12d5   :  { %v949_v3 = vpop.permute.xlu1 %948 }
0x12d6   :  { %v6929_v4 = vmul.f32 %v6163_v56, %v949_v3 }
0x12d8   :  { %953 = vrot.lane.b32.xlu0 %v6929_v4, %s6574_s15 }
0x12d9   :  { %v957_v8 = vpop.permute.xlu1 %956 }
0x134a   :  { %v954_v9 = vpop.permute.xlu0 %953 }
0x134b   :  { %v959_v16 = vsel %vm208_vm1, %v954_v9, %v957_v8 }
0x134c   :  { %5209 = vmatmul.mubr.msk.f32.vlgmr.msra.gmra.mrb[6].mxu1 %vm106_vm2, %v959_v16 }
0x134d   :  { %5804 = vmatpush3.bf16.msra.mxu1 %v6709_v5  ;;  %5238 = vmatprep.mubr.msk.f32.mxu1 %vm6571_vm0, %v6572_v1 }
0x134e   :  { %5805 = vmatprep.subr.bf16.mxu1 %v6570_v0 }
0x1351   :  { %5807 = vmatpush3.bf16.msra.mxu1 %v6712_v7 }
0x1352   :  { %5808 = vmatprep.subr.bf16.mxu1 %v6570_v0 }
0x1355   :  { %5810 = vmatpush3.bf16.msra.mxu1 %v6716_v10 }
0x1356   :  { %5811 = vmatprep.subr.bf16.mxu1 %v6570_v0 }
0x1359   :  { %5813 = vmatpush3.bf16.msra.mxu1 %v6720_v13 }
0x135a   :  { %5826 = vmatprep.subr.bf16.mxu1 %v6570_v0 }
0x141f   :  { %v1029_v54 = vpop.f32.mrb[6].mxu1 }
0x1420   :  { %v1030_v11 = vadd.f32 %v6775_v45, %v1029_v54  ;;  %v5210_v12 = vpop.f32.mrb[7].mxu1  ;;  %v4683_v54 = vld [vmem:[%s7864_s4 + $0x10] sm:$0xff] }
0x1422   :  { %6166 = vtanh.f32 %v1030_v11  ;;  %v4678_v17 = vmul.f32 -1.442695, %v1030_v11 }
0x1424   :  { %6168 = vpow2.f32 %v4678_v17  ;;  %v1198_v17 = vrot.slane %v4683_v54, %v6815_v35 }
0x142c   :  { %v6167_v15 = vpop.eup %6166 }
0x142d   :  { %1042 = vrot.lane.b32.xlu0 %v6167_v15, %s6573_s14 }
0x142e   :  { %v6169_v19 = vpop.eup %6168 }
0x142f   :  { %v1036_v22 = vadd.f32 1.0, %v6169_v19  ;;  %v1207_v19 = vrot.slane %v4683_v54, %v6818_v37 }
0x1431   :  { %6170 = vrcp.f32 %v1036_v22 }
0x143b   :  { %v6171_v23 = vpop.eup %6170 }
0x143c   :  { %v1040_v24 = vmul.f32 %v6171_v23, %v6871_v46 }
0x149f   :  { %v1043_v20 = vpop.permute.xlu0 %1042 }
0x14a0   :  { %v1045_v27 = vmul.f32 %v6171_v23, %v1043_v20 }
0x14a2   :  { %1047 = vrot.lane.b32.xlu1 %v1045_v27, %s6574_s15 }
0x1514   :  { %v1048_v25 = vpop.permute.xlu1 %1047 }
0x1515   :  { %v6949_v26 = vadd.f32 %v1048_v25, %v1040_v24 }
0x1517   :  { %6172 = vtanh.f32 %v6949_v26 }
0x1521   :  { %v6173_v41 = vpop.eup %6172 }
0x1522   :  { %1053 = vrot.lane.b32.xlu0 %v6173_v41, %s6573_s14 }
0x1594   :  { %v1054_v46 = vpop.permute.xlu0 %1053 }
0x1595   :  { %v6955_v43 = vmul.f32 %v6171_v23, %v1054_v46 }
0x1597   :  { %1071 = vrot.lane.b32.xlu1 %v6955_v43, %s6574_s15 }
0x1609   :  { %v1072_v47 = vpop.permute.xlu1 %1071 }
0x160a   :  { %5220 = vmatmul.mubr.msk.f32.vlgmr.msra.gmra.mrb[8].mxu0 %vm208_vm1, %v1072_v47 }
0x160b   :  { %5816 = vmatpush3.bf16.msra.mxu0 %v6739_v31  ;;  %5257 = vmatprep.mubr.msk.f32.mxu0 %vm6571_vm0, %v6572_v1 }
0x160c   :  { %5817 = vmatprep.subr.bf16.mxu0 %v6570_v0 }
0x160f   :  { %5819 = vmatpush3.bf16.msra.mxu0 %v6742_v33 }
0x1610   :  { %5820 = vmatprep.subr.bf16.mxu0 %v6570_v0 }
0x1613   :  { %5822 = vmatpush3.bf16.msra.mxu0 %v6746_v36 }
0x1614   :  { %5823 = vmatprep.subr.bf16.mxu0 %v6570_v0 }
0x1617   :  { %5825 = vmatpush3.bf16.msra.mxu0 %v6751_v40 }
0x1618   :  { %5832 = vmatprep.subr.bf16.mxu0 %v6570_v0 }
0x16dd   :  { %v1141_v49 = vpop.f32.mrb[8].mxu0 }
0x16de   :  { %v1142_v51 = vadd.f32 %v4679_v48, %v1141_v49  ;;  %v5221_v52 = vpop.f32.mrb[9].mxu0 }
0x16e0   :  { %v6973_v58 = vadd.f32 %v4681_v50, %v1142_v51 }
0x16e2   :  { %v1156_v55 = vadd.f32 %v4682_v53, %v6973_v58 }
0x16e4   :  { %1157 = vmax.xlane.f32.xlu0 %v1156_v55 }
0x1771   :  { %v1158_v56 = vpop.xlane.xlu0 %1157 }
0x1772   :  { %vm1159_vm13 = vcmp.ge.f32.partialorder %v1156_v55, %v1158_v56 }
0x1773   :  { %v1160_v57 = vsel %vm1159_vm13, %v6807_v21, 128  ;;  %vm1952_vm13 = vcmask 31744  }
0x1774   :  { %v1162_v59 = vshra.s32 %v1160_v57, 16  ;;  %v1161_v61 = vand.u32 65535, %v1160_v57 }
0x1776   :  { %v1164_v60 = vcvt.s32.f32 %v1162_v59  ;;  %v1163_v3 = vcvt.s32.f32 %v1161_v61 }
0x1778   :  { %1165 = vmin.xlane.f32.xlu1 %v1164_v60 }
0x1805   :  { %v1166_v2 = vpop.xlane.xlu1 %1165 }
0x1806   :  { %vm1167_vm14 = vcmp.eq.f32.partialorder %v1164_v60, %v1166_v2  ;;  %v1172_v9 = vcvt.f32.s32 %v1166_v2 }
0x1807   :  { %v1168_v8 = vsel %vm1167_vm14, %v1163_v3, inf }
0x1808   :  { %1169 = vmin.xlane.f32.xlu0 %v1168_v8  ;;  %v1173_v11 = vshll.u32 %v1172_v9, 16 }
0x181e   :  { %1210 = vrot.lane.b32.xlu0 %v6929_v4, %s6573_s14  ;;  %v1947_v4 = vsel %vm1946_vm15, %v6826_v42, %v6904_v6 }
0x1895   :  { %v1170_v16 = vpop.xlane.xlu0 %1169 }
0x1896   :  { %v1171_v12 = vcvt.f32.s32 %v1170_v16 }
0x1898   :  { %v6982_v15 = vadd.s32 %v1173_v11, %v1171_v12  ;;  %v1418_v11 = vld [vmem:[#allocation5 + $0x68] sm:$0xff]  ;;  %v1419_v12 = vld [vmem:[#allocation5 + $0x70] sm:$0xff] }
0x1899   :  { %v1211_v28 = vpop.permute.xlu0 %1210 }
0x189a   :  { %vm1192_vm4 = vcmp.eq.s32.totalorder %v6982_v15, 0  ;;  %vm1201_vm5 = vcmp.eq.s32.totalorder %v6982_v15, 1  ;;  %v6993_v22 = vsel %vm1948_vm3, %v1947_v4, %v6982_v15 }
0x189b   :  { %v4684_v23 = vsel %vm1192_vm4, 1.0, %v6572_v1  ;;  %v4685_v20 = vsel %vm1201_vm5, 1.0, %v6572_v1 }
0x189c   :  { %v1199_v27 = vmul.f32 %v4684_v23, %v1198_v17  ;;  %v1208_v24 = vmul.f32 %v4685_v20, %v1207_v19  ;;  %v1420_v19 = vld [vmem:[#allocation5 + $0x78] sm:$0xff] }
0x189d   :  { %v5830_v4 = vpack.c.bf16 %v1420_v19, %v1419_v12 }
0x189e   :  { %v1209_v25 = vadd.f32 %v1208_v24, %v1199_v27  ;;  %v4690_v24 = vld [vmem:[#allocation7 + $0x3] ss:$0 sm:$0xff] }
0x18a0   :  { %v1213_v29 = vsel %vm208_vm1, %v1209_v25, %v1211_v28 }
0x18a1   :  { %5239 = vmatmul.mubr.msk.f32.vlgmr.msra.gmra.mrb[8].mxu1 %vm106_vm2, %v1213_v29 }
0x18a2   :  { %5268 = vmatprep.mubr.msk.f32.mxu1 %vm6571_vm0, %v6572_v1 }
0x1974   :  { %v1283_v30 = vpop.f32.mrb[8].mxu1 }
0x1975   :  { %v1284_v34 = vadd.f32 %v6731_v14, %v1283_v30  ;;  %v5240_v38 = vpop.f32.mrb[9].mxu1  ;;  %v4693_v30 = vld [vmem:[%s7866_s6 + $0x18] sm:$0xff] }
0x1977   :  { %6174 = vtanh.f32 %v1284_v34  ;;  %v4687_v41 = vmul.f32 -1.442695, %v1284_v34 }
0x1979   :  { %6176 = vpow2.f32 %v4687_v41 }
0x1981   :  { %v6175_v39 = vpop.eup %6174 }
0x1982   :  { %1296 = vrot.lane.b32.xlu1 %v6175_v39, %s6573_s14 }
0x1983   :  { %v6177_v46 = vpop.eup %6176 }
0x1984   :  { %v1290_v47 = vadd.f32 1.0, %v6177_v46 }
0x1986   :  { %6178 = vrcp.f32 %v1290_v47 }
0x1990   :  { %v6179_v48 = vpop.eup %6178 }
0x1991   :  { %v1294_v51 = vmul.f32 %v6179_v48, %v6923_v62 }
0x19f4   :  { %v1297_v49 = vpop.permute.xlu1 %1296 }
0x19f5   :  { %v1299_v50 = vmul.f32 %v6179_v48, %v1297_v49 }
0x19f7   :  { %1301 = vrot.lane.b32.xlu1 %v1299_v50, %s6574_s15 }
0x1a69   :  { %v1302_v52 = vpop.permute.xlu1 %1301 }
0x1a6a   :  { %v7005_v53 = vadd.f32 %v1302_v52, %v1294_v51  ;;  %v4694_v51 = vld [vmem:[%s7864_s4 + $0x18] sm:$0xff] }
0x1a6c   :  { %6180 = vtanh.f32 %v7005_v53 }
0x1a76   :  { %v6181_v14 = vpop.eup %6180 }
0x1a77   :  { %1307 = vrot.lane.b32.xlu0 %v6181_v14, %s6573_s14 }
0x1a7b   :  { %1315 = vrot.lane.b32.xlu0 %v6955_v43, %s6573_s14 }
0x1ae9   :  { %v1308_v55 = vpop.permute.xlu0 %1307 }
0x1aea   :  { %v7011_v56 = vmul.f32 %v6179_v48, %v1308_v55 }
0x1aec   :  { %1312 = vrot.lane.b32.xlu1 %v7011_v56, %s6574_s15 }
0x1aed   :  { %v1316_v57 = vpop.permute.xlu0 %1315 }
0x1b5e   :  { %v1313_v59 = vpop.permute.xlu1 %1312 }
0x1b5f   :  { %v1318_v62 = vsel %vm208_vm1, %v1313_v59, %v1316_v57  ;;  %v1566_v57 = vrot.slane %v4694_v51, %v6818_v37 }
0x1b60   :  { %5258 = vmatmul.mubr.msk.f32.vlgmr.msra.gmra.mrb[10].mxu0 %vm106_vm2, %v1318_v62 }
0x1b61   :  { %5834 = vmatpush3.bf16.msra.mxu0 %v6709_v5  ;;  %5287 = vmatprep.mubr.msk.f32.mxu0 %vm6571_vm0, %v6572_v1 }
0x1b62   :  { %5835 = vmatprep.subr.bf16.mxu0 %v6570_v0 }
0x1b65   :  { %5837 = vmatpush3.bf16.msra.mxu0 %v6712_v7 }
0x1b66   :  { %5838 = vmatprep.subr.bf16.mxu0 %v6570_v0 }
0x1b69   :  { %5840 = vmatpush3.bf16.msra.mxu0 %v6716_v10 }
0x1b6a   :  { %5841 = vmatprep.subr.bf16.mxu0 %v6570_v0 }
0x1b6d   :  { %5843 = vmatpush3.bf16.msra.mxu0 %v6720_v13 }
0x1b6e   :  { %5856 = vmatprep.subr.bf16.mxu0 %v6570_v0 }
0x1c33   :  { %v1388_v43 = vpop.f32.mrb[10].mxu0 }
0x1c34   :  { %v1389_v5 = vadd.f32 %v6775_v45, %v1388_v43  ;;  %v5259_v60 = vpop.f32.mrb[11].mxu0  ;;  %v1417_v45 = vld [vmem:[#allocation5 + $0x60] sm:$0xff] }
0x1c35   :  { %v5827_v17 = vpack.c.bf16 %v1418_v11, %v1417_v45 }
0x1c36   :  { %6182 = vtanh.f32 %v1389_v5  ;;  %v4689_v2 = vmul.f32 -1.442695, %v1389_v5 }
0x1c37   :  { %5828 = vmatpush3.bf16.msra.mxu1 %v5827_v17 }
0x1c38   :  { %6184 = vpow2.f32 %v4689_v2  ;;  %5829 = vmatprep.subr.bf16.mxu1 %v6570_v0 }
0x1c3b   :  { %5831 = vmatpush3.bf16.msra.mxu1 %v5830_v4 }
0x1c3c   :  { %5844 = vmatprep.subr.bf16.mxu1 %v6570_v0 }
0x1c40   :  { %v6183_v61 = vpop.eup %6182 }
0x1c41   :  { %1401 = vrot.lane.b32.xlu1 %v6183_v61, %s6573_s14 }
0x1c42   :  { %v6185_v7 = vpop.eup %6184 }
0x1c43   :  { %v1395_v3 = vadd.f32 1.0, %v6185_v7 }
0x1c45   :  { %6186 = vrcp.f32 %v1395_v3 }
0x1c4f   :  { %v6187_v10 = vpop.eup %6186 }
0x1c50   :  { %v1399_v13 = vmul.f32 %v6187_v10, %v6949_v26 }
0x1cb3   :  { %v1402_v8 = vpop.permute.xlu1 %1401 }
0x1cb4   :  { %v1404_v9 = vmul.f32 %v6187_v10, %v1402_v8 }
0x1cb6   :  { %1406 = vrot.lane.b32.xlu0 %v1404_v9, %s6574_s15 }
0x1d28   :  { %v1407_v16 = vpop.permute.xlu0 %1406 }
0x1d29   :  { %v7031_v54 = vadd.f32 %v1407_v16, %v1399_v13 }
0x1d2b   :  { %6188 = vtanh.f32 %v7031_v54 }
0x1d35   :  { %v6189_v23 = vpop.eup %6188 }
0x1d36   :  { %1412 = vrot.lane.b32.xlu1 %v6189_v23, %s6573_s14 }
0x1da8   :  { %v1413_v26 = vpop.permute.xlu1 %1412 }
0x1da9   :  { %v7037_v20 = vmul.f32 %v6187_v10, %v1413_v26 }
0x1dab   :  { %1430 = vrot.lane.b32.xlu0 %v7037_v20, %s6574_s15 }
0x1e1d   :  { %v1431_v27 = vpop.permute.xlu0 %1430 }
0x1e1e   :  { %5269 = vmatmul.mubr.msk.f32.vlgmr.msra.gmra.mrb[10].mxu1 %vm208_vm1, %v1431_v27 }
0x1e1f   :  { %5846 = vmatpush3.bf16.msra.mxu1 %v6739_v31  ;;  %5306 = vmatprep.mubr.msk.f32.mxu1 %vm6571_vm0, %v6572_v1  ;;  %v4692_v31 = vld [vmem:[#allocation8 + $0x3] ss:$0 sm:$0xff] }
0x1e20   :  { %5847 = vmatprep.subr.bf16.mxu1 %v6570_v0 }
0x1e23   :  { %5849 = vmatpush3.bf16.msra.mxu1 %v6742_v33 }
0x1e24   :  { %5850 = vmatprep.subr.bf16.mxu1 %v6570_v0 }
0x1e27   :  { %5852 = vmatpush3.bf16.msra.mxu1 %v6746_v36 }
0x1e28   :  { %5853 = vmatprep.subr.bf16.mxu1 %v6570_v0 }
0x1e2b   :  { %5855 = vmatpush3.bf16.msra.mxu1 %v6751_v40 }
0x1e2c   :  { %5862 = vmatprep.subr.bf16.mxu1 %v6570_v0 }
0x1ef1   :  { %v1500_v25 = vpop.f32.mrb[10].mxu1 }
0x1ef2   :  { %v1501_v28 = vadd.f32 %v4690_v24, %v1500_v25  ;;  %v5270_v29 = vpop.f32.mrb[11].mxu1 }
0x1ef4   :  { %v7055_v33 = vadd.f32 %v4692_v31, %v1501_v28 }
0x1ef6   :  { %v1515_v34 = vadd.f32 %v4693_v30, %v7055_v33 }
0x1ef8   :  { %1516 = vmax.xlane.f32.xlu1 %v1515_v34 }
0x1f09   :  { %1569 = vrot.lane.b32.xlu1 %v7011_v56, %s6573_s14  ;;  %v1557_v56 = vrot.slane %v4694_v51, %v6815_v35  ;;  %v1777_v51 = vld [vmem:[#allocation5 + $0x88] sm:$0xff] }
0x1f85   :  { %v1517_v36 = vpop.xlane.xlu1 %1516 }
0x1f86   :  { %vm1518_vm6 = vcmp.ge.f32.partialorder %v1515_v34, %v1517_v36 }
0x1f87   :  { %v1519_v40 = vsel %vm1518_vm6, %v6807_v21, 128 }
0x1f88   :  { %v1521_v38 = vshra.s32 %v1519_v40, 16  ;;  %v1520_v41 = vand.u32 65535, %v1519_v40 }
0x1f89   :  { %v1570_v2 = vpop.permute.xlu1 %1569 }
0x1f8a   :  { %v1523_v39 = vcvt.s32.f32 %v1521_v38  ;;  %v1522_v47 = vcvt.s32.f32 %v1520_v41 }
0x1f8c   :  { %1524 = vmin.xlane.f32.xlu0 %v1523_v39 }
0x2019   :  { %v1525_v46 = vpop.xlane.xlu0 %1524 }
0x201a   :  { %vm1526_vm7 = vcmp.eq.f32.partialorder %v1523_v39, %v1525_v46  ;;  %v1531_v49 = vcvt.f32.s32 %v1525_v46 }
0x201b   :  { %v1527_v48 = vsel %vm1526_vm7, %v1522_v47, inf  ;;  %vm1954_vm7 = vcmask 39936  }
0x201c   :  { %1528 = vmin.xlane.f32.xlu0 %v1527_v48  ;;  %v1532_v52 = vshll.u32 %v1531_v49, 16 }
0x20a9   :  { %v1529_v50 = vpop.xlane.xlu0 %1528 }
0x20aa   :  { %v1530_v14 = vcvt.f32.s32 %v1529_v50  ;;  %v1776_v50 = vld [vmem:[#allocation5 + $0x80] sm:$0xff] }
0x20ac   :  { %v7064_v55 = vadd.s32 %v1532_v52, %v1530_v14  ;;  %v1778_v52 = vld [vmem:[#allocation5 + $0x90] sm:$0xff]  ;;  %v5857_v14 = vpack.c.bf16 %v1777_v51, %v1776_v50 }
0x20ae   :  { %vm1551_vm9 = vcmp.eq.s32.totalorder %v7064_v55, 0  ;;  %vm1560_vm10 = vcmp.eq.s32.totalorder %v7064_v55, 1  ;;  %v7073_v59 = vsel %vm1950_vm8, %v6993_v22, %v7064_v55  ;;  %v6370_v22 = vld [vmem:[%s7861_s1] ss:$0 sm:$0xff] }
0x20af   :  { %v4695_v62 = vsel %vm1551_vm9, 1.0, %v6572_v1  ;;  %v4696_v43 = vsel %vm1560_vm10, 1.0, %v6572_v1  ;;  %vm1186_vm9 = vcmp.eq.s32.totalorder %v6807_v21, %v6982_v15 }
0x20b0   :  { %v1558_v5 = vmul.f32 %v4695_v62, %v1557_v56  ;;  %v1567_v60 = vmul.f32 %v4696_v43, %v1566_v57  ;;  %v1779_v56 = vld [vmem:[#allocation5 + $0x98] sm:$0xff] }
0x20b1   :  { %v5860_v57 = vpack.c.bf16 %v1779_v56, %v1778_v52 }
0x20b2   :  { %v1568_v61 = vadd.f32 %v1567_v60, %v1558_v5  ;;  %v4701_v60 = vld [vmem:[#allocation7 + $0x4] ss:$0 sm:$0xff] }
0x20b4   :  { %v1572_v7 = vsel %vm208_vm1, %v1568_v61, %v1570_v2  ;;  %v4703_v2 = vld [vmem:[#allocation8 + $0x4] ss:$0 sm:$0xff] }
0x20b5   :  { %5288 = vmatmul.mubr.msk.f32.vlgmr.msra.gmra.mrb[12].mxu0 %vm106_vm2, %v1572_v7 }
0x20b6   :  { %5317 = vmatprep.mubr.msk.f32.mxu0 %vm6571_vm0, %v6572_v1  ;;  %5858 = vmatpush3.bf16.msra.mxu0 %v5857_v14 }
0x20b7   :  { %5859 = vmatprep.subr.bf16.mxu0 %v6570_v0 }
0x20ba   :  { %5861 = vmatpush3.bf16.msra.mxu0 %v5860_v57 }
0x20bb   :  { %5874 = vmatprep.subr.bf16.mxu0 %v6570_v0 }
0x2188   :  { %v1642_v3 = vpop.f32.mrb[12].mxu0 }
0x2189   :  { %v1643_v10 = vadd.f32 %v6370_v22, %v1642_v3  ;;  %v5289_v8 = vpop.f32.mrb[13].mxu0  ;;  %v4704_v22 = vld [vmem:[%s7866_s6 + $0x20] sm:$0xff] }
0x218b   :  { %6190 = vtanh.f32 %v1643_v10  ;;  %v4698_v13 = vmul.f32 -1.442695, %v1643_v10 }
0x218d   :  { %6192 = vpow2.f32 %v4698_v13 }
0x2195   :  { %v6191_v9 = vpop.eup %6190 }
0x2196   :  { %1655 = vrot.lane.b32.xlu0 %v6191_v9, %s6573_s14 }
0x2197   :  { %v6193_v16 = vpop.eup %6192 }
0x2198   :  { %v1649_v45 = vadd.f32 1.0, %v6193_v16 }
0x219a   :  { %6194 = vrcp.f32 %v1649_v45 }
0x21a4   :  { %v6195_v11 = vpop.eup %6194 }
0x21a5   :  { %v1653_v19 = vmul.f32 %v6195_v11, %v7005_v53 }
0x2208   :  { %v1656_v12 = vpop.permute.xlu0 %1655 }
0x2209   :  { %v1658_v17 = vmul.f32 %v6195_v11, %v1656_v12 }
0x220b   :  { %1660 = vrot.lane.b32.xlu1 %v1658_v17, %s6574_s15 }
0x227d   :  { %v1661_v4 = vpop.permute.xlu1 %1660 }
0x227e   :  { %v7087_v23 = vadd.f32 %v1661_v4, %v1653_v19  ;;  %v1965_v4 = vld [vmem:[#allocation2] sm:$0xff] }
0x2280   :  { %6196 = vtanh.f32 %v7087_v23 }
0x228a   :  { %v6197_v26 = vpop.eup %6196 }
0x228b   :  { %1666 = vrot.lane.b32.xlu1 %v6197_v26, %s6573_s14  ;;  %v1966_v26 = vld [vmem:[#allocation2 + $0x8] sm:$0xff] }
0x228f   :  { %1674 = vrot.lane.b32.xlu1 %v7037_v20, %s6573_s14  ;;  %v6371_v20 = vld [vmem:[%s7861_s1 + $0x1] ss:$0 sm:$0xff] }
0x22fd   :  { %v1667_v27 = vpop.permute.xlu1 %1666 }
0x22fe   :  { %v7093_v24 = vmul.f32 %v6195_v11, %v1667_v27  ;;  %v7127_v27 = vpack.c.bf16 %v1966_v26, %v1965_v4 }
0x2300   :  { %1671 = vrot.lane.b32.xlu0 %v7093_v24, %s6574_s15 }
0x2301   :  { %v1675_v25 = vpop.permute.xlu1 %1674 }
0x2372   :  { %v1672_v31 = vpop.permute.xlu0 %1671 }
0x2373   :  { %v1677_v53 = vsel %vm208_vm1, %v1672_v31, %v1675_v25  ;;  %v1967_v25 = vld [vmem:[#allocation2 + $0x10] sm:$0xff]  ;;  %v1968_v31 = vld [vmem:[#allocation2 + $0x18] sm:$0xff] }
0x2374   :  { %5307 = vmatmul.mubr.msk.f32.vlgmr.msra.gmra.mrb[12].mxu1 %vm106_vm2, %v1677_v53  ;;  %v7131_v53 = vpack.c.bf16 %v1968_v31, %v1967_v25  ;;  %v2085_v25 = vld [vmem:[#allocation2 + $0x40] sm:$0xff]  ;;  %v2086_v31 = vld [vmem:[#allocation2 + $0x48] sm:$0xff] }
0x2375   :  { %5336 = vmatprep.mubr.msk.f32.mxu1 %vm6571_vm0, %v6572_v1  ;;  %5864 = vmatpush3.bf16.msra.mxu1 %v7127_v27 }
0x2376   :  { %5865 = vmatprep.subr.bf16.mxu1 %v6570_v0 }
0x2379   :  { %5867 = vmatpush3.bf16.msra.mxu1 %v7131_v53 }
0x237a   :  { %5868 = vmatprep.subr.bf16.mxu1 %v6570_v0 }
0x2447   :  { %v1747_v28 = vpop.f32.mrb[12].mxu1 }
0x2448   :  { %v1748_v29 = vadd.f32 %v6371_v20, %v1747_v28  ;;  %v5308_v30 = vpop.f32.mrb[13].mxu1  ;;  %v1969_v28 = vld [vmem:[#allocation2 + $0x20] sm:$0xff]  ;;  %v1970_v20 = vld [vmem:[#allocation2 + $0x28] sm:$0xff] }
0x2449   :  { %v1971_v30 = vld [vmem:[#allocation2 + $0x30] sm:$0xff] }
0x244a   :  { %6198 = vtanh.f32 %v1748_v29  ;;  %v4700_v36 = vmul.f32 -1.442695, %v1748_v29  ;;  %v7135_v29 = vpack.c.bf16 %v1970_v20, %v1969_v28  ;;  %v2087_v28 = vld [vmem:[#allocation2 + $0x50] sm:$0xff]  ;;  %v7185_v20 = vpack.c.bf16 %v2086_v31, %v2085_v25 }
0x244c   :  { %6200 = vpow2.f32 %v4700_v36  ;;  %5870 = vmatpush3.bf16.msra.mxu1 %v7135_v29 }
0x244d   :  { %5871 = vmatprep.subr.bf16.mxu1 %v6570_v0 }
0x2454   :  { %v6199_v34 = vpop.eup %6198 }
0x2455   :  { %1760 = vrot.lane.b32.xlu0 %v6199_v34, %s6573_s14  ;;  %v1972_v34 = vld [vmem:[#allocation2 + $0x38] sm:$0xff] }
0x2456   :  { %v6201_v40 = vpop.eup %6200  ;;  %v7141_v36 = vpack.c.bf16 %v1972_v34, %v1971_v30  ;;  %v2088_v30 = vld [vmem:[#allocation2 + $0x58] sm:$0xff] }
0x2457   :  { %v1754_v38 = vadd.f32 1.0, %v6201_v40  ;;  %v7188_v34 = vpack.c.bf16 %v2088_v30, %v2087_v28 }
0x2458   :  { %5873 = vmatpush3.bf16.msra.mxu1 %v7141_v36 }
0x2459   :  { %6202 = vrcp.f32 %v1754_v38  ;;  %5886 = vmatprep.subr.bf16.mxu1 %v6570_v0  ;;  %v4705_v38 = vld [vmem:[%s7864_s4 + $0x20] sm:$0xff]  ;;  %s6578_s4 = smov 4  }
0x245a   :  { %v1934_v51 = vrot.slane %v4705_v38, %v6824_v44 }
0x2463   :  { %v6203_v39 = vpop.eup %6202 }
0x2464   :  { %v1758_v47 = vmul.f32 %v6203_v39, %v7031_v54 }
0x24c7   :  { %v1761_v41 = vpop.permute.xlu0 %1760 }
0x24c8   :  { %v1763_v46 = vmul.f32 %v6203_v39, %v1761_v41 }
0x24ca   :  { %1765 = vrot.lane.b32.xlu1 %v1763_v46, %s6574_s15  ;;  %v1916_v46 = vrot.slane %v4705_v38, %v6815_v35 }
0x253c   :  { %v1766_v48 = vpop.permute.xlu1 %1765 }
0x253d   :  { %v7107_v49 = vadd.f32 %v1766_v48, %v1758_v47  ;;  %v1925_v47 = vrot.slane %v4705_v38, %v6818_v37  ;;  %v1942_v48 = vsub.s32 3, %v6812_v32 }
0x253f   :  { %6204 = vtanh.f32 %v7107_v49  ;;  %v1943_v32 = vrot.slane %v4705_v38, %v1942_v48  ;;  %v2090_v38 = vld [vmem:[#allocation2 + $0x68] sm:$0xff] }
0x2549   :  { %v6205_v62 = vpop.eup %6204 }
0x254a   :  { %1771 = vrot.lane.b32.xlu0 %v6205_v62, %s6573_s14 }
0x25bc   :  { %v1772_v54 = vpop.permute.xlu0 %1771 }
0x25bd   :  { %v7113_v43 = vmul.f32 %v6203_v39, %v1772_v54 }
0x25bf   :  { %1789 = vrot.lane.b32.xlu1 %v7113_v43, %s6574_s15 }
0x2631   :  { %v1790_v5 = vpop.permute.xlu1 %1789 }
0x2632   :  { %5318 = vmatmul.mubr.msk.f32.vlgmr.msra.gmra.mrb[14].mxu0 %vm208_vm1, %v1790_v5 }
0x2633   :  { %5355 = vmatprep.mubr.msk.f32.mxu0 %vm6571_vm0, %v6572_v1  ;;  %5876 = vmatpush3.bf16.msra.mxu0 %v7185_v20 }
0x2634   :  { %5877 = vmatprep.subr.bf16.mxu0 %v6570_v0 }
0x2637   :  { %5879 = vmatpush3.bf16.msra.mxu0 %v7188_v34 }
0x2638   :  { %5880 = vmatprep.subr.bf16.mxu0 %v6570_v0 }
0x2705   :  { %v1859_v61 = vpop.f32.mrb[14].mxu0 }
0x2706   :  { %v1860_v7 = vadd.f32 %v4701_v60, %v1859_v61  ;;  %v5319_v3 = vpop.f32.mrb[15].mxu0 }
0x2708   :  { %v7123_v10 = vadd.f32 %v4703_v2, %v1860_v7 }
0x270a   :  { %v1874_v8 = vadd.f32 %v4704_v22, %v7123_v10 }
0x270c   :  { %1875 = vmax.xlane.f32.xlu0 %v1874_v8 }
0x2799   :  { %v1876_v9 = vpop.xlane.xlu0 %1875 }
0x279a   :  { %vm1877_vm11 = vcmp.ge.f32.partialorder %v1874_v8, %v1876_v9 }
0x279b   :  { %v1878_v13 = vsel %vm1877_vm11, %v6807_v21, 128 }
0x279c   :  { %v1880_v16 = vshra.s32 %v1878_v13, 16  ;;  %v1879_v11 = vand.u32 65535, %v1878_v13 }
0x279e   :  { %v1882_v45 = vcvt.s32.f32 %v1880_v16  ;;  %v1881_v17 = vcvt.s32.f32 %v1879_v11 }
0x27a0   :  { %1883 = vmin.xlane.f32.xlu1 %v1882_v45 }
0x282d   :  { %v1884_v12 = vpop.xlane.xlu1 %1883 }
0x282e   :  { %vm1885_vm12 = vcmp.eq.f32.partialorder %v1882_v45, %v1884_v12  ;;  %v1890_v40 = vcvt.f32.s32 %v1884_v12 }
0x282f   :  { %v1886_v19 = vsel %vm1885_vm12, %v1881_v17, inf }
0x2830   :  { %1887 = vmin.xlane.f32.xlu0 %v1886_v19  ;;  %v1891_v41 = vshll.u32 %v1890_v40, 16  ;;  %v2089_v40 = vld [vmem:[#allocation2 + $0x60] sm:$0xff] }
0x2846   :  { %1961 = vrot.lane.b32.xlu0 %v7093_v24, %s6573_s14 }
0x28bd   :  { %v1888_v39 = vpop.xlane.xlu0 %1887 }
0x28be   :  { %v1889_v24 = vcvt.f32.s32 %v1888_v39  ;;  %v7193_v39 = vpack.c.bf16 %v2090_v38, %v2089_v40  ;;  %v2198_v38 = vld [vmem:[#allocation5 + $0xa0] sm:$0xff] }
0x28c0   :  { %v7151_v50 = vadd.s32 %v1891_v41, %v1889_v24  ;;  %v2091_v41 = vld [vmem:[#allocation2 + $0x70] sm:$0xff]  ;;  %v2092_v24 = vld [vmem:[#allocation2 + $0x78] sm:$0xff]  ;;  %5882 = vmatpush3.bf16.msra.mxu0 %v7193_v39 }
0x28c1   :  { %v1962_v2 = vpop.permute.xlu0 %1961  ;;  %5883 = vmatprep.subr.bf16.mxu0 %v6570_v0 }
0x28c2   :  { %vm1910_vm14 = vcmp.eq.s32.totalorder %v7151_v50, 0  ;;  %vm1919_vm4 = vcmp.eq.s32.totalorder %v7151_v50, 1  ;;  %vm1928_vm5 = vcmp.eq.s32.totalorder %v7151_v50, 2  ;;  %vm1937_vm6 = vcmp.eq.s32.totalorder %v7151_v50, 3 }
0x28c3   :  { %v4706_v52 = vsel %vm1910_vm14, 1.0, %v6572_v1  ;;  %v4707_v35 = vsel %vm1919_vm4, 1.0, %v6572_v1  ;;  %v4708_v37 = vsel %vm1928_vm5, 1.0, %v6572_v1  ;;  %v4709_v44 = vsel %vm1937_vm6, 1.0, %v6572_v1 }
0x28c4   :  { %v1917_v14 = vmul.f32 %v4706_v52, %v1916_v46  ;;  %v1926_v56 = vmul.f32 %v4707_v35, %v1925_v47  ;;  %v1953_v57 = vsel %vm1952_vm13, %v7073_v59, %v7151_v50  ;;  %v1935_v54 = vmul.f32 %v4708_v37, %v1934_v51  ;;  %v7176_v59 = vld [vmem:[%s7861_s1] ss:$0 sm:$0xff] }
0x28c5   :  { %1955 = vst.msk [vmem:[#allocation10] sm:$0xff] %vm1954_vm7, %v1953_v57  ;;  %v1944_v60 = vmul.f32 %v4709_v44, %v1943_v32  ;;  %v7199_v46 = vpack.c.bf16 %v2092_v24, %v2091_v41  ;;  %v7226_v32 = vld [vmem:[%s7861_s1 + $0x1] ss:$0 sm:$0xff]  ;;  %v2200_v41 = vld [vmem:[#allocation5 + $0xb0] sm:$0xff]  ;;  %vm1904_vm10 = vcmp.eq.s32.totalorder %v6807_v21, %v7151_v50 }
0x28c6   :  { %v1927_v62 = vadd.f32 %v1926_v56, %v1917_v14 }
0x28c7   :  { %5885 = vmatpush3.bf16.msra.mxu0 %v7199_v46 }
0x28c8   :  { %v1936_v5 = vadd.f32 %v1935_v54, %v1927_v62  ;;  %5892 = vmatprep.subr.bf16.mxu0 %v6570_v0 }
0x28ca   :  { %v7166_v61 = vadd.f32 %v1944_v60, %v1936_v5 }
0x28cc   :  { %v1964_v7 = vsel %vm208_vm1, %v7166_v61, %v1962_v2 }
0x28cd   :  { %5337 = vmatmul.mubr.msk.f32.vlgmr.msra.gmra.mrb[14].mxu1 %vm106_vm2, %v1964_v7 }
0x28ce   :  { %5366 = vmatprep.mubr.msk.f32.mxu1 %vm6571_vm0, %v6572_v1 }
0x29a0   :  { %v2049_v3 = vpop.f32.mrb[14].mxu1 }
0x29a1   :  { %v2050_v22 = vadd.f32 %v7176_v59, %v2049_v3  ;;  %v5338_v8 = vpop.f32.mrb[15].mxu1 }
0x29a3   :  { %6206 = vtanh.f32 %v2050_v22  ;;  %v4712_v13 = vmul.f32 -1.442695, %v2050_v22 }
0x29a5   :  { %6208 = vpow2.f32 %v4712_v13 }
0x29ad   :  { %v6207_v9 = vpop.eup %6206 }
0x29ae   :  { %2062 = vrot.lane.b32.xlu1 %v6207_v9, %s6573_s14 }
0x29af   :  { %v6209_v16 = vpop.eup %6208 }
0x29b0   :  { %v2056_v45 = vadd.f32 1.0, %v6209_v16 }
0x29b2   :  { %6210 = vrcp.f32 %v2056_v45 }
0x29bc   :  { %v6211_v11 = vpop.eup %6210 }
0x29bd   :  { %v2060_v19 = vmul.f32 %v6211_v11, %v7087_v23 }
0x2a20   :  { %v2063_v12 = vpop.permute.xlu1 %2062 }
0x2a21   :  { %v2065_v17 = vmul.f32 %v6211_v11, %v2063_v12 }
0x2a23   :  { %2067 = vrot.lane.b32.xlu1 %v2065_v17, %s6574_s15 }
0x2a95   :  { %v2068_v4 = vpop.permute.xlu1 %2067 }
0x2a96   :  { %v7182_v26 = vadd.f32 %v2068_v4, %v2060_v19 }
0x2a98   :  { %6212 = vtanh.f32 %v7182_v26 }
0x2aa2   :  { %v6213_v23 = vpop.eup %6212 }
0x2aa3   :  { %2073 = vrot.lane.b32.xlu0 %v6213_v23, %s6573_s14  ;;  %v2199_v23 = vld [vmem:[#allocation5 + $0xa8] sm:$0xff] }
0x2aa4   :  { %v5887_v24 = vpack.c.bf16 %v2199_v23, %v2198_v38 }
0x2aa6   :  { %5888 = vmatpush3.bf16.msra.mxu1 %v5887_v24 }
0x2aa7   :  { %2081 = vrot.lane.b32.xlu0 %v7113_v43, %s6573_s14  ;;  %5889 = vmatprep.subr.bf16.mxu1 %v6570_v0 }
0x2b15   :  { %v2074_v47 = vpop.permute.xlu0 %2073 }
0x2b16   :  { %v2076_v48 = vmul.f32 %v6211_v11, %v2074_v47 }
0x2b18   :  { %2078 = vrot.lane.b32.xlu1 %v2076_v48, %s6574_s15 }
0x2b19   :  { %v2082_v51 = vpop.permute.xlu0 %2081 }
0x2b1c   :  { %2306 = vrot.lane.b32.xlu1 %v2076_v48, %s6573_s14 }
0x2b8a   :  { %v2079_v52 = vpop.permute.xlu1 %2078 }
0x2b8b   :  { %v2084_v43 = vsel %vm208_vm1, %v2079_v52, %v2082_v51 }
0x2b8c   :  { %5356 = vmatmul.mubr.msk.f32.vlgmr.msra.gmra.mrb[16].mxu0 %vm106_vm2, %v2084_v43 }
0x2b8d   :  { %5894 = vmatpush3.bf16.msra.mxu0 %v7127_v27  ;;  %5385 = vmatprep.mubr.msk.f32.mxu0 %vm6571_vm0, %v6572_v1 }
0x2b8e   :  { %5895 = vmatprep.subr.bf16.mxu0 %v6570_v0  ;;  %v2307_v35 = vpop.permute.xlu1 %2306 }
0x2b8f   :  { %v2309_v37 = vsel %vm208_vm1, %v7166_v61, %v2307_v35 }
0x2b91   :  { %5897 = vmatpush3.bf16.msra.mxu0 %v7131_v53 }
0x2b92   :  { %5898 = vmatprep.subr.bf16.mxu0 %v6570_v0 }
0x2b95   :  { %5900 = vmatpush3.bf16.msra.mxu0 %v7135_v29 }
0x2b96   :  { %5901 = vmatprep.subr.bf16.mxu0 %v6570_v0 }
0x2b99   :  { %5903 = vmatpush3.bf16.msra.mxu0 %v7141_v36 }
0x2b9a   :  { %5916 = vmatprep.subr.bf16.mxu0 %v6570_v0 }
0x2b9c   :  { %5386 = vmatmul.mubr.msk.f32.vlgmr.msra.gmra.mrb[18].mxu0 %vm106_vm2, %v2309_v37 }
0x2b9d   :  { %5415 = vmatprep.mubr.msk.f32.mxu0 %vm6571_vm0, %v6572_v1 }
0x2c5f   :  { %v2169_v14 = vpop.f32.mrb[16].mxu0 }
0x2c60   :  { %v2170_v56 = vadd.f32 %v7226_v32, %v2169_v14  ;;  %v5357_v44 = vpop.f32.mrb[17].mxu0 }
0x2c62   :  { %6214 = vtanh.f32 %v2170_v56  ;;  %v4716_v2 = vmul.f32 -1.442695, %v2170_v56 }
0x2c6c   :  { %v6215_v57 = vpop.eup %6214 }
0x2c6d   :  { %2182 = vrot.lane.b32.xlu0 %v6215_v57, %s6573_s14 }
0x2c6f   :  { %v2379_v62 = vpop.f32.mrb[18].mxu0 }
0x2c70   :  { %v2380_v54 = vadd.f32 %v7176_v59, %v2379_v62  ;;  %v5387_v5 = vpop.f32.mrb[19].mxu0 }
0x2c72   :  { %6216 = vtanh.f32 %v2380_v54  ;;  %v4721_v3 = vmul.f32 -1.442695, %v2380_v54 }
0x2c73   :  { %6218 = vpow2.f32 %v4716_v2 }
0x2c74   :  { %6220 = vpow2.f32 %v4721_v3 }
0x2c7c   :  { %v6217_v60 = vpop.eup %6216 }
0x2c7d   :  { %2392 = vrot.lane.b32.xlu1 %v6217_v60, %s6573_s14  ;;  %v6219_v7 = vpop.eup %6218 }
0x2c7e   :  { %v2176_v22 = vadd.f32 1.0, %v6219_v7  ;;  %v6221_v8 = vpop.eup %6220 }
0x2c7f   :  { %v2386_v45 = vadd.f32 1.0, %v6221_v8 }
0x2c80   :  { %6222 = vrcp.f32 %v2176_v22 }
0x2c81   :  { %6224 = vrcp.f32 %v2386_v45 }
0x2c8a   :  { %v6223_v9 = vpop.eup %6222 }
0x2c8b   :  { %v6225_v11 = vpop.eup %6224  ;;  %v2180_v19 = vmul.f32 %v6223_v9, %v7107_v49  ;;  %v2201_v49 = vld [vmem:[#allocation5 + $0xb8] sm:$0xff] }
0x2c8c   :  { %v2390_v28 = vmul.f32 %v6225_v11, %v7182_v26  ;;  %v5890_v47 = vpack.c.bf16 %v2201_v49, %v2200_v41 }
0x2c8e   :  { %5891 = vmatpush3.bf16.msra.mxu1 %v5890_v47 }
0x2c8f   :  { %5904 = vmatprep.subr.bf16.mxu1 %v6570_v0 }
0x2cdf   :  { %v2183_v13 = vpop.permute.xlu0 %2182 }
0x2ce0   :  { %v2185_v16 = vmul.f32 %v6223_v9, %v2183_v13 }
0x2ce2   :  { %2187 = vrot.lane.b32.xlu0 %v2185_v16, %s6574_s15 }
0x2cef   :  { %v2393_v12 = vpop.permute.xlu1 %2392 }
0x2cf0   :  { %v2395_v17 = vmul.f32 %v6225_v11, %v2393_v12 }
0x2cf2   :  { %2397 = vrot.lane.b32.xlu1 %v2395_v17, %s6574_s15 }
0x2d54   :  { %v2188_v4 = vpop.permute.xlu0 %2187 }
0x2d55   :  { %v7235_v25 = vadd.f32 %v2188_v4, %v2180_v19 }
0x2d57   :  { %6226 = vtanh.f32 %v7235_v25 }
0x2d61   :  { %v6227_v31 = vpop.eup %6226 }
0x2d62   :  { %2193 = vrot.lane.b32.xlu0 %v6227_v31, %s6573_s14 }
0x2d64   :  { %v2398_v30 = vpop.permute.xlu1 %2397 }
0x2d65   :  { %v7240_v40 = vadd.f32 %v2398_v30, %v2390_v28 }
0x2d67   :  { %6228 = vtanh.f32 %v7240_v40 }
0x2d71   :  { %v6229_v48 = vpop.eup %6228 }
0x2d72   :  { %2403 = vrot.lane.b32.xlu1 %v6229_v48, %s6573_s14 }
0x2dd4   :  { %v2194_v26 = vpop.permute.xlu0 %2193 }
0x2dd5   :  { %v2196_v51 = vmul.f32 %v6223_v9, %v2194_v26 }
0x2dd7   :  { %2211 = vrot.lane.b32.xlu0 %v2196_v51, %s6574_s15 }
0x2ddb   :  { %2411 = vrot.lane.b32.xlu0 %v2196_v51, %s6573_s14  ;;  %v2513_v51 = vld [vmem:[#allocation5 + $0xc0] sm:$0xff] }
0x2de4   :  { %v2404_v52 = vpop.permute.xlu1 %2403 }
0x2de5   :  { %v2406_v43 = vmul.f32 %v6225_v11, %v2404_v52  ;;  %v2514_v52 = vld [vmem:[#allocation5 + $0xc8] sm:$0xff] }
0x2de7   :  { %2408 = vrot.lane.b32.xlu1 %v2406_v43, %s6574_s15 }
0x2deb   :  { %2622 = vrot.lane.b32.xlu1 %v2406_v43, %s6573_s14  ;;  %v2515_v43 = vld [vmem:[#allocation5 + $0xd0] sm:$0xff] }
0x2e49   :  { %v2212_v35 = vpop.permute.xlu0 %2211 }
0x2e4a   :  { %5367 = vmatmul.mubr.msk.f32.vlgmr.msra.gmra.mrb[16].mxu1 %vm208_vm1, %v2212_v35  ;;  %v5917_v35 = vpack.c.bf16 %v2514_v52, %v2513_v51 }
0x2e4b   :  { %5906 = vmatpush3.bf16.msra.mxu1 %v7185_v20  ;;  %5404 = vmatprep.mubr.msk.f32.mxu1 %vm6571_vm0, %v6572_v1 }
0x2e4c   :  { %5907 = vmatprep.subr.bf16.mxu1 %v6570_v0  ;;  %5918 = vmatpush3.bf16.msra.mxu0 %v5917_v35 }
0x2e4d   :  { %v2412_v37 = vpop.permute.xlu0 %2411  ;;  %5919 = vmatprep.subr.bf16.mxu0 %v6570_v0 }
0x2e4f   :  { %5909 = vmatpush3.bf16.msra.mxu1 %v7188_v34 }
0x2e50   :  { %5910 = vmatprep.subr.bf16.mxu1 %v6570_v0 }
0x2e53   :  { %5912 = vmatpush3.bf16.msra.mxu1 %v7193_v39 }
0x2e54   :  { %5913 = vmatprep.subr.bf16.mxu1 %v6570_v0 }
0x2e57   :  { %5915 = vmatpush3.bf16.msra.mxu1 %v7199_v46 }
0x2e58   :  { %5922 = vmatprep.subr.bf16.mxu1 %v6570_v0 }
0x2e59   :  { %v2409_v14 = vpop.permute.xlu1 %2408 }
0x2e5a   :  { %v2414_v56 = vsel %vm208_vm1, %v2409_v14, %v2412_v37 }
0x2e5b   :  { %5405 = vmatmul.mubr.msk.f32.vlgmr.msra.gmra.mrb[18].mxu1 %vm106_vm2, %v2414_v56 }
0x2e5c   :  { %5924 = vmatpush3.bf16.msra.mxu1 %v7127_v27  ;;  %5434 = vmatprep.mubr.msk.f32.mxu1 %vm6571_vm0, %v6572_v1 }
0x2e5d   :  { %5925 = vmatprep.subr.bf16.mxu1 %v6570_v0  ;;  %v2623_v44 = vpop.permute.xlu1 %2622 }
0x2e5e   :  { %v2625_v57 = vsel %vm208_vm1, %v7166_v61, %v2623_v44 }
0x2e60   :  { %5927 = vmatpush3.bf16.msra.mxu1 %v7131_v53 }
0x2e61   :  { %5928 = vmatprep.subr.bf16.mxu1 %v6570_v0 }
0x2e64   :  { %5930 = vmatpush3.bf16.msra.mxu1 %v7135_v29 }
0x2e65   :  { %5931 = vmatprep.subr.bf16.mxu1 %v6570_v0 }
0x2e68   :  { %5933 = vmatpush3.bf16.msra.mxu1 %v7141_v36 }
0x2e69   :  { %5946 = vmatprep.subr.bf16.mxu1 %v6570_v0 }
0x2e6b   :  { %5435 = vmatmul.mubr.msk.f32.vlgmr.msra.gmra.mrb[20].mxu1 %vm106_vm2, %v2625_v57 }
0x2e6c   :  { %5464 = vmatprep.mubr.msk.f32.mxu1 %vm6571_vm0, %v6572_v1 }
0x2f1d   :  { %v7278_v62 = vpop.f32.mrb[16].mxu1 }
0x2f1e   :  { %v5368_v54 = vpop.f32.mrb[17].mxu1 }
0x2f2e   :  { %v2484_v5 = vpop.f32.mrb[18].mxu1 }
0x2f2f   :  { %v2485_v60 = vadd.f32 %v7226_v32, %v2484_v5  ;;  %v5406_v2 = vpop.f32.mrb[19].mxu1 }
0x2f31   :  { %6230 = vtanh.f32 %v2485_v60  ;;  %v4723_v13 = vmul.f32 -1.442695, %v2485_v60 }
0x2f3b   :  { %v6231_v7 = vpop.eup %6230 }
0x2f3c   :  { %2497 = vrot.lane.b32.xlu0 %v6231_v7, %s6573_s14 }
0x2f3e   :  { %v2695_v3 = vpop.f32.mrb[20].mxu1 }
0x2f3f   :  { %v2696_v22 = vadd.f32 %v7176_v59, %v2695_v3  ;;  %v5436_v8 = vpop.f32.mrb[21].mxu1 }
0x2f41   :  { %6232 = vtanh.f32 %v2696_v22  ;;  %v4729_v45 = vmul.f32 -1.442695, %v2696_v22 }
0x2f42   :  { %6234 = vpow2.f32 %v4723_v13 }
0x2f43   :  { %6236 = vpow2.f32 %v4729_v45 }
0x2f4b   :  { %v6233_v9 = vpop.eup %6232 }
0x2f4c   :  { %2708 = vrot.lane.b32.xlu1 %v6233_v9, %s6573_s14  ;;  %v6235_v16 = vpop.eup %6234 }
0x2f4d   :  { %v2491_v11 = vadd.f32 1.0, %v6235_v16  ;;  %v6237_v12 = vpop.eup %6236 }
0x2f4e   :  { %v2702_v31 = vadd.f32 1.0, %v6237_v12 }
0x2f4f   :  { %6238 = vrcp.f32 %v2491_v11 }
0x2f50   :  { %6240 = vrcp.f32 %v2702_v31 }
0x2f59   :  { %v6239_v17 = vpop.eup %6238 }
0x2f5a   :  { %v6241_v28 = vpop.eup %6240  ;;  %v2495_v23 = vmul.f32 %v6239_v17, %v7235_v25  ;;  %v2516_v25 = vld [vmem:[#allocation5 + $0xd8] sm:$0xff] }
0x2f5b   :  { %v2706_v47 = vmul.f32 %v6241_v28, %v7240_v40  ;;  %v5920_v37 = vpack.c.bf16 %v2516_v25, %v2515_v43 }
0x2f5d   :  { %5921 = vmatpush3.bf16.msra.mxu0 %v5920_v37 }
0x2f5e   :  { %5934 = vmatprep.subr.bf16.mxu0 %v6570_v0 }
0x2fae   :  { %v2498_v19 = vpop.permute.xlu0 %2497 }
0x2faf   :  { %v2500_v4 = vmul.f32 %v6239_v17, %v2498_v19 }
0x2fb1   :  { %2502 = vrot.lane.b32.xlu0 %v2500_v4, %s6574_s15 }
0x2fbe   :  { %v2709_v30 = vpop.permute.xlu1 %2708 }
0x2fbf   :  { %v2711_v38 = vmul.f32 %v6241_v28, %v2709_v30 }
0x2fc1   :  { %2713 = vrot.lane.b32.xlu1 %v2711_v38, %s6574_s15 }
0x3023   :  { %v2503_v41 = vpop.permute.xlu0 %2502 }
0x3024   :  { %v7287_v24 = vadd.f32 %v2503_v41, %v2495_v23 }
0x3026   :  { %6242 = vtanh.f32 %v7287_v24 }
0x3030   :  { %v6243_v49 = vpop.eup %6242 }
0x3031   :  { %2508 = vrot.lane.b32.xlu0 %v6243_v49, %s6573_s14 }
0x3033   :  { %v2714_v48 = vpop.permute.xlu1 %2713 }
0x3034   :  { %v7292_v26 = vadd.f32 %v2714_v48, %v2706_v47 }
0x3036   :  { %6244 = vtanh.f32 %v7292_v26 }
0x3040   :  { %v6245_v14 = vpop.eup %6244 }
0x3041   :  { %2719 = vrot.lane.b32.xlu1 %v6245_v14, %s6573_s14 }
0x30a3   :  { %v2509_v40 = vpop.permute.xlu0 %2508 }
0x30a4   :  { %v2511_v56 = vmul.f32 %v6239_v17, %v2509_v40 }
0x30a6   :  { %2526 = vrot.lane.b32.xlu0 %v2511_v56, %s6574_s15 }
0x30aa   :  { %2727 = vrot.lane.b32.xlu0 %v2511_v56, %s6573_s14 }
0x30b3   :  { %v2720_v44 = vpop.permute.xlu1 %2719 }
0x30b4   :  { %v2722_v57 = vmul.f32 %v6241_v28, %v2720_v44  ;;  %v2829_v44 = vld [vmem:[#allocation5 + $0xe0] sm:$0xff] }
0x30b6   :  { %2724 = vrot.lane.b32.xlu1 %v2722_v57, %s6574_s15 }
0x30ba   :  { %2938 = vrot.lane.b32.xlu1 %v2722_v57, %s6573_s14  ;;  %v2830_v57 = vld [vmem:[#allocation5 + $0xe8] sm:$0xff] }
0x3118   :  { %v2527_v54 = vpop.permute.xlu0 %2526 }
0x3119   :  { %5416 = vmatmul.mubr.msk.f32.vlgmr.msra.gmra.mrb[20].mxu0 %vm208_vm1, %v2527_v54  ;;  %v2831_v54 = vld [vmem:[#allocation5 + $0xf0] sm:$0xff] }
0x311a   :  { %5936 = vmatpush3.bf16.msra.mxu0 %v7185_v20  ;;  %5453 = vmatprep.mubr.msk.f32.mxu0 %vm6571_vm0, %v6572_v1 }
0x311b   :  { %5937 = vmatprep.subr.bf16.mxu0 %v6570_v0 }
0x311c   :  { %v2728_v5 = vpop.permute.xlu0 %2727 }
0x311e   :  { %5939 = vmatpush3.bf16.msra.mxu0 %v7188_v34 }
0x311f   :  { %5940 = vmatprep.subr.bf16.mxu0 %v6570_v0 }
0x3122   :  { %5942 = vmatpush3.bf16.msra.mxu0 %v7193_v39 }
0x3123   :  { %5943 = vmatprep.subr.bf16.mxu0 %v6570_v0 }
0x3126   :  { %5945 = vmatpush3.bf16.msra.mxu0 %v7199_v46 }
0x3127   :  { %5952 = vmatprep.subr.bf16.mxu0 %v6570_v0 }
0x3128   :  { %v2725_v60 = vpop.permute.xlu1 %2724 }
0x3129   :  { %v2730_v2 = vsel %vm208_vm1, %v2725_v60, %v2728_v5  ;;  %v5947_v5 = vpack.c.bf16 %v2830_v57, %v2829_v44 }
0x312a   :  { %5454 = vmatmul.mubr.msk.f32.vlgmr.msra.gmra.mrb[22].mxu0 %vm106_vm2, %v2730_v2 }
0x312b   :  { %5954 = vmatpush3.bf16.msra.mxu0 %v7127_v27  ;;  %5483 = vmatprep.mubr.msk.f32.mxu0 %vm6571_vm0, %v6572_v1 }
0x312c   :  { %5955 = vmatprep.subr.bf16.mxu0 %v6570_v0  ;;  %v2939_v7 = vpop.permute.xlu1 %2938  ;;  %5948 = vmatpush3.bf16.msra.mxu1 %v5947_v5 }
0x312d   :  { %v2941_v3 = vsel %vm208_vm1, %v7166_v61, %v2939_v7  ;;  %5949 = vmatprep.subr.bf16.mxu1 %v6570_v0 }
0x312f   :  { %5957 = vmatpush3.bf16.msra.mxu0 %v7131_v53 }
0x3130   :  { %5958 = vmatprep.subr.bf16.mxu0 %v6570_v0 }
0x3133   :  { %5960 = vmatpush3.bf16.msra.mxu0 %v7135_v29 }
0x3134   :  { %5961 = vmatprep.subr.bf16.mxu0 %v6570_v0 }
0x3137   :  { %5963 = vmatpush3.bf16.msra.mxu0 %v7141_v36 }
0x3138   :  { %5976 = vmatprep.subr.bf16.mxu0 %v6570_v0 }
0x313a   :  { %5484 = vmatmul.mubr.msk.f32.vlgmr.msra.gmra.mrb[24].mxu0 %vm106_vm2, %v2941_v3 }
0x313b   :  { %5513 = vmatprep.mubr.msk.f32.mxu0 %vm6571_vm0, %v6572_v1 }
0x31ec   :  { %v7330_v22 = vpop.f32.mrb[20].mxu0 }
0x31ed   :  { %v5417_v8 = vpop.f32.mrb[21].mxu0 }
0x31fd   :  { %v2800_v9 = vpop.f32.mrb[22].mxu0 }
0x31fe   :  { %v2801_v13 = vadd.f32 %v7226_v32, %v2800_v9  ;;  %v5455_v16 = vpop.f32.mrb[23].mxu0 }
0x3200   :  { %6246 = vtanh.f32 %v2801_v13  ;;  %v4731_v4 = vmul.f32 -1.442695, %v2801_v13 }
0x320a   :  { %v6247_v45 = vpop.eup %6246 }
0x320b   :  { %2813 = vrot.lane.b32.xlu0 %v6247_v45, %s6573_s14 }
0x320d   :  { %v3011_v11 = vpop.f32.mrb[24].mxu0 }
0x320e   :  { %v3012_v12 = vadd.f32 %v7176_v59, %v3011_v11  ;;  %v5485_v17 = vpop.f32.mrb[25].mxu0 }
0x3210   :  { %6248 = vtanh.f32 %v3012_v12  ;;  %v4737_v28 = vmul.f32 -1.442695, %v3012_v12 }
0x3211   :  { %6250 = vpow2.f32 %v4731_v4 }
0x3212   :  { %6252 = vpow2.f32 %v4737_v28 }
0x321a   :  { %v6249_v19 = vpop.eup %6248 }
0x321b   :  { %3024 = vrot.lane.b32.xlu1 %v6249_v19, %s6573_s14  ;;  %v6251_v31 = vpop.eup %6250 }
0x321c   :  { %v2807_v30 = vadd.f32 1.0, %v6251_v31  ;;  %v6253_v38 = vpop.eup %6252 }
0x321d   :  { %v3018_v47 = vadd.f32 1.0, %v6253_v38 }
0x321e   :  { %6254 = vrcp.f32 %v2807_v30 }
0x321f   :  { %6256 = vrcp.f32 %v3018_v47 }
0x3228   :  { %v6255_v23 = vpop.eup %6254 }
0x3229   :  { %v6257_v48 = vpop.eup %6256  ;;  %v2811_v43 = vmul.f32 %v6255_v23, %v7287_v24  ;;  %v2832_v24 = vld [vmem:[#allocation5 + $0xf8] sm:$0xff] }
0x322a   :  { %v3022_v14 = vmul.f32 %v6257_v48, %v7292_v26  ;;  %v5950_v60 = vpack.c.bf16 %v2832_v24, %v2831_v54 }
0x322c   :  { %5951 = vmatpush3.bf16.msra.mxu1 %v5950_v60 }
0x322d   :  { %5964 = vmatprep.subr.bf16.mxu1 %v6570_v0 }
0x327d   :  { %v2814_v41 = vpop.permute.xlu0 %2813 }
0x327e   :  { %v2816_v49 = vmul.f32 %v6255_v23, %v2814_v41 }
0x3280   :  { %2818 = vrot.lane.b32.xlu0 %v2816_v49, %s6574_s15 }
0x328d   :  { %v3025_v51 = vpop.permute.xlu1 %3024 }
0x328e   :  { %v3027_v52 = vmul.f32 %v6257_v48, %v3025_v51 }
0x3290   :  { %3029 = vrot.lane.b32.xlu1 %v3027_v52, %s6574_s15 }
0x32f2   :  { %v2819_v35 = vpop.permute.xlu0 %2818 }
0x32f3   :  { %v7339_v25 = vadd.f32 %v2819_v35, %v2811_v43 }
0x32f5   :  { %6258 = vtanh.f32 %v7339_v25 }
0x32ff   :  { %v6259_v37 = vpop.eup %6258 }
0x3300   :  { %2824 = vrot.lane.b32.xlu0 %v6259_v37, %s6573_s14 }
0x3302   :  { %v3030_v40 = vpop.permute.xlu1 %3029 }
0x3303   :  { %v7344_v56 = vadd.f32 %v3030_v40, %v3022_v14 }
0x3305   :  { %6260 = vtanh.f32 %v7344_v56 }
0x330f   :  { %v6261_v2 = vpop.eup %6260 }
0x3310   :  { %3035 = vrot.lane.b32.xlu1 %v6261_v2, %s6573_s14 }
0x3372   :  { %v2825_v26 = vpop.permute.xlu0 %2824 }
0x3373   :  { %v2827_v7 = vmul.f32 %v6255_v23, %v2825_v26 }
0x3375   :  { %2842 = vrot.lane.b32.xlu0 %v2827_v7, %s6574_s15 }
0x3379   :  { %3043 = vrot.lane.b32.xlu0 %v2827_v7, %s6573_s14 }
0x3382   :  { %v3036_v3 = vpop.permute.xlu1 %3035 }
0x3383   :  { %v3038_v8 = vmul.f32 %v6257_v48, %v3036_v3 }
0x3385   :  { %3040 = vrot.lane.b32.xlu1 %v3038_v8, %s6574_s15 }
0x3389   :  { %3254 = vrot.lane.b32.xlu1 %v3038_v8, %s6573_s14  ;;  %v3145_v8 = vld [vmem:[#allocation5 + $0x100] sm:$0xff] }
0x33e7   :  { %v2843_v9 = vpop.permute.xlu0 %2842 }
0x33e8   :  { %5465 = vmatmul.mubr.msk.f32.vlgmr.msra.gmra.mrb[22].mxu1 %vm208_vm1, %v2843_v9  ;;  %v3146_v9 = vld [vmem:[#allocation5 + $0x108] sm:$0xff] }
0x33e9   :  { %5966 = vmatpush3.bf16.msra.mxu1 %v7185_v20  ;;  %5502 = vmatprep.mubr.msk.f32.mxu1 %vm6571_vm0, %v6572_v1 }
0x33ea   :  { %5967 = vmatprep.subr.bf16.mxu1 %v6570_v0 }
0x33eb   :  { %v3044_v13 = vpop.permute.xlu0 %3043 }
0x33ed   :  { %5969 = vmatpush3.bf16.msra.mxu1 %v7188_v34 }
0x33ee   :  { %5970 = vmatprep.subr.bf16.mxu1 %v6570_v0 }
0x33f1   :  { %5972 = vmatpush3.bf16.msra.mxu1 %v7193_v39 }
0x33f2   :  { %5973 = vmatprep.subr.bf16.mxu1 %v6570_v0 }
0x33f5   :  { %5975 = vmatpush3.bf16.msra.mxu1 %v7199_v46 }
0x33f6   :  { %5982 = vmatprep.subr.bf16.mxu1 %v6570_v0 }
0x33f7   :  { %v3041_v16 = vpop.permute.xlu1 %3040 }
0x33f8   :  { %v3046_v45 = vsel %vm208_vm1, %v3041_v16, %v3044_v13  ;;  %v3147_v13 = vld [vmem:[#allocation5 + $0x110] sm:$0xff]  ;;  %v5977_v16 = vpack.c.bf16 %v3146_v9, %v3145_v8 }
0x33f9   :  { %5503 = vmatmul.mubr.msk.f32.vlgmr.msra.gmra.mrb[24].mxu1 %vm106_vm2, %v3046_v45 }
0x33fa   :  { %5984 = vmatpush3.bf16.msra.mxu1 %v7127_v27  ;;  %5532 = vmatprep.mubr.msk.f32.mxu1 %vm6571_vm0, %v6572_v1 }
0x33fb   :  { %5985 = vmatprep.subr.bf16.mxu1 %v6570_v0  ;;  %v3255_v11 = vpop.permute.xlu1 %3254  ;;  %5978 = vmatpush3.bf16.msra.mxu0 %v5977_v16 }
0x33fc   :  { %v3257_v12 = vsel %vm208_vm1, %v7166_v61, %v3255_v11  ;;  %5979 = vmatprep.subr.bf16.mxu0 %v6570_v0 }
0x33fe   :  { %5987 = vmatpush3.bf16.msra.mxu1 %v7131_v53 }
0x33ff   :  { %5988 = vmatprep.subr.bf16.mxu1 %v6570_v0 }
0x3402   :  { %5990 = vmatpush3.bf16.msra.mxu1 %v7135_v29 }
0x3403   :  { %5991 = vmatprep.subr.bf16.mxu1 %v6570_v0 }
0x3406   :  { %5993 = vmatpush3.bf16.msra.mxu1 %v7141_v36 }
0x3407   :  { %6006 = vmatprep.subr.bf16.mxu1 %v6570_v0 }
0x3409   :  { %5533 = vmatmul.mubr.msk.f32.vlgmr.msra.gmra.mrb[26].mxu1 %vm106_vm2, %v3257_v12 }
0x340a   :  { %5562 = vmatprep.mubr.msk.f32.mxu1 %vm6571_vm0, %v6572_v1 }
0x34bb   :  { %v7382_v17 = vpop.f32.mrb[22].mxu1 }
0x34bc   :  { %v5466_v19 = vpop.f32.mrb[23].mxu1 }
0x34cc   :  { %v3116_v4 = vpop.f32.mrb[24].mxu1 }
0x34cd   :  { %v3117_v31 = vadd.f32 %v7226_v32, %v3116_v4  ;;  %v5504_v28 = vpop.f32.mrb[25].mxu1 }
0x34cf   :  { %6262 = vtanh.f32 %v3117_v31  ;;  %v4739_v47 = vmul.f32 -1.442695, %v3117_v31 }
0x34d9   :  { %v6263_v30 = vpop.eup %6262 }
0x34da   :  { %3129 = vrot.lane.b32.xlu0 %v6263_v30, %s6573_s14 }
0x34dc   :  { %v3327_v38 = vpop.f32.mrb[26].mxu1 }
0x34dd   :  { %v3328_v23 = vadd.f32 %v7176_v59, %v3327_v38  ;;  %v5534_v41 = vpop.f32.mrb[27].mxu1 }
0x34df   :  { %6264 = vtanh.f32 %v3328_v23  ;;  %v4745_v51 = vmul.f32 -1.442695, %v3328_v23 }
0x34e0   :  { %6266 = vpow2.f32 %v4739_v47 }
0x34e1   :  { %6268 = vpow2.f32 %v4745_v51 }
0x34e9   :  { %v6265_v49 = vpop.eup %6264 }
0x34ea   :  { %3340 = vrot.lane.b32.xlu1 %v6265_v49, %s6573_s14  ;;  %v6267_v48 = vpop.eup %6266 }
0x34eb   :  { %v3123_v52 = vadd.f32 1.0, %v6267_v48  ;;  %v6269_v43 = vpop.eup %6268 }
0x34ec   :  { %v3334_v40 = vadd.f32 1.0, %v6269_v43 }
0x34ed   :  { %6270 = vrcp.f32 %v3123_v52 }
0x34ee   :  { %6272 = vrcp.f32 %v3334_v40 }
0x34f7   :  { %v6271_v35 = vpop.eup %6270 }
0x34f8   :  { %v6273_v44 = vpop.eup %6272  ;;  %v3127_v5 = vmul.f32 %v6271_v35, %v7339_v25  ;;  %v3148_v25 = vld [vmem:[#allocation5 + $0x118] sm:$0xff] }
0x34f9   :  { %v3338_v26 = vmul.f32 %v6273_v44, %v7344_v56  ;;  %v5980_v45 = vpack.c.bf16 %v3148_v25, %v3147_v13 }
0x34fb   :  { %5981 = vmatpush3.bf16.msra.mxu0 %v5980_v45 }
0x34fc   :  { %5994 = vmatprep.subr.bf16.mxu0 %v6570_v0 }
0x354c   :  { %v3130_v37 = vpop.permute.xlu0 %3129 }
0x354d   :  { %v3132_v14 = vmul.f32 %v6271_v35, %v3130_v37 }
0x354f   :  { %3134 = vrot.lane.b32.xlu0 %v3132_v14, %s6574_s15 }
0x355c   :  { %v3341_v57 = vpop.permute.xlu1 %3340 }
0x355d   :  { %v3343_v54 = vmul.f32 %v6273_v44, %v3341_v57 }
0x355f   :  { %3345 = vrot.lane.b32.xlu1 %v3343_v54, %s6574_s15 }
0x35c1   :  { %v3135_v24 = vpop.permute.xlu0 %3134 }
0x35c2   :  { %v7391_v60 = vadd.f32 %v3135_v24, %v3127_v5 }
0x35c4   :  { %6274 = vtanh.f32 %v7391_v60 }
0x35ce   :  { %v6275_v2 = vpop.eup %6274 }
0x35cf   :  { %3140 = vrot.lane.b32.xlu0 %v6275_v2, %s6573_s14 }
0x35d1   :  { %v3346_v7 = vpop.permute.xlu1 %3345 }
0x35d2   :  { %v7396_v3 = vadd.f32 %v3346_v7, %v3338_v26 }
0x35d4   :  { %6276 = vtanh.f32 %v7396_v3 }
0x35de   :  { %v6277_v11 = vpop.eup %6276 }
0x35df   :  { %3351 = vrot.lane.b32.xlu1 %v6277_v11, %s6573_s14 }
0x3641   :  { %v3141_v56 = vpop.permute.xlu0 %3140 }
0x3642   :  { %v3143_v12 = vmul.f32 %v6271_v35, %v3141_v56 }
0x3644   :  { %3158 = vrot.lane.b32.xlu0 %v3143_v12, %s6574_s15 }
0x3648   :  { %3359 = vrot.lane.b32.xlu0 %v3143_v12, %s6573_s14 }
0x3651   :  { %v3352_v19 = vpop.permute.xlu1 %3351 }
0x3652   :  { %v3354_v4 = vmul.f32 %v6273_v44, %v3352_v19 }
0x3654   :  { %3356 = vrot.lane.b32.xlu1 %v3354_v4, %s6574_s15 }
0x3658   :  { %3570 = vrot.lane.b32.xlu1 %v3354_v4, %s6573_s14  ;;  %v3461_v4 = vld [vmem:[#allocation5 + $0x120] sm:$0xff] }
0x36b6   :  { %v3159_v31 = vpop.permute.xlu0 %3158 }
0x36b7   :  { %5514 = vmatmul.mubr.msk.f32.vlgmr.msra.gmra.mrb[26].mxu0 %vm208_vm1, %v3159_v31  ;;  %v3462_v31 = vld [vmem:[#allocation5 + $0x128] sm:$0xff] }
0x36b8   :  { %5996 = vmatpush3.bf16.msra.mxu0 %v7185_v20  ;;  %5551 = vmatprep.mubr.msk.f32.mxu0 %vm6571_vm0, %v6572_v1 }
0x36b9   :  { %5997 = vmatprep.subr.bf16.mxu0 %v6570_v0 }
0x36ba   :  { %v3360_v28 = vpop.permute.xlu0 %3359 }
0x36bc   :  { %5999 = vmatpush3.bf16.msra.mxu0 %v7188_v34 }
0x36bd   :  { %6000 = vmatprep.subr.bf16.mxu0 %v6570_v0 }
0x36c0   :  { %6002 = vmatpush3.bf16.msra.mxu0 %v7193_v39 }
0x36c1   :  { %6003 = vmatprep.subr.bf16.mxu0 %v6570_v0 }
0x36c4   :  { %6005 = vmatpush3.bf16.msra.mxu0 %v7199_v46 }
0x36c5   :  { %6012 = vmatprep.subr.bf16.mxu0 %v6570_v0 }
0x36c6   :  { %v3357_v30 = vpop.permute.xlu1 %3356 }
0x36c7   :  { %v3362_v38 = vsel %vm208_vm1, %v3357_v30, %v3360_v28  ;;  %v3463_v28 = vld [vmem:[#allocation5 + $0x130] sm:$0xff]  ;;  %v6007_v30 = vpack.c.bf16 %v3462_v31, %v3461_v4 }
0x36c8   :  { %5552 = vmatmul.mubr.msk.f32.vlgmr.msra.gmra.mrb[28].mxu0 %vm106_vm2, %v3362_v38 }
0x36c9   :  { %6014 = vmatpush3.bf16.msra.mxu0 %v7127_v27  ;;  %5581 = vmatprep.mubr.msk.f32.mxu0 %vm6571_vm0, %v6572_v1 }
0x36ca   :  { %6015 = vmatprep.subr.bf16.mxu0 %v6570_v0  ;;  %v3571_v23 = vpop.permute.xlu1 %3570  ;;  %6008 = vmatpush3.bf16.msra.mxu1 %v6007_v30 }
0x36cb   :  { %v3573_v41 = vsel %vm208_vm1, %v7166_v61, %v3571_v23  ;;  %6009 = vmatprep.subr.bf16.mxu1 %v6570_v0 }
0x36cd   :  { %6017 = vmatpush3.bf16.msra.mxu0 %v7131_v53 }
0x36ce   :  { %6018 = vmatprep.subr.bf16.mxu0 %v6570_v0 }
0x36d1   :  { %6020 = vmatpush3.bf16.msra.mxu0 %v7135_v29 }
0x36d2   :  { %6021 = vmatprep.subr.bf16.mxu0 %v6570_v0 }
0x36d5   :  { %6023 = vmatpush3.bf16.msra.mxu0 %v7141_v36 }
0x36d6   :  { %6036 = vmatprep.subr.bf16.mxu0 %v6570_v0 }
0x36d8   :  { %5582 = vmatmul.mubr.msk.f32.vlgmr.msra.gmra.mrb[30].mxu0 %vm106_vm2, %v3573_v41 }
0x36d9   :  { %5611 = vmatprep.mubr.msk.f32.mxu0 %vm6571_vm0, %v6572_v1 }
0x378a   :  { %v7434_v49 = vpop.f32.mrb[26].mxu0 }
0x378b   :  { %v5515_v47 = vpop.f32.mrb[27].mxu0 }
0x379b   :  { %v3432_v48 = vpop.f32.mrb[28].mxu0 }
0x379c   :  { %v3433_v51 = vadd.f32 %v7226_v32, %v3432_v48  ;;  %v5553_v52 = vpop.f32.mrb[29].mxu0 }
0x379e   :  { %6278 = vtanh.f32 %v3433_v51  ;;  %v4747_v44 = vmul.f32 -1.442695, %v3433_v51 }
0x37a8   :  { %v6279_v43 = vpop.eup %6278 }
0x37a9   :  { %3445 = vrot.lane.b32.xlu0 %v6279_v43, %s6573_s14 }
0x37ab   :  { %v3643_v35 = vpop.f32.mrb[30].mxu0 }
0x37ac   :  { %v3644_v37 = vadd.f32 %v7176_v59, %v3643_v35  ;;  %v5583_v14 = vpop.f32.mrb[31].mxu0 }
0x37ae   :  { %6280 = vtanh.f32 %v3644_v37  ;;  %v4753_v54 = vmul.f32 -1.442695, %v3644_v37 }
0x37af   :  { %6282 = vpow2.f32 %v4747_v44 }
0x37b0   :  { %6284 = vpow2.f32 %v4753_v54 }
0x37b8   :  { %v6281_v40 = vpop.eup %6280 }
0x37b9   :  { %3656 = vrot.lane.b32.xlu1 %v6281_v40, %s6573_s14  ;;  %v6283_v57 = vpop.eup %6282 }
0x37ba   :  { %v3439_v5 = vadd.f32 1.0, %v6283_v57  ;;  %v6285_v24 = vpop.eup %6284 }
0x37bb   :  { %v3650_v8 = vadd.f32 1.0, %v6285_v24 }
0x37bc   :  { %6286 = vrcp.f32 %v3439_v5 }
0x37bd   :  { %6288 = vrcp.f32 %v3650_v8 }
0x37c6   :  { %v6287_v2 = vpop.eup %6286 }
0x37c7   :  { %v6289_v59 = vpop.eup %6288  ;;  %v3443_v16 = vmul.f32 %v6287_v2, %v7391_v60  ;;  %v3464_v60 = vld [vmem:[#allocation5 + $0x138] sm:$0xff] }
0x37c8   :  { %v3654_v56 = vmul.f32 %v6289_v59, %v7396_v3  ;;  %v6010_v38 = vpack.c.bf16 %v3464_v60, %v3463_v28 }
0x37ca   :  { %6011 = vmatpush3.bf16.msra.mxu1 %v6010_v38 }
0x37cb   :  { %6024 = vmatprep.subr.bf16.mxu1 %v6570_v0 }
0x381b   :  { %v3446_v26 = vpop.permute.xlu0 %3445 }
0x381c   :  { %v3448_v7 = vmul.f32 %v6287_v2, %v3446_v26  ;;  %v7493_v26 = vld [vmem:[%s7861_s1] ss:$0 sm:$0xff] }
0x381e   :  { %3450 = vrot.lane.b32.xlu0 %v3448_v7, %s6574_s15 }
0x382b   :  { %v3657_v9 = vpop.permute.xlu1 %3656 }
0x382c   :  { %v3659_v13 = vmul.f32 %v6289_v59, %v3657_v9 }
0x382e   :  { %3661 = vrot.lane.b32.xlu1 %v3659_v13, %s6574_s15 }
0x3890   :  { %v3451_v25 = vpop.permute.xlu0 %3450 }
0x3891   :  { %v7443_v45 = vadd.f32 %v3451_v25, %v3443_v16 }
0x3893   :  { %6290 = vtanh.f32 %v7443_v45 }
0x389d   :  { %v6291_v11 = vpop.eup %6290 }
0x389e   :  { %3456 = vrot.lane.b32.xlu0 %v6291_v11, %s6573_s14 }
0x38a0   :  { %v3662_v12 = vpop.permute.xlu1 %3661 }
0x38a1   :  { %v7448_v19 = vadd.f32 %v3662_v12, %v3654_v56 }
0x38a3   :  { %6292 = vtanh.f32 %v7448_v19 }
0x38ad   :  { %v6293_v23 = vpop.eup %6292 }
0x38ae   :  { %3667 = vrot.lane.b32.xlu1 %v6293_v23, %s6573_s14 }
0x3910   :  { %v3457_v3 = vpop.permute.xlu0 %3456 }
0x3911   :  { %v3459_v41 = vmul.f32 %v6287_v2, %v3457_v3 }
0x3913   :  { %3474 = vrot.lane.b32.xlu0 %v3459_v41, %s6574_s15 }
0x3917   :  { %3675 = vrot.lane.b32.xlu0 %v3459_v41, %s6573_s14 }
0x3920   :  { %v3668_v47 = vpop.permute.xlu1 %3667 }
0x3921   :  { %v3670_v48 = vmul.f32 %v6289_v59, %v3668_v47 }
0x3923   :  { %3672 = vrot.lane.b32.xlu1 %v3670_v48, %s6574_s15 }
0x3927   :  { %3886 = vrot.lane.b32.xlu1 %v3670_v48, %s6573_s14 }
0x3985   :  { %v3475_v51 = vpop.permute.xlu0 %3474 }
0x3986   :  { %5563 = vmatmul.mubr.msk.f32.vlgmr.msra.gmra.mrb[28].mxu1 %vm208_vm1, %v3475_v51  ;;  %v3777_v51 = vld [vmem:[#allocation5 + $0x140] sm:$0xff] }
0x3987   :  { %6026 = vmatpush3.bf16.msra.mxu1 %v7185_v20  ;;  %5600 = vmatprep.mubr.msk.f32.mxu1 %vm6571_vm0, %v6572_v1 }
0x3988   :  { %6027 = vmatprep.subr.bf16.mxu1 %v6570_v0 }
0x3989   :  { %v3676_v52 = vpop.permute.xlu0 %3675 }
0x398b   :  { %6029 = vmatpush3.bf16.msra.mxu1 %v7188_v34 }
0x398c   :  { %6030 = vmatprep.subr.bf16.mxu1 %v6570_v0 }
0x398f   :  { %6032 = vmatpush3.bf16.msra.mxu1 %v7193_v39 }
0x3990   :  { %6033 = vmatprep.subr.bf16.mxu1 %v6570_v0 }
0x3993   :  { %6035 = vmatpush3.bf16.msra.mxu1 %v7199_v46 }
0x3994   :  { %6042 = vmatprep.subr.bf16.mxu1 %v6570_v0 }
0x3995   :  { %v3673_v43 = vpop.permute.xlu1 %3672 }
0x3996   :  { %v3678_v35 = vsel %vm208_vm1, %v3673_v43, %v3676_v52  ;;  %v3778_v52 = vld [vmem:[#allocation5 + $0x148] sm:$0xff]  ;;  %v3779_v43 = vld [vmem:[#allocation5 + $0x150] sm:$0xff] }
0x3997   :  { %5601 = vmatmul.mubr.msk.f32.vlgmr.msra.gmra.mrb[30].mxu1 %vm106_vm2, %v3678_v35  ;;  %v6037_v35 = vpack.c.bf16 %v3778_v52, %v3777_v51 }
0x3998   :  { %6044 = vmatpush3.bf16.msra.mxu1 %v7127_v27  ;;  %5630 = vmatprep.mubr.msk.f32.mxu1 %vm6571_vm0, %v6572_v1 }
0x3999   :  { %6045 = vmatprep.subr.bf16.mxu1 %v6570_v0  ;;  %v3887_v37 = vpop.permute.xlu1 %3886  ;;  %6038 = vmatpush3.bf16.msra.mxu0 %v6037_v35 }
0x399a   :  { %v3889_v14 = vsel %vm208_vm1, %v7166_v61, %v3887_v37  ;;  %6039 = vmatprep.subr.bf16.mxu0 %v6570_v0 }
0x399c   :  { %6047 = vmatpush3.bf16.msra.mxu1 %v7131_v53 }
0x399d   :  { %6048 = vmatprep.subr.bf16.mxu1 %v6570_v0 }
0x39a0   :  { %6050 = vmatpush3.bf16.msra.mxu1 %v7135_v29 }
0x39a1   :  { %6051 = vmatprep.subr.bf16.mxu1 %v6570_v0 }
0x39a4   :  { %6053 = vmatpush3.bf16.msra.mxu1 %v7141_v36 }
0x39a5   :  { %6066 = vmatprep.subr.bf16.mxu1 %v6570_v0 }
0x39a7   :  { %5631 = vmatmul.mubr.msk.f32.vlgmr.msra.gmra.mrb[32].mxu1 %vm106_vm2, %v3889_v14 }
0x39a8   :  { %5660 = vmatprep.mubr.msk.f32.mxu1 %vm6571_vm0, %v6572_v1 }
0x3a59   :  { %v7486_v40 = vpop.f32.mrb[28].mxu1 }
0x3a5a   :  { %v5564_v44 = vpop.f32.mrb[29].mxu1 }
0x3a6a   :  { %v3748_v57 = vpop.f32.mrb[30].mxu1 }
0x3a6b   :  { %v3749_v54 = vadd.f32 %v7226_v32, %v3748_v57  ;;  %v5602_v5 = vpop.f32.mrb[31].mxu1 }
0x3a6d   :  { %6294 = vtanh.f32 %v3749_v54  ;;  %v4755_v9 = vmul.f32 -1.442695, %v3749_v54 }
0x3a77   :  { %v6295_v24 = vpop.eup %6294 }
0x3a78   :  { %3761 = vrot.lane.b32.xlu0 %v6295_v24, %s6573_s14 }
0x3a7a   :  { %v3959_v2 = vpop.f32.mrb[32].mxu1 }
0x3a7b   :  { %v3960_v7 = vadd.f32 %v7493_v26, %v3959_v2  ;;  %v5632_v8 = vpop.f32.mrb[33].mxu1 }
0x3a7d   :  { %6296 = vtanh.f32 %v3960_v7  ;;  %v4761_v13 = vmul.f32 -1.442695, %v3960_v7 }
0x3a7e   :  { %6298 = vpow2.f32 %v4755_v9 }
0x3a7f   :  { %6300 = vpow2.f32 %v4761_v13 }
0x3a87   :  { %v6297_v59 = vpop.eup %6296 }
0x3a88   :  { %3972 = vrot.lane.b32.xlu1 %v6297_v59, %s6573_s14  ;;  %v6299_v32 = vpop.eup %6298 }
0x3a89   :  { %v3755_v16 = vadd.f32 1.0, %v6299_v32  ;;  %v6301_v25 = vpop.eup %6300 }
0x3a8a   :  { %v3966_v4 = vadd.f32 1.0, %v6301_v25 }
0x3a8b   :  { %6302 = vrcp.f32 %v3755_v16 }
0x3a8c   :  { %6304 = vrcp.f32 %v3966_v4 }
0x3a95   :  { %v6303_v11 = vpop.eup %6302 }
0x3a96   :  { %v6305_v31 = vpop.eup %6304  ;;  %v3759_v60 = vmul.f32 %v6303_v11, %v7443_v45  ;;  %v3780_v45 = vld [vmem:[#allocation5 + $0x158] sm:$0xff] }
0x3a97   :  { %v3970_v41 = vmul.f32 %v6305_v31, %v7448_v19  ;;  %v6040_v37 = vpack.c.bf16 %v3780_v45, %v3779_v43 }
0x3a99   :  { %6041 = vmatpush3.bf16.msra.mxu0 %v6040_v37 }
0x3a9a   :  { %6054 = vmatprep.subr.bf16.mxu0 %v6570_v0 }
0x3aea   :  { %v3762_v56 = vpop.permute.xlu0 %3761 }
0x3aeb   :  { %v3764_v12 = vmul.f32 %v6303_v11, %v3762_v56 }
0x3aed   :  { %3766 = vrot.lane.b32.xlu0 %v3764_v12, %s6574_s15 }
0x3afa   :  { %v3973_v28 = vpop.permute.xlu1 %3972 }
0x3afb   :  { %v3975_v30 = vmul.f32 %v6305_v31, %v3973_v28 }
0x3afd   :  { %3977 = vrot.lane.b32.xlu1 %v3975_v30, %s6574_s15 }
0x3b5f   :  { %v3767_v38 = vpop.permute.xlu0 %3766 }
0x3b60   :  { %v7500_v23 = vadd.f32 %v3767_v38, %v3759_v60 }
0x3b62   :  { %6306 = vtanh.f32 %v7500_v23 }
0x3b6c   :  { %v6307_v3 = vpop.eup %6306 }
0x3b6d   :  { %3772 = vrot.lane.b32.xlu0 %v6307_v3, %s6573_s14 }
0x3b6f   :  { %v3978_v47 = vpop.permute.xlu1 %3977 }
0x3b70   :  { %v7505_v48 = vadd.f32 %v3978_v47, %v3970_v41 }
0x3b72   :  { %6308 = vtanh.f32 %v7505_v48 }
0x3b7c   :  { %v6309_v14 = vpop.eup %6308 }
0x3b7d   :  { %3983 = vrot.lane.b32.xlu1 %v6309_v14, %s6573_s14 }
0x3bdf   :  { %v3773_v19 = vpop.permute.xlu0 %3772 }
0x3be0   :  { %v3775_v44 = vmul.f32 %v6303_v11, %v3773_v19  ;;  %v4093_v19 = vld [vmem:[#allocation5 + $0x160] sm:$0xff] }
0x3be2   :  { %3790 = vrot.lane.b32.xlu0 %v3775_v44, %s6574_s15 }
0x3be6   :  { %3991 = vrot.lane.b32.xlu0 %v3775_v44, %s6573_s14  ;;  %v4094_v44 = vld [vmem:[#allocation5 + $0x168] sm:$0xff] }
0x3bef   :  { %v3984_v57 = vpop.permute.xlu1 %3983 }
0x3bf0   :  { %v3986_v54 = vmul.f32 %v6305_v31, %v3984_v57  ;;  %v4095_v57 = vld [vmem:[#allocation5 + $0x170] sm:$0xff] }
0x3bf2   :  { %3988 = vrot.lane.b32.xlu1 %v3986_v54, %s6574_s15 }
0x3bf6   :  { %4202 = vrot.lane.b32.xlu1 %v3986_v54, %s6573_s14  ;;  %v6067_v54 = vpack.c.bf16 %v4094_v44, %v4093_v19 }
0x3bf8   :  { %6068 = vmatpush3.bf16.msra.mxu1 %v6067_v54  ;;  %v7643_v54 = vld [vmem:[%s7867_s7 + $0x38] sm:$0xff] }
0x3bf9   :  { %6069 = vmatprep.subr.bf16.mxu1 %v6570_v0 }
0x3c54   :  { %v3791_v5 = vpop.permute.xlu0 %3790 }
0x3c55   :  { %5612 = vmatmul.mubr.msk.f32.vlgmr.msra.gmra.mrb[32].mxu0 %vm208_vm1, %v3791_v5  ;;  %v4096_v5 = vld [vmem:[#allocation5 + $0x178] sm:$0xff] }
0x3c56   :  { %6056 = vmatpush3.bf16.msra.mxu0 %v7185_v20  ;;  %5649 = vmatprep.mubr.msk.f32.mxu0 %vm6571_vm0, %v6572_v1 }
0x3c57   :  { %6057 = vmatprep.subr.bf16.mxu0 %v6570_v0 }
0x3c58   :  { %v3992_v24 = vpop.permute.xlu0 %3991 }
0x3c5a   :  { %6059 = vmatpush3.bf16.msra.mxu0 %v7188_v34 }
0x3c5b   :  { %6060 = vmatprep.subr.bf16.mxu0 %v6570_v0 }
0x3c5e   :  { %6062 = vmatpush3.bf16.msra.mxu0 %v7193_v39 }
0x3c5f   :  { %6063 = vmatprep.subr.bf16.mxu0 %v6570_v0 }
0x3c62   :  { %6065 = vmatpush3.bf16.msra.mxu0 %v7199_v46 }
0x3c63   :  { %6072 = vmatprep.subr.bf16.mxu0 %v6570_v0 }
0x3c64   :  { %v3989_v2 = vpop.permute.xlu1 %3988 }
0x3c65   :  { %v3994_v7 = vsel %vm208_vm1, %v3989_v2, %v3992_v24  ;;  %v6070_v24 = vpack.c.bf16 %v4096_v5, %v4095_v57 }
0x3c66   :  { %5650 = vmatmul.mubr.msk.f32.vlgmr.msra.gmra.mrb[34].mxu0 %vm106_vm2, %v3994_v7 }
0x3c67   :  { %6074 = vmatpush3.bf16.msra.mxu0 %v7127_v27  ;;  %5679 = vmatprep.mubr.msk.f32.mxu0 %vm6571_vm0, %v6572_v1 }
0x3c68   :  { %6075 = vmatprep.subr.bf16.mxu0 %v6570_v0  ;;  %v4203_v8 = vpop.permute.xlu1 %4202  ;;  %6071 = vmatpush3.bf16.msra.mxu1 %v6070_v24 }
0x3c69   :  { %v4205_v27 = vsel %vm208_vm1, %v7166_v61, %v4203_v8  ;;  %6084 = vmatprep.subr.bf16.mxu1 %v6570_v0 }
0x3c6b   :  { %6077 = vmatpush3.bf16.msra.mxu0 %v7131_v53 }
0x3c6c   :  { %6078 = vmatprep.subr.bf16.mxu0 %v6570_v0 }
0x3c6f   :  { %6080 = vmatpush3.bf16.msra.mxu0 %v7135_v29  ;;  %v7548_v29 = vld [vmem:[%s7861_s1 + $0x1] ss:$0 sm:$0xff] }
0x3c70   :  { %6081 = vmatprep.subr.bf16.mxu0 %v6570_v0 }
0x3c73   :  { %6083 = vmatpush3.bf16.msra.mxu0 %v7141_v36 }
0x3c74   :  { %6096 = vmatprep.subr.bf16.mxu0 %v6570_v0 }
0x3c76   :  { %5680 = vmatmul.mubr.msk.f32.vlgmr.msra.gmra.mrb[36].mxu0 %vm106_vm2, %v4205_v27 }
0x3c77   :  { %5709 = vmatprep.mubr.msk.f32.mxu0 %vm6571_vm0, %v6572_v1 }
0x3d28   :  { %v7543_v53 = vpop.f32.mrb[32].mxu0 }
0x3d29   :  { %v5613_v59 = vpop.f32.mrb[33].mxu0 }
0x3d39   :  { %v4064_v9 = vpop.f32.mrb[34].mxu0 }
0x3d3a   :  { %v4065_v36 = vadd.f32 %v7548_v29, %v4064_v9  ;;  %v5651_v32 = vpop.f32.mrb[35].mxu0 }
0x3d3c   :  { %6310 = vtanh.f32 %v4065_v36  ;;  %v4763_v56 = vmul.f32 -1.442695, %v4065_v36 }
0x3d46   :  { %v6311_v13 = vpop.eup %6310 }
0x3d47   :  { %4077 = vrot.lane.b32.xlu0 %v6311_v13, %s6573_s14 }
0x3d49   :  { %v4275_v61 = vpop.f32.mrb[36].mxu0 }
0x3d4a   :  { %v4276_v16 = vadd.f32 %v7493_v26, %v4275_v61  ;;  %v5681_v25 = vpop.f32.mrb[37].mxu0 }
0x3d4c   :  { %6312 = vtanh.f32 %v4276_v16  ;;  %v4769_v4 = vmul.f32 -1.442695, %v4276_v16 }
0x3d4d   :  { %6314 = vpow2.f32 %v4763_v56 }
0x3d4e   :  { %6316 = vpow2.f32 %v4769_v4 }
0x3d56   :  { %v6313_v11 = vpop.eup %6312 }
0x3d57   :  { %4288 = vrot.lane.b32.xlu1 %v6313_v11, %s6573_s14  ;;  %v6315_v12 = vpop.eup %6314 }
0x3d58   :  { %v4071_v31 = vadd.f32 1.0, %v6315_v12  ;;  %v6317_v28 = vpop.eup %6316 }
0x3d59   :  { %v4282_v3 = vadd.f32 1.0, %v6317_v28  ;;  %v7588_v28 = vld [vmem:[%s7867_s7 + $0x8] sm:$0xff] }
0x3d5a   :  { %6318 = vrcp.f32 %v4071_v31 }
0x3d5b   :  { %6320 = vrcp.f32 %v4282_v3  ;;  %v4409_v3 = vld [vmem:[#allocation5 + $0x180] sm:$0xff] }
0x3d64   :  { %v6319_v30 = vpop.eup %6318 }
0x3d65   :  { %v6321_v26 = vpop.eup %6320  ;;  %v4075_v51 = vmul.f32 %v6319_v30, %v7500_v23 }
0x3d66   :  { %v4286_v45 = vmul.f32 %v6321_v26, %v7505_v48 }
0x3db9   :  { %v4078_v60 = vpop.permute.xlu0 %4077 }
0x3dba   :  { %v4080_v38 = vmul.f32 %v6319_v30, %v4078_v60  ;;  %v7602_v60 = vld [vmem:[%s7867_s7 + $0x20] sm:$0xff] }
0x3dbc   :  { %4082 = vrot.lane.b32.xlu0 %v4080_v38, %s6574_s15  ;;  %v7609_v38 = vld [vmem:[%s7867_s7 + $0x30] sm:$0xff] }
0x3dc9   :  { %v4289_v41 = vpop.permute.xlu1 %4288 }
0x3dca   :  { %v4291_v47 = vmul.f32 %v6321_v26, %v4289_v41  ;;  %v4411_v41 = vld [vmem:[#allocation5 + $0x190] sm:$0xff] }
0x3dcc   :  { %4293 = vrot.lane.b32.xlu1 %v4291_v47, %s6574_s15 }
0x3e2e   :  { %v4083_v52 = vpop.permute.xlu0 %4082 }
0x3e2f   :  { %v4085_v43 = vadd.f32 %v4083_v52, %v4075_v51  ;;  %v4412_v51 = vld [vmem:[#allocation5 + $0x198] sm:$0xff] }
0x3e30   :  { %v6100_v52 = vpack.c.bf16 %v4412_v51, %v4411_v41 }
0x3e31   :  { %6322 = vtanh.f32 %v4085_v43 }
0x3e3b   :  { %v6323_v35 = vpop.eup %6322 }
0x3e3c   :  { %4088 = vrot.lane.b32.xlu0 %v6323_v35, %s6573_s14 }
0x3e3e   :  { %v4294_v37 = vpop.permute.xlu1 %4293 }
0x3e3f   :  { %v4296_v14 = vadd.f32 %v4294_v37, %v4286_v45  ;;  %v7621_v45 = vld [vmem:[%s7867_s7 + $0x10] sm:$0xff] }
0x3e41   :  { %6324 = vtanh.f32 %v4296_v14  ;;  %v7632_v14 = vld [vmem:[%s7867_s7 + $0x28] sm:$0xff] }
0x3e4b   :  { %v6325_v23 = vpop.eup %6324 }
0x3e4c   :  { %4299 = vrot.lane.b32.xlu1 %v6325_v23, %s6573_s14 }
0x3eae   :  { %v4089_v2 = vpop.permute.xlu0 %4088 }
0x3eaf   :  { %v4091_v48 = vmul.f32 %v6319_v30, %v4089_v2  ;;  %v7595_v30 = vld [vmem:[%s7867_s7 + $0x18] sm:$0xff]  ;;  %v4724_v2 = vld [vmem:[#allocation7 + $0x6] ss:$0 sm:$0xff] }
0x3eb1   :  { %4106 = vrot.lane.b32.xlu0 %v4091_v48, %s6574_s15 }
0x3eb5   :  { %4307 = vrot.lane.b32.xlu0 %v4091_v48, %s6573_s14  ;;  %v7648_v48 = vadd.f32 %v4724_v2, %v7330_v22 }
0x3ebe   :  { %v4300_v7 = vpop.permute.xlu1 %4299 }
0x3ebf   :  { %v4302_v8 = vmul.f32 %v6321_v26, %v4300_v7  ;;  %v4410_v26 = vld [vmem:[#allocation5 + $0x188] sm:$0xff]  ;;  %v2602_v7 = vmul.f32 1.442695, %v7648_v48 }
0x3ec0   :  { %v6097_v47 = vpack.c.bf16 %v4410_v26, %v4409_v3 }
0x3ec1   :  { %4304 = vrot.lane.b32.xlu1 %v4302_v8, %s6574_s15  ;;  %v7654_v8 = vld [vmem:[%s7867_s7] sm:$0xff]  ;;  %s6576_s7 = smov 2  }
0x3ec2   :  { %6098 = vmatpush3.bf16.msra.mxu0 %v6097_v47 }
0x3ec3   :  { %6099 = vmatprep.subr.bf16.mxu0 %v6570_v0 }
0x3ec6   :  { %6101 = vmatpush3.bf16.msra.mxu0 %v6100_v52 }
0x3f23   :  { %v4107_v27 = vpop.permute.xlu0 %4106 }
0x3f24   :  { %5661 = vmatmul.mubr.msk.f32.vlgmr.msra.gmra.mrb[34].mxu1 %vm208_vm1, %v4107_v27  ;;  %v4732_v27 = vld [vmem:[#allocation7 + $0x7] ss:$0 sm:$0xff] }
0x3f25   :  { %6086 = vmatpush3.bf16.msra.mxu1 %v7185_v20  ;;  %5698 = vmatprep.mubr.msk.f32.mxu1 %vm6571_vm0, %v6572_v1  ;;  %vm451_vm0 = vcmp.eq.s32.totalorder %v6807_v21, %v6826_v42 }
0x3f26   :  { %6087 = vmatprep.subr.bf16.mxu1 %v6570_v0 }
0x3f27   :  { %v4308_v59 = vpop.permute.xlu0 %4307 }
0x3f29   :  { %6089 = vmatpush3.bf16.msra.mxu1 %v7188_v34 }
0x3f2a   :  { %6090 = vmatprep.subr.bf16.mxu1 %v6570_v0 }
0x3f2d   :  { %6092 = vmatpush3.bf16.msra.mxu1 %v7193_v39 }
0x3f2e   :  { %6093 = vmatprep.subr.bf16.mxu1 %v6570_v0 }
0x3f31   :  { %6095 = vmatpush3.bf16.msra.mxu1 %v7199_v46 }
0x3f33   :  { %v4305_v9 = vpop.permute.xlu1 %4304 }
0x3f34   :  { %v4310_v36 = vsel %vm208_vm1, %v4305_v9, %v4308_v59  ;;  %v7659_v59 = vadd.f32 %v4732_v27, %v7382_v17  ;;  %v4748_v17 = vld [vmem:[#allocation7 + $0x9] ss:$0 sm:$0xff] }
0x3f35   :  { %5699 = vmatmul.mubr.msk.f32.vlgmr.msra.gmra.mrb[36].mxu1 %vm106_vm2, %v4310_v36  ;;  %vm818_vm2 = vcmp.eq.s32.totalorder %v6807_v21, %v6904_v6  ;;  %v4194_v6 = vmul.f32 -0.5, %v7609_v38 }
0x3ff7   :  { %v7577_v20 = vpop.f32.mrb[34].mxu1 }
0x3ff8   :  { %v5662_v1 = vpop.f32.mrb[35].mxu1 }
0x4008   :  { %v4380_v32 = vpop.f32.mrb[36].mxu1 }
0x4009   :  { %v4381_v34 = vadd.f32 %v7548_v29, %v4380_v32  ;;  %v5700_v13 = vpop.f32.mrb[37].mxu1  ;;  %v4740_v32 = vld [vmem:[#allocation7 + $0x8] ss:$0 sm:$0xff] }
0x400a   :  { %v7667_v13 = vadd.f32 %v4740_v32, %v7434_v49 }
0x400b   :  { %6326 = vtanh.f32 %v4381_v34  ;;  %v4771_v39 = vmul.f32 -1.442695, %v4381_v34  ;;  %v2918_v34 = vmul.f32 1.442695, %v7659_v59 }
0x400d   :  { %6328 = vpow2.f32 %v4771_v39 }
0x4015   :  { %v6327_v61 = vpop.eup %6326 }
0x4016   :  { %4393 = vrot.lane.b32.xlu1 %v6327_v61, %s6573_s14 }
0x4017   :  { %v6329_v46 = vpop.eup %6328 }
0x4018   :  { %v4387_v16 = vadd.f32 1.0, %v6329_v46  ;;  %v3234_v46 = vmul.f32 1.442695, %v7667_v13 }
0x401a   :  { %6330 = vrcp.f32 %v4387_v16  ;;  %v7675_v16 = vadd.f32 %v4748_v17, %v7486_v40 }
0x4024   :  { %v6331_v25 = vpop.eup %6330 }
0x4025   :  { %v4391_v12 = vmul.f32 %v6331_v25, %v4085_v43 }
0x4088   :  { %v4394_v11 = vpop.permute.xlu1 %4393 }
0x4089   :  { %v4396_v56 = vmul.f32 %v6331_v25, %v4394_v11 }
0x408b   :  { %4398 = vrot.lane.b32.xlu0 %v4396_v56, %s6574_s15 }
0x40fd   :  { %v4399_v4 = vpop.permute.xlu0 %4398 }
0x40fe   :  { %v4401_v31 = vadd.f32 %v4399_v4, %v4391_v12  ;;  %v3550_v12 = vmul.f32 1.442695, %v7675_v16 }
0x4100   :  { %6332 = vtanh.f32 %v4401_v31  ;;  %v4764_v31 = vld [vmem:[#allocation7 + $0xb] ss:$0 sm:$0xff] }
0x4101   :  { %v7691_v41 = vadd.f32 %v4764_v31, %v7577_v20 }
0x410a   :  { %v6333_v29 = vpop.eup %6332 }
0x410b   :  { %4404 = vrot.lane.b32.xlu1 %v6333_v29, %s6573_s14 }
0x412f   :  { %440 = vmax.xlane.f32.xlu1 %v6804_v18 }
0x4133   :  { %1534 = vmax.xlane.f32.xlu1 %v7055_v33 }
0x4144   :  { %2605 = vrot.lane.b32.xlu1 %v7588_v28, %s6568_s29 }
0x4148   :  { %3237 = vrot.lane.b32.xlu1 %v7595_v30, %s6568_s29 }
0x414c   :  { %3553 = vrot.lane.b32.xlu1 %v7602_v60, %s6568_s29 }
0x4150   :  { %4185 = vrot.lane.b32.xlu1 %v7609_v38, %s6568_s29 }
0x417d   :  { %v4405_v43 = vpop.permute.xlu1 %4404 }
0x417e   :  { %v4407_v35 = vmul.f32 %v6331_v25, %v4405_v43  ;;  %v4756_v25 = vld [vmem:[#allocation7 + $0xa] ss:$0 sm:$0xff] }
0x417f   :  { %v7683_v4 = vadd.f32 %v4756_v25, %v7543_v53 }
0x4180   :  { %4422 = vrot.lane.b32.xlu0 %v4407_v35, %s6574_s15  ;;  %v4182_v35 = vmul.f32 1.442695, %v7691_v41 }
0x4181   :  { %v3866_v26 = vmul.f32 1.442695, %v7683_v4 }
0x419f   :  { %807 = vmax.xlane.f32.xlu0 %v6895_v63 }
0x41a3   :  { %1175 = vmax.xlane.f32.xlu0 %v6973_v58 }
0x41a7   :  { %1893 = vmax.xlane.f32.xlu0 %v7123_v10 }
0x41bc   :  { %v7623_v37 = vpop.xlane.xlu1 %440 }
0x41bd   :  { %v442_v0 = vsub.f32 %v6804_v18, %v7623_v37  ;;  %2921 = vrot.lane.b32.xlu0 %v7621_v45, %s6568_s29 }
0x41bf   :  { %v443_v19 = vmul.f32 1.442695, %v442_v0 }
0x41c0   :  { %v7634_v44 = vpop.xlane.xlu1 %1534 }
0x41c1   :  { %6334 = vpow2.f32 %v443_v19  ;;  %v1536_v57 = vsub.f32 %v7055_v33, %v7634_v44  ;;  %3869 = vrot.lane.b32.xlu0 %v7632_v14, %s6568_s29 }
0x41c3   :  { %v1537_v5 = vmul.f32 1.442695, %v1536_v57 }
0x41c4   :  { %v2606_v9 = vpop.permute.xlu1 %2605 }
0x41c5   :  { %6336 = vpow2.f32 %v1537_v5  ;;  %4501 = vrot.lane.b32.xlu0 %v7643_v54, %s6568_s29 }
0x41c6   :  { %6338 = vpow2.f32 %v2602_v7 }
0x41c7   :  { %6340 = vpow2.f32 %v2918_v34 }
0x41c8   :  { %v3238_v52 = vpop.permute.xlu1 %3237 }
0x41cb   :  { %v6335_v24 = vpop.eup %6334 }
0x41cc   :  { %445 = vadd.xlane.f32.xlu1 %v6335_v24  ;;  %v3554_v5 = vpop.permute.xlu1 %3553 }
0x41cf   :  { %v6337_v23 = vpop.eup %6336 }
0x41d0   :  { %1539 = vadd.xlane.f32.xlu1 %v6337_v23  ;;  %v6339_v22 = vpop.eup %6338 }
0x41d1   :  { %v2608_v36 = vmul.f32 %v6339_v22, %v2606_v9  ;;  %v6341_v51 = vpop.eup %6340  ;;  %v4186_v22 = vpop.permute.xlu1 %4185 }
0x41e1   :  { %2289 = vrot.lane.b32.xlu1 %v7654_v8, %s6568_s29 }
0x41e5   :  { %2933 = vrot.lane.b32.xlu1 %v7659_v59, %s6575_s17 }
0x41e9   :  { %2610 = vrot.lane.b32.xlu1 %v2608_v36, %s6575_s17 }
0x41f2   :  { %v4423_v1 = vpop.permute.xlu0 %4422 }
0x41f3   :  { %5710 = vmatmul.mubr.msk.f32.vlgmr.msra.gmra.mrb[38].mxu0 %vm208_vm1, %v4423_v1  ;;  %vm1545_vm1 = vcmp.eq.s32.totalorder %v6807_v21, %v7064_v55 }
0x422c   :  { %v7669_v61 = vpop.xlane.xlu0 %807 }
0x422d   :  { %v809_v39 = vsub.f32 %v6895_v63, %v7669_v61 }
0x422f   :  { %v810_v11 = vmul.f32 1.442695, %v809_v39 }
0x4230   :  { %v7677_v56 = vpop.xlane.xlu0 %1175 }
0x4231   :  { %6342 = vpow2.f32 %v810_v11  ;;  %v1177_v49 = vsub.f32 %v6973_v58, %v7677_v56 }
0x4232   :  { %6344 = vpow2.f32 %v3234_v46 }
0x4233   :  { %v1178_v29 = vmul.f32 1.442695, %v1177_v49 }
0x4234   :  { %v7685_v3 = vpop.xlane.xlu0 %1893 }
0x4235   :  { %6346 = vpow2.f32 %v1178_v29  ;;  %v1895_v40 = vsub.f32 %v7123_v10, %v7685_v3 }
0x4236   :  { %6348 = vpow2.f32 %v3550_v12 }
0x4237   :  { %v1896_v47 = vmul.f32 1.442695, %v1895_v40 }
0x4238   :  { %v2922_v43 = vpop.permute.xlu0 %2921 }
0x4239   :  { %6350 = vpow2.f32 %v1896_v47  ;;  %v2924_v53 = vmul.f32 %v6341_v51, %v2922_v43  ;;  %v4717_v47 = vld [vmem:[#allocation7 + $0x5] ss:$0 sm:$0xff] }
0x423a   :  { %6352 = vpow2.f32 %v3866_v26 }
0x423b   :  { %v6343_v0 = vpop.eup %6342  ;;  %2926 = vrot.lane.b32.xlu1 %v2924_v53, %s6575_s17  ;;  %6354 = vpow2.f32 %v4182_v35  ;;  %v2614_v53 = vmul.f32 -0.5, %v7588_v28 }
0x423c   :  { %v6345_v19 = vpop.eup %6344  ;;  %812 = vadd.xlane.f32.xlu0 %v6343_v0  ;;  %v3870_v2 = vpop.permute.xlu0 %3869 }
0x423d   :  { %v3240_v57 = vmul.f32 %v6345_v19, %v3238_v52  ;;  %v2615_v0 = vmul.f32 %v7588_v28, %v2614_v53 }
0x423f   :  { %v6347_v24 = vpop.eup %6346  ;;  %3242 = vrot.lane.b32.xlu1 %v3240_v57, %s6575_s17 }
0x4240   :  { %v6349_v20 = vpop.eup %6348  ;;  %1180 = vadd.xlane.f32.xlu0 %v6347_v24 }
0x4241   :  { %v3556_v23 = vmul.f32 %v6349_v20, %v3554_v5 }
0x4243   :  { %v6351_v7 = vpop.eup %6350  ;;  %3558 = vrot.lane.b32.xlu1 %v3556_v23, %s6575_s17 }
0x4244   :  { %v6353_v27 = vpop.eup %6352  ;;  %1898 = vadd.xlane.f32.xlu0 %v6351_v7  ;;  %v3562_v7 = vmul.f32 -0.5, %v7602_v60 }
0x4245   :  { %v3872_v9 = vmul.f32 %v6353_v27, %v3870_v2  ;;  %v6355_v36 = vpop.eup %6354 }
0x4246   :  { %v4188_v1 = vmul.f32 %v6355_v36, %v4186_v22 }
0x4247   :  { %3874 = vrot.lane.b32.xlu1 %v3872_v9, %s6575_s17 }
0x424b   :  { %4190 = vrot.lane.b32.xlu1 %v4188_v1, %s6575_s17 }
0x4259   :  { %v446_v32 = vpop.xlane.xlu1 %445 }
0x425a   :  { %6356 = vlog2.f32 %v446_v32  ;;  %2617 = vrot.lane.b32.xlu0 %v7648_v48, %s6575_s17 }
0x425d   :  { %v1540_v34 = vpop.xlane.xlu1 %1539 }
0x425e   :  { %6358 = vlog2.f32 %v1540_v34  ;;  %3249 = vrot.lane.b32.xlu0 %v7667_v13, %s6575_s17 }
0x4261   :  { %v7717_v40 = vpop.permute.xlu1 %2289 }
0x4262   :  { %3565 = vrot.lane.b32.xlu0 %v7675_v16, %s6575_s17 }
0x4264   :  { %v6357_v17 = vpop.eup %6356 }
0x4265   :  { %v448_v39 = vmul.f32 0.6931472, %v6357_v17  ;;  %v2934_v26 = vpop.permute.xlu1 %2933 }
0x4266   :  { %3881 = vrot.lane.b32.xlu0 %v7683_v4, %s6575_s17 }
0x4267   :  { %v449_v46 = vadd.f32 %v448_v39, %v7623_v37  ;;  %v3563_v39 = vmul.f32 %v7602_v60, %v3562_v7 }
0x4268   :  { %v6359_v25 = vpop.eup %6358 }
0x4269   :  { %v1542_v11 = vmul.f32 0.6931472, %v6359_v25  ;;  %v450_v49 = vsub.f32 %v6804_v18, %v449_v46  ;;  %v7720_v18 = vadd.f32 %v4717_v47, %v7278_v62  ;;  %v2930_v62 = vmul.f32 -0.5, %v7621_v45 }
0x426a   :  { %4197 = vrot.lane.b32.xlu0 %v7691_v41, %s6575_s17 }
0x426b   :  { %v1543_v12 = vadd.f32 %v1542_v11, %v7634_v44  ;;  %v452_v31 = vsel %vm451_vm0, %v450_v49, 0.0  ;;  %v2611_v44 = vpop.permute.xlu1 %2610  ;;  %v2931_v57 = vmul.f32 %v7621_v45, %v2930_v62  ;;  %v2286_v53 = vmul.f32 1.442695, %v7720_v18 }
0x426c   :  { %v2613_v42 = vadd.f32 %v2611_v44, %v7648_v48  ;;  %v3246_v48 = vmul.f32 -0.5, %v7595_v30 }
0x426d   :  { %v1544_v29 = vsub.f32 %v7055_v33, %v1543_v12  ;;  %v7726_v33 = vpop.permute.xlu0 %4501  ;;  %v2936_v27 = vsub.f32 %v2931_v57, %v2934_v26 }
0x426e   :  { %v3247_v22 = vmul.f32 %v7595_v30, %v3246_v48 }
0x426f   :  { %453 = vadd.xlane.f32.xlu1 %v452_v31  ;;  %v1546_v37 = vsel %vm1545_vm1, %v1544_v29, 0.0  ;;  %v4735_v34 = vadd.f32 -0.9189385, %v2936_v27  ;;  %v4195_v29 = vmul.f32 %v7609_v38, %v4194_v6 }
0x4273   :  { %1547 = vadd.xlane.f32.xlu1 %v1546_v37 }
0x4284   :  { %2301 = vrot.lane.b32.xlu1 %v7720_v18, %s6575_s17 }
0x4288   :  { %4519 = vrot.lane.b32.xlu1 %v2613_v42, %s6568_s29 }
0x42ad   :  { %v2927_v62 = vpop.permute.xlu1 %2926 }
0x42c6   :  { %v4492_v55 = vpop.f32.mrb[38].mxu0 }
0x42c7   :  { %v5711_v51 = vpop.f32.mrb[39].mxu0 }
0x42c9   :  { %v813_v52 = vpop.xlane.xlu0 %812 }
0x42ca   :  { %6360 = vlog2.f32 %v813_v52 }
0x42cd   :  { %v1181_v43 = vpop.xlane.xlu0 %1180 }
0x42ce   :  { %6362 = vlog2.f32 %v1181_v43 }
0x42d1   :  { %v1899_v35 = vpop.xlane.xlu0 %1898 }
0x42d4   :  { %v6361_v19 = vpop.eup %6360 }
0x42d5   :  { %v815_v5 = vmul.f32 0.6931472, %v6361_v19  ;;  %v2618_v24 = vpop.permute.xlu0 %2617 }
0x42d6   :  { %v2620_v20 = vsub.f32 %v2615_v0, %v2618_v24 }
0x42d7   :  { %v816_v23 = vadd.f32 %v815_v5, %v7669_v61  ;;  %v3878_v61 = vmul.f32 -0.5, %v7632_v14  ;;  %v4510_v5 = vmul.f32 -0.5, %v7643_v54 }
0x42d8   :  { %v6363_v2 = vpop.eup %6362  ;;  %v4727_v9 = vadd.f32 -0.9189385, %v2620_v20 }
0x42d9   :  { %v1183_v36 = vmul.f32 0.6931472, %v6363_v2  ;;  %v3250_v1 = vpop.permute.xlu0 %3249  ;;  %v817_v28 = vsub.f32 %v6895_v63, %v816_v23  ;;  %v3879_v49 = vmul.f32 %v7632_v14, %v3878_v61 }
0x42da   :  { %4558 = vrot.lane.b32.xlu1 %v4727_v9, %s6568_s29  ;;  %v3252_v17 = vsub.f32 %v3247_v22, %v3250_v1  ;;  %s6577_s29 = smov 3  }
0x42db   :  { %v1184_v45 = vadd.f32 %v1183_v36, %v7677_v56  ;;  %v819_v32 = vsel %vm818_vm2, %v817_v28, 0.0  ;;  %v4772_v56 = vld [vmem:[#allocation7 + $0xc] ss:$0 sm:$0xff] }
0x42dc   :  { %820 = vadd.xlane.f32.xlu0 %v819_v32  ;;  %v4743_v25 = vadd.f32 -0.9189385, %v3252_v17 }
0x42dd   :  { %v3566_v30 = vpop.permute.xlu0 %3565  ;;  %v1185_v46 = vsub.f32 %v6973_v58, %v1184_v45  ;;  %v7750_v58 = vadd.f32 %v4772_v56, %v4492_v55 }
0x42de   :  { %4562 = vrot.lane.b32.xlu1 %v4735_v34, %s6576_s7  ;;  %v3568_v11 = vsub.f32 %v3563_v39, %v3566_v30 }
0x42df   :  { %v1187_v63 = vsel %vm1186_vm9, %v1185_v46, 0.0  ;;  %v4498_v37 = vmul.f32 1.442695, %v7750_v58 }
0x42e0   :  { %1188 = vadd.xlane.f32.xlu0 %v1187_v63  ;;  %v4751_v60 = vadd.f32 -0.9189385, %v3568_v11 }
0x42e1   :  { %v3882_v12 = vpop.permute.xlu0 %3881  ;;  %6364 = vpow2.f32 %v4498_v37 }
0x42e2   :  { %4566 = vrot.lane.b32.xlu1 %v4743_v25, %s6577_s29  ;;  %v3884_v31 = vsub.f32 %v3879_v49, %v3882_v12  ;;  %6366 = vlog2.f32 %v1899_v35  ;;  %v2929_v35 = vadd.f32 %v2927_v62, %v7659_v59 }
0x42e3   :  { %6368 = vpow2.f32 %v2286_v53 }
0x42e4   :  { %v4759_v26 = vadd.f32 -0.9189385, %v3884_v31 }
0x42e5   :  { %v4198_v15 = vpop.permute.xlu0 %4197 }
0x42e6   :  { %4570 = vrot.lane.b32.xlu1 %v4751_v60, %s6578_s4  ;;  %v4200_v47 = vsub.f32 %v4195_v29, %v4198_v15 }
0x42e8   :  { %v4767_v14 = vadd.f32 -0.9189385, %v4200_v47 }
0x42ea   :  { %4574 = vrot.lane.b32.xlu1 %v4759_v26, %s6579_s19 }
0x42eb   :  { %v6365_v44 = vpop.eup %6364 }
0x42ec   :  { %v4504_v38 = vmul.f32 %v6365_v44, %v7726_v33  ;;  %v6367_v42 = vpop.eup %6366  ;;  %v3243_v33 = vpop.permute.xlu1 %3242 }
0x42ed   :  { %v1901_v55 = vmul.f32 0.6931472, %v6367_v42  ;;  %v6369_v0 = vpop.eup %6368 }
0x42ee   :  { %4578 = vrot.lane.b32.xlu1 %v4767_v14, %s6580_s21  ;;  %v2292_v19 = vmul.f32 %v6369_v0, %v7717_v40 }
0x42ef   :  { %v1902_v51 = vadd.f32 %v1901_v55, %v7685_v3 }
0x42f0   :  { %v3559_v3 = vpop.permute.xlu1 %3558 }
0x42f1   :  { %v1903_v52 = vsub.f32 %v7123_v10, %v1902_v51  ;;  %v3245_v10 = vadd.f32 %v3243_v33, %v7667_v13  ;;  %v3561_v50 = vadd.f32 %v3559_v3, %v7675_v16 }
0x42f3   :  { %v1905_v43 = vsel %vm1904_vm10, %v1903_v52, 0.0 }
0x42f4   :  { %v3875_v21 = vpop.permute.xlu1 %3874 }
0x42f5   :  { %v3877_v48 = vadd.f32 %v3875_v21, %v7683_v4 }
0x42f6   :  { %4513 = vrot.lane.b32.xlu0 %v7750_v58, %s6575_s17 }
0x42f8   :  { %v4191_v57 = vpop.permute.xlu1 %4190 }
0x42f9   :  { %v4193_v40 = vadd.f32 %v4191_v57, %v7691_v41 }
0x42fa   :  { %4506 = vrot.lane.b32.xlu0 %v4504_v38, %s6575_s17 }
0x4319   :  { %1906 = vadd.xlane.f32.xlu0 %v1905_v43 }
0x432f   :  { %2294 = vrot.lane.b32.xlu0 %v2292_v19, %s6575_s17 }
0x4333   :  { %4523 = vrot.lane.b32.xlu0 %v2929_v35, %s6576_s7 }
0x4337   :  { %4527 = vrot.lane.b32.xlu0 %v3245_v10, %s6577_s29 }
0x433b   :  { %4531 = vrot.lane.b32.xlu0 %v3561_v50, %s6578_s4 }
0x433f   :  { %4535 = vrot.lane.b32.xlu0 %v3877_v48, %s6579_s19 }
0x4343   :  { %4539 = vrot.lane.b32.xlu0 %v4193_v40, %s6580_s21 }
0x4369   :  { %v821_v59 = vpop.xlane.xlu0 %820 }
0x436d   :  { %v1189_v13 = vpop.xlane.xlu0 %1188 }
0x436e   :  { %6473 = shalt.err (!%p6470_p8)
}
0x436f   :  { %s6474_s1 = scalar_lea.hbm %s7868_s8, 128 }
0x4370   :  { %p6475_p9 = scmp.ne.s32.totalorder %s7868_s8, %s6474_s1  ;;  %p6478_p10 = scmp.lt.u32.totalorder %s6474_s1, %s7868_s8 }
0x4372   :  { %p6480_p11 = pnand %p6478_p10, %p6475_p9 }
0x4374   :  { %6483 = shalt.err (!%p6480_p11)
}
0x4375   :  { %4602 = dma.vmem_to_hbm [thread:$0]  %s4600_s23, 128, %s7868_s8, [#allocation4]   ;;  %v4511_v16 = vmul.f32 %v7643_v54, %v4510_v5  ;;  %v4514_v4 = vpop.permute.xlu0 %4513  ;;  %v454_v2 = vpop.xlane.xlu1 %453 }
0x4376   :  { %s6582_s12 = smov 7   ;;  %v1956_v7 = vsel %vm1946_vm15, %v454_v2, %v821_v59  ;;  %s6583_s5 = smov [#allocation11]  }
0x4377   :  { %v4516_v41 = vsub.f32 %v4511_v16, %v4514_v4  ;;  %v1957_v27 = vsel %vm1948_vm3, %v1956_v7, %v1189_v13  ;;  %s4609_s13 = sshll.u32 %s6583_s5, 4  ;;  %s4610_s13 = int_to_ptr.vmem [resolvable:$true] %s4609_s13 }
0x4378   :  { %s6484_s8 = scalar_lea.vmem %s4610_s13, 128  ;;  %p6489_p13 = scmp.lt.s32.totalorder %s4610_s13, %s4610_s13 }
0x4379   :  { %v4775_v24 = vadd.f32 -0.9189385, %v4516_v41  ;;  %v4507_v20 = vpop.permute.xlu0 %4506  ;;  %v1548_v9 = vpop.xlane.xlu1 %1547  ;;  %p6485_p12 = scmp.ne.s32.totalorder %s4610_s13, %s6484_s8  ;;  %p6490_p0 = scmp.lt.s32.totalorder %s6484_s8, %s6484_s8 }
0x437a   :  { %v4509_v23 = vadd.f32 %v4507_v20, %v7750_v58  ;;  %v1958_v22 = vsel %vm1950_vm8, %v1957_v27, %v1548_v9 }
0x437b   :  { %4582 = vrot.lane.b32.xlu1 %v4775_v24, %s6582_s12  ;;  %p6491_p1 = por %p6490_p0, %p6489_p13 }
0x437c   :  { %4543 = vrot.lane.b32.xlu0 %v4509_v23, %s6582_s12 }
0x437d   :  { %p6492_p2 = pnand %p6491_p1, %p6485_p12 }
0x43a6   :  { %v1907_v54 = vpop.xlane.xlu0 %1906 }
0x43a7   :  { %v1959_v36 = vsel %vm1952_vm13, %v1958_v22, %v1907_v54 }
0x43a8   :  { %1960 = vst.msk [vmem:[#allocation11] sm:$0xff] %vm1954_vm7, %v1959_v36 }
0x43a9   :  { %6495 = shalt.err (!%p6492_p2)
}
0x43aa   :  { %s6496_s0 = scalar_lea.hbm %s7869_s9, 128 }
0x43ab   :  { %p6497_p3 = scmp.ne.s32.totalorder %s7869_s9, %s6496_s0  ;;  %p6500_p4 = scmp.lt.u32.totalorder %s6496_s0, %s7869_s9 }
0x43ad   :  { %p6502_p5 = pnand %p6500_p4, %p6497_p3 }
0x43af   :  { %6505 = shalt.err (!%p6502_p5)
}
0x43b0   :  { %4612 = dma.vmem_to_hbm [thread:$0]  %s4610_s13, 128, %s7869_s9, [#allocation12]   ;;  %v2302_v1 = vpop.permute.xlu1 %2301  ;;  %v2295_v32 = vpop.permute.xlu0 %2294  ;;  %v2298_v30 = vmul.f32 -0.5, %v7654_v8  ;;  %vm4551_vm11 = vcmask 48128   ;;  %vm4553_vm12 = vcmask 56320   ;;  %vm4555_vm14 = vcmask 64512  }
0x43b1   :  { %v2297_v11 = vadd.f32 %v2295_v32, %v7720_v18  ;;  %s6584_s9 = smov [#allocation14]   ;;  %s6585_s19 = smov [#allocation13]  }
0x43b2   :  { %v2299_v63 = vmul.f32 %v2298_v30, %v7654_v8  ;;  %s4629_s4 = sshll.u32 %s6584_s9, 4  ;;  %s4619_s21 = sshll.u32 %s6585_s19, 4  ;;  %s4630_s4 = int_to_ptr.vmem [resolvable:$true] %s4629_s4  ;;  %s7826_s21 = int_to_ptr.vmem [resolvable:$true] %s4619_s21 }
0x43b3   :  { %s6506_s22 = scalar_lea.vmem %s4630_s4, 128  ;;  %p6511_p7 = scmp.lt.s32.totalorder %s4630_s4, %s4630_s4 }
0x43b4   :  { %v4520_v28 = vpop.permute.xlu1 %4519  ;;  %v4524_v34 = vpop.permute.xlu0 %4523  ;;  %v2304_v56 = vsub.f32 %v2299_v63, %v2302_v1  ;;  %p6507_p6 = scmp.ne.s32.totalorder %s4630_s4, %s6506_s22  ;;  %p6512_p8 = scmp.lt.s32.totalorder %s6506_s22, %s6506_s22 }
0x43b5   :  { %v4546_v60 = vsel %vm1946_vm15, %v2297_v11, %v4520_v28 }
0x43b6   :  { %v4719_v12 = vadd.f32 -0.9189385, %v2304_v56  ;;  %v4547_v37 = vsel %vm1948_vm3, %v4546_v60, %v4524_v34  ;;  %p6513_p9 = por %p6512_p8, %p6511_p7 }
0x43b8   :  { %v4559_v45 = vpop.permute.xlu1 %4558  ;;  %v4528_v39 = vpop.permute.xlu0 %4527  ;;  %p6514_p10 = pnand %p6513_p9, %p6507_p6 }
0x43b9   :  { %v4585_v58 = vsel %vm1946_vm15, %v4719_v12, %v4559_v45  ;;  %v4548_v47 = vsel %vm1950_vm8, %v4547_v37, %v4528_v39 }
0x43bc   :  { %v4563_v61 = vpop.permute.xlu1 %4562  ;;  %v4532_v6 = vpop.permute.xlu0 %4531 }
0x43bd   :  { %v4586_v31 = vsel %vm1948_vm3, %v4585_v58, %v4563_v61  ;;  %v4549_v44 = vsel %vm1952_vm13, %v4548_v47, %v4532_v6 }
0x43c0   :  { %v4567_v17 = vpop.permute.xlu1 %4566  ;;  %v4536_v49 = vpop.permute.xlu0 %4535 }
0x43c1   :  { %v4587_v15 = vsel %vm1950_vm8, %v4586_v31, %v4567_v17  ;;  %v4550_v42 = vsel %vm1954_vm7, %v4549_v44, %v4536_v49 }
0x43c4   :  { %v4571_v46 = vpop.permute.xlu1 %4570  ;;  %v4540_v26 = vpop.permute.xlu0 %4539 }
0x43c5   :  { %v4588_v8 = vsel %vm1952_vm13, %v4587_v15, %v4571_v46  ;;  %v4552_v51 = vsel %vm4551_vm11, %v4550_v42, %v4540_v26 }
0x43c8   :  { %v4575_v25 = vpop.permute.xlu1 %4574 }
0x43c9   :  { %v4589_v18 = vsel %vm1954_vm7, %v4588_v8, %v4575_v25 }
0x43cc   :  { %v4579_v29 = vpop.permute.xlu1 %4578 }
0x43cd   :  { %v4590_v14 = vsel %vm4551_vm11, %v4589_v18, %v4579_v29 }
0x43ed   :  { %v4583_v38 = vpop.permute.xlu1 %4582 }
0x43ee   :  { %v4591_v55 = vsel %vm4553_vm12, %v4590_v14, %v4583_v38  ;;  %v4544_v52 = vpop.permute.xlu0 %4543 }
0x43ef   :  { %4592 = vst.msk [vmem:[#allocation14] sm:$0xff] %vm4555_vm14, %v4591_v55  ;;  %v4554_v43 = vsel %vm4553_vm12, %v4552_v51, %v4544_v52 }
0x43f0   :  { %6517 = shalt.err (!%p6514_p10)
}
0x43f1   :  { %s6518_s18 = scalar_lea.hbm %s7871_s11, 128 }
0x43f2   :  { %p6519_p11 = scmp.ne.s32.totalorder %s7871_s11, %s6518_s18  ;;  %p6522_p12 = scmp.lt.u32.totalorder %s6518_s18, %s7871_s11 }
0x43f4   :  { %p6524_p13 = pnand %p6522_p12, %p6519_p11 }
0x43f6   :  { %6527 = shalt.err (!%p6524_p13)
}
0x43f7   :  { %4632 = dma.vmem_to_hbm [thread:$0]  %s4630_s4, 128, %s7871_s11, [#allocation15]   ;;  %4556 = vst.msk [vmem:[#allocation13] sm:$0xff] %vm4555_vm14, %v4554_v43 }
0x43f8   :  { %s6528_s3 = scalar_lea.vmem %s7826_s21, 128  ;;  %p6533_p1 = scmp.lt.s32.totalorder %s7826_s21, %s7826_s21 }
0x43f9   :  { %p6529_p0 = scmp.ne.s32.totalorder %s7826_s21, %s6528_s3  ;;  %p6534_p2 = scmp.lt.s32.totalorder %s6528_s3, %s6528_s3 }
0x43fb   :  { %p6535_p3 = por %p6534_p2, %p6533_p1 }
0x43fd   :  { %p6536_p4 = pnand %p6535_p3, %p6529_p0 }
0x43ff   :  { %6539 = shalt.err (!%p6536_p4)
}
0x4400   :  { %s6540_s5 = scalar_lea.hbm %s7870_s10, 128 }
0x4401   :  { %p6541_p5 = scmp.ne.s32.totalorder %s7870_s10, %s6540_s5  ;;  %p6544_p6 = scmp.lt.u32.totalorder %s6540_s5, %s7870_s10 }
0x4403   :  { %p6546_p7 = pnand %p6544_p6, %p6541_p5 }
0x4405   :  { %6549 = shalt.err (!%p6546_p7)
}
0x4406   :  { %4622 = dma.vmem_to_hbm [thread:$0]  %s7826_s21, 128, %s7870_s10, [#allocation12]  }
0x4407   :  { %6556 = dma.done.wait [#allocation4], 128  }
0x4408   :  { %6557 = vsyncadd [#allocation4], 4294967168 }
0x4409   :  { %6558 = dma.done.wait [#allocation12], 256  }
0x440a   :  { %6559 = vsyncadd [#allocation12], 4294967040 }
0x440b   :  { %6560 = dma.done.wait [#allocation15], 128  }
0x440c   :  { %6561 = vsyncadd [#allocation15], 4294967168 }
0x440d   :  { %4645 = vsyncpa [#allocation3], 1 }
0x440e   :  { %4646 = vsyncpa [#allocation6], 1 }
0x440f   :  { %4647 = vsyncpa [#allocation9], 1 }
0x4410   :  { %4648 = vsyncpa [#allocation4], 1 }
0x4411   :  { %4649 = vsyncpa [#allocation12], 1 }
0x4412   :  { %4650 = vsyncpa [#allocation15], 1 }

</bundles_post_ra>
